<compile_context>
chip_gen: v7x
topology: tpu7x:2x2x1
jax: 0.10.0
libtpu: 0.0.40
codegen_flags: <defaults>
</compile_context>

<pallas_src>
import jax
import jax.numpy as jnp
from jax.experimental import pallas as pl
from jax.experimental.pallas import tpu as pltpu

IN_DIM = 768
HID_DIM = 512
N_CLASSES = 2
NEG_SLOPE = 0.01    # nn.LeakyReLU default


def _leaky_relu(x):
    return jnp.where(x > 0, x, NEG_SLOPE * x)


def mlp_ce_kernel(x_ref, w1_ref, b1_ref, w2_ref, b2_ref, w3_ref, b3_ref, y_ref,
                  loss_ref, pred_ref):
    # Loss accumulator lives in the same output block across all grid steps.
    @pl.when(pl.program_id(0) == 0)
    def _():
        loss_ref[...] = jnp.zeros_like(loss_ref)

    # fc: Linear(768, 512) + LeakyReLU  (bf16 operands -> f32 MXU accumulation).
    # x arrives as f32; cast to bf16 in-kernel (free VPU work on a DMA-bound kernel).
    xb = x_ref[...].astype(jnp.bfloat16)
    h = jnp.dot(xb, w1_ref[...], preferred_element_type=jnp.float32) + b1_ref[...]
    h = _leaky_relu(h)

    # dropout(0.5): identity in eval mode (see TODO at top of file)

    # classifier[0:2]: Linear(512, 512) + LeakyReLU
    h = jnp.dot(h.astype(jnp.bfloat16), w2_ref[...],
                preferred_element_type=jnp.float32) + b2_ref[...]
    h = _leaky_relu(h)

    # classifier[2]: Linear(512, 2)  -> logits [TM, 2]
    logits = jnp.dot(h.astype(jnp.bfloat16), w3_ref[...],
                     preferred_element_type=jnp.float32) + b3_ref[...]
    pred_ref[...] = logits.astype(pred_ref.dtype)

    # CrossEntropyLoss (mean): loss_i = logsumexp(logits_i) - logits_i[y_i]
    m = jnp.max(logits, axis=-1, keepdims=True)
    lse = m + jnp.log(jnp.sum(jnp.exp(logits - m), axis=-1, keepdims=True))
    col_ids = jax.lax.broadcasted_iota(jnp.int32, logits.shape, 1)
    tgt_mask = col_ids == y_ref[...]                       # [TM, 2] via broadcast
    tgt = jnp.sum(jnp.where(tgt_mask, logits, 0.0), axis=-1, keepdims=True)

    # mean over full batch = (1 / num_tiles) * sum over tiles of per-tile mean
    tile_mean = jnp.mean(lse - tgt)
    loss_ref[...] += (tile_mean / pl.num_programs(0)).reshape(1, 1)


def prepare_params(params):
    """Cast MXU operands to bf16 once; reuse across calls (halves weight DMA bytes).
    Weights are stored transposed vs PyTorch: W[in_features, out_features]."""
    w1, b1, w2, b2, w3, b3 = params
    return (w1.astype(jnp.bfloat16), b1.astype(jnp.float32),
            w2.astype(jnp.bfloat16), b2.astype(jnp.float32),
            w3.astype(jnp.bfloat16), b3.astype(jnp.float32))


def _pick_batch_tile(B, target=512):
    """Biggest tile wins (per-step overhead ~0.35us); VMEM footprint is tiny here."""
    if B <= target:
        return B                      # single grid step; full-extent block is always legal
    for tm in (target, 256, 128, 64, 32, 16, 8):
        if B % tm == 0:
            return tm
    return B                          # ragged batch: fall back to one full-array block


def my_model_forward(x, y, prepped, batch_tile=None):
    """x: [B, 768] f32, y: [B] int32 class labels in {0, 1}."""
    w1, b1, w2, b2, w3, b3 = prepped
    B = x.shape[0]
    tm = _pick_batch_tile(B) if batch_tile is None else batch_tile
    assert B % tm == 0, f"batch {B} must be divisible by batch_tile {tm}"
    grid = (B // tm,)

    y2d = y.reshape(B, 1).astype(jnp.int32)

    flops = 2 * B * (IN_DIM * HID_DIM + HID_DIM * HID_DIM + HID_DIM * N_CLASSES)
    bytes_accessed = int(
        x.size * 4 + w1.size * 2 + w2.size * 2 + w3.size * 2
        + b1.size * 4 + b2.size * 4 + b3.size * 4
        + y2d.size * 4 + B * N_CLASSES * 4 + 4)

    loss, pred = pl.pallas_call(
        mlp_ce_kernel,
        grid=grid,
        out_shape=(
            jax.ShapeDtypeStruct((1, 1), jnp.float32),          # loss (accumulator)
            jax.ShapeDtypeStruct((B, N_CLASSES), jnp.float32),  # logits
        ),
        in_specs=[
            pl.BlockSpec((tm, IN_DIM), lambda i: (i, 0)),            # x   (tiled)
            pl.BlockSpec((IN_DIM, HID_DIM), lambda i: (0, 0)),       # w1  (resident)
            pl.BlockSpec((1, HID_DIM), lambda i: (0, 0)),            # b1
            pl.BlockSpec((HID_DIM, HID_DIM), lambda i: (0, 0)),      # w2
            pl.BlockSpec((1, HID_DIM), lambda i: (0, 0)),            # b2
            pl.BlockSpec((HID_DIM, N_CLASSES), lambda i: (0, 0)),    # w3 (no dead padding)
            pl.BlockSpec((1, N_CLASSES), lambda i: (0, 0)),          # b3
            pl.BlockSpec((tm, 1), lambda i: (i, 0)),                 # y   (tiled)
        ],
        out_specs=(
            pl.BlockSpec((1, 1), lambda i: (0, 0)),                  # loss accumulator
            pl.BlockSpec((tm, N_CLASSES), lambda i: (i, 0)),         # pred (tiled)
        ),
        compiler_params=pltpu.CompilerParams(
            # Batch axis carries the loss reduction -> "arbitrary".  On v7x, switch
            # to "parallel" only for very large batches (duplicated weight DMA per TC).
            dimension_semantics=("arbitrary",)),
        cost_estimate=pl.CostEstimate(
            flops=flops,
            transcendentals=3 * B,
            bytes_accessed=bytes_accessed),
    )(x, w1, b1, w2, b2, w3, b3, y2d)

    return loss[0, 0], pred


def init_params(key):
    """Deterministic init mimicking nn.Linear (uniform +/- 1/sqrt(fan_in)).
    Weights stored as [in_features, out_features]."""
    def linear(key, fan_in, fan_out):
        kw, kb = jax.random.split(key)
        bound = 1.0 / jnp.sqrt(fan_in)
        w = jax.random.uniform(kw, (fan_in, fan_out), jnp.float32, -bound, bound)
        b = jax.random.uniform(kb, (1, fan_out), jnp.float32, -bound, bound)
        return w, b

    k1, k2, k3 = jax.random.split(key, 3)
    w1, b1 = linear(k1, IN_DIM, HID_DIM)
    w2, b2 = linear(k2, HID_DIM, HID_DIM)
    w3, b3 = linear(k3, HID_DIM, N_CLASSES)
    return (w1, b1, w2, b2, w3, b3)


if __name__ == "__main__":
    key = jax.random.PRNGKey(0)
    kp, kx, ky = jax.random.split(key, 3)

    B = 256          # small demo batch; batch_tile=128 -> grid=(2,) exercises the pipeline
    params = init_params(kp)
    x = jax.random.normal(kx, (B, IN_DIM), dtype=jnp.float32)
    y = jax.random.randint(ky, (B,), 0, N_CLASSES, dtype=jnp.int32)

    prepped = prepare_params(params)    # bf16 weights derived once; reuse across calls
    fwd = jax.jit(my_model_forward, static_argnames=("batch_tile",))
    loss, pred = fwd(x, y, prepped, batch_tile=128)
    jax.block_until_ready((loss, pred))

    # pure-JAX reference with the same bf16 rounding applied to the MXU operands
    w1, b1, w2, b2, w3, b3 = params
    rnd = lambda a: a.astype(jnp.bfloat16).astype(jnp.float32)
    h = rnd(x) @ rnd(w1) + b1
    h = jnp.where(h > 0, h, NEG_SLOPE * h)
    h = rnd(h) @ rnd(w2) + b2
    h = jnp.where(h > 0, h, NEG_SLOPE * h)
    logits = rnd(h) @ rnd(w3) + b3
    ref_loss = jnp.mean(
        jax.nn.logsumexp(logits, axis=-1)
        - jnp.take_along_axis(logits, y[:, None], axis=-1)[:, 0])

    assert pred.shape == (B, N_CLASSES)
    assert jnp.allclose(pred, logits, atol=2e-2, rtol=2e-2)
    assert jnp.allclose(loss, ref_loss, atol=2e-2, rtol=2e-2)

    print("KERNEL_OK")
</pallas_src>

<mosaic_0001>
module attributes {stable_mosaic.version = 11 : i64} {
  func.func @mlp_ce_kernel(%arg0: i32, %arg1: memref<128x768xf32, #tpu.memory_space<vmem>>, %arg2: memref<768x512xbf16, #tpu.memory_space<vmem>>, %arg3: memref<1x512xf32, #tpu.memory_space<vmem>>, %arg4: memref<512x512xbf16, #tpu.memory_space<vmem>>, %arg5: memref<1x512xf32, #tpu.memory_space<vmem>>, %arg6: memref<512x2xbf16, #tpu.memory_space<vmem>>, %arg7: memref<1x2xf32, #tpu.memory_space<vmem>>, %arg8: memref<128x1xi32, #tpu.memory_space<vmem>>, %arg9: memref<1x1xf32, #tpu.memory_space<vmem>>, %arg10: memref<128x2xf32, #tpu.memory_space<vmem>>) attributes {dimension_semantics = [#tpu.dimension_semantics<arbitrary>], iteration_bounds = array<i64: 2>, scalar_prefetch = 0 : i64, scratch_operands = 0 : i64, tpu.core_type = #tpu.core_type<tc>, window_params = [{transform_indices = @transform_0, window_bounds = array<i64: 128, 768>}, {pipeline_mode = #tpu.pipeline_mode<synchronous>, transform_indices = @transform_1, window_bounds = array<i64: 768, 512>}, {pipeline_mode = #tpu.pipeline_mode<synchronous>, transform_indices = @transform_2, window_bounds = array<i64: 1, 512>}, {pipeline_mode = #tpu.pipeline_mode<synchronous>, transform_indices = @transform_3, window_bounds = array<i64: 512, 512>}, {pipeline_mode = #tpu.pipeline_mode<synchronous>, transform_indices = @transform_4, window_bounds = array<i64: 1, 512>}, {pipeline_mode = #tpu.pipeline_mode<synchronous>, transform_indices = @transform_5, window_bounds = array<i64: 512, 2>}, {pipeline_mode = #tpu.pipeline_mode<synchronous>, transform_indices = @transform_6, window_bounds = array<i64: 1, 2>}, {transform_indices = @transform_7, window_bounds = array<i64: 128, 1>}, {pipeline_mode = #tpu.pipeline_mode<synchronous>, transform_indices = @transform_8, window_bounds = array<i64: 1, 1>}, {transform_indices = @transform_9, window_bounds = array<i64: 128, 2>}]} {
    %c0_i32 = arith.constant 0 : i32
    %0 = arith.cmpi eq, %arg0, %c0_i32 : i32
    %1 = arith.extui %0 : i1 to i32
    %c0_i32_0 = arith.constant 0 : i32
    %2 = arith.cmpi ne, %1, %c0_i32_0 : i32
    scf.if %2 {
      %cst_35 = arith.constant 0.000000e+00 : f32
      %61 = vector.broadcast %cst_35 : f32 to vector<1x1xf32>
      %c0_36 = arith.constant 0 : index
      %c0_37 = arith.constant 0 : index
      %62 = vector.load %arg9[%c0_36, %c0_37] : memref<1x1xf32, #tpu.memory_space<vmem>>, vector<1x1xf32>
      tpu.vector_store %arg9[%c0_36, %c0_37], %61 {strides = array<i32>} : memref<1x1xf32, #tpu.memory_space<vmem>>, vector<1x1xf32>,
    } else {
    }
    %c0 = arith.constant 0 : index
    %c0_1 = arith.constant 0 : index
    %3 = vector.load %arg1[%c0, %c0_1] : memref<128x768xf32, #tpu.memory_space<vmem>>, vector<128x768xf32>
    %4 = arith.truncf %3 : vector<128x768xf32> to vector<128x768xbf16>
    %c0_2 = arith.constant 0 : index
    %c0_3 = arith.constant 0 : index
    %5 = vector.load %arg2[%c0_2, %c0_3] : memref<768x512xbf16, #tpu.memory_space<vmem>>, vector<768x512xbf16>
    %cst = arith.constant dense<0.000000e+00> : vector<128x512xf32>
    %6 = tpu.matmul %4, %5, %cst {dimension_numbers = #tpu.dot_dimension_numbers<[1], [0], [0], [1], [0, 0, 1, 1], [], []>} : vector<128x768xbf16>, vector<768x512xbf16>, vector<128x512xf32> -> vector<128x512xf32>
    %c0_4 = arith.constant 0 : index
    %c0_5 = arith.constant 0 : index
    %7 = vector.load %arg3[%c0_4, %c0_5] : memref<1x512xf32, #tpu.memory_space<vmem>>, vector<1x512xf32>
    %8 = vector.broadcast %7 : vector<1x512xf32> to vector<128x512xf32>
    %9 = arith.addf %6, %8 : vector<128x512xf32>
    %cst_6 = arith.constant 0.000000e+00 : f32
    %10 = vector.broadcast %cst_6 : f32 to vector<128x512xf32>
    %11 = arith.cmpf ogt, %9, %10 : vector<128x512xf32>
    %cst_7 = arith.constant 0.00999999977 : f32
    %12 = vector.broadcast %cst_7 : f32 to vector<128x512xf32>
    %13 = arith.mulf %12, %9 : vector<128x512xf32>
    %14 = arith.select %11, %9, %13 : vector<128x512xi1>, vector<128x512xf32>
    %15 = arith.truncf %14 : vector<128x512xf32> to vector<128x512xbf16>
    %c0_8 = arith.constant 0 : index
    %c0_9 = arith.constant 0 : index
    %16 = vector.load %arg4[%c0_8, %c0_9] : memref<512x512xbf16, #tpu.memory_space<vmem>>, vector<512x512xbf16>
    %cst_10 = arith.constant dense<0.000000e+00> : vector<128x512xf32>
    %17 = tpu.matmul %15, %16, %cst_10 {dimension_numbers = #tpu.dot_dimension_numbers<[1], [0], [0], [1], [0, 0, 1, 1], [], []>} : vector<128x512xbf16>, vector<512x512xbf16>, vector<128x512xf32> -> vector<128x512xf32>
    %c0_11 = arith.constant 0 : index
    %c0_12 = arith.constant 0 : index
    %18 = vector.load %arg5[%c0_11, %c0_12] : memref<1x512xf32, #tpu.memory_space<vmem>>, vector<1x512xf32>
    %19 = vector.broadcast %18 : vector<1x512xf32> to vector<128x512xf32>
    %20 = arith.addf %17, %19 : vector<128x512xf32>
    %cst_13 = arith.constant 0.000000e+00 : f32
    %21 = vector.broadcast %cst_13 : f32 to vector<128x512xf32>
    %22 = arith.cmpf ogt, %20, %21 : vector<128x512xf32>
    %cst_14 = arith.constant 0.00999999977 : f32
    %23 = vector.broadcast %cst_14 : f32 to vector<128x512xf32>
    %24 = arith.mulf %23, %20 : vector<128x512xf32>
    %25 = arith.select %22, %20, %24 : vector<128x512xi1>, vector<128x512xf32>
    %26 = arith.truncf %25 : vector<128x512xf32> to vector<128x512xbf16>
    %c0_15 = arith.constant 0 : index
    %c0_16 = arith.constant 0 : index
    %27 = vector.load %arg6[%c0_15, %c0_16] : memref<512x2xbf16, #tpu.memory_space<vmem>>, vector<512x2xbf16>
    %cst_17 = arith.constant dense<0.000000e+00> : vector<128x2xf32>
    %28 = tpu.matmul %26, %27, %cst_17 {dimension_numbers = #tpu.dot_dimension_numbers<[1], [0], [0], [1], [0, 0, 1, 1], [], []>} : vector<128x512xbf16>, vector<512x2xbf16>, vector<128x2xf32> -> vector<128x2xf32>
    %c0_18 = arith.constant 0 : index
    %c0_19 = arith.constant 0 : index
    %29 = vector.load %arg7[%c0_18, %c0_19] : memref<1x2xf32, #tpu.memory_space<vmem>>, vector<1x2xf32>
    %30 = vector.broadcast %29 : vector<1x2xf32> to vector<128x2xf32>
    %31 = arith.addf %28, %30 : vector<128x2xf32>
    %c0_20 = arith.constant 0 : index
    %c0_21 = arith.constant 0 : index
    %32 = vector.load %arg10[%c0_20, %c0_21] : memref<128x2xf32, #tpu.memory_space<vmem>>, vector<128x2xf32>
    tpu.vector_store %arg10[%c0_20, %c0_21], %31 {strides = array<i32>} : memref<128x2xf32, #tpu.memory_space<vmem>>, vector<128x2xf32>,
    %cst_22 = arith.constant dense<0xFF800000> : vector<128xf32>
    %33 = vector.multi_reduction <maximumf>, %31, %cst_22 [1] : vector<128x2xf32> to vector<128xf32>
    %34 = vector.shape_cast %33 : vector<128xf32> to vector<128x1xf32>
    %35 = vector.broadcast %34 : vector<128x1xf32> to vector<128x2xf32>
    %36 = arith.subf %31, %35 : vector<128x2xf32>
    %37 = math.exp %36 : vector<128x2xf32>
    %cst_23 = arith.constant dense<0.000000e+00> : vector<128xf32>
    %38 = vector.multi_reduction <add>, %37, %cst_23 [1] : vector<128x2xf32> to vector<128xf32>
    %39 = vector.shape_cast %38 : vector<128xf32> to vector<128x1xf32>
    %40 = math.log %39 : vector<128x1xf32>
    %41 = arith.addf %34, %40 : vector<128x1xf32>
    %42 = tpu.iota {dimensions = array<i32: 1>} : vector<128x2xi32>
    %c0_24 = arith.constant 0 : index
    %c0_25 = arith.constant 0 : index
    %43 = vector.load %arg8[%c0_24, %c0_25] : memref<128x1xi32, #tpu.memory_space<vmem>>, vector<128x1xi32>
    %44 = vector.broadcast %43 : vector<128x1xi32> to vector<128x2xi32>
    %45 = arith.cmpi eq, %42, %44 : vector<128x2xi32>
    %cst_26 = arith.constant 0.000000e+00 : f32
    %46 = vector.broadcast %cst_26 : f32 to vector<128x2xf32>
    %47 = arith.select %45, %31, %46 : vector<128x2xi1>, vector<128x2xf32>
    %cst_27 = arith.constant dense<0.000000e+00> : vector<128xf32>
    %48 = vector.multi_reduction <add>, %47, %cst_27 [1] : vector<128x2xf32> to vector<128xf32>
    %49 = vector.shape_cast %48 : vector<128xf32> to vector<128x1xf32>
    %50 = arith.subf %41, %49 : vector<128x1xf32>
    %51 = vector.shape_cast %50 : vector<128x1xf32> to vector<1x128x1xf32>
    %cst_28 = arith.constant dense<0.000000e+00> : vector<1xf32>
    %52 = vector.multi_reduction <add>, %51, %cst_28 [1, 2] : vector<1x128x1xf32> to vector<1xf32>
    %53 = vector.shape_cast %52 : vector<1xf32> to vector<1x1x1xf32>
    %54 = vector.extract %53[0, 0, 0] : f32 from vector<1x1x1xf32>
    %cst_29 = arith.constant 1.280000e+02 : f32
    %55 = arith.divf %54, %cst_29 : f32
    %c0_30 = arith.constant 0 : index
    %c0_31 = arith.constant 0 : index
    %56 = vector.load %arg9[%c0_30, %c0_31] : memref<1x1xf32, #tpu.memory_space<vmem>>, vector<1x1xf32>
    %cst_32 = arith.constant 2.000000e+00 : f32
    %57 = arith.divf %55, %cst_32 : f32
    %58 = vector.broadcast %57 : f32 to vector<1x1xf32>
    %59 = arith.addf %56, %58 : vector<1x1xf32>
    %c0_33 = arith.constant 0 : index
    %c0_34 = arith.constant 0 : index
    %60 = vector.load %arg9[%c0_33, %c0_34] : memref<1x1xf32, #tpu.memory_space<vmem>>, vector<1x1xf32>
    tpu.vector_store %arg9[%c0_33, %c0_34], %59 {strides = array<i32>} : memref<1x1xf32, #tpu.memory_space<vmem>>, vector<1x1xf32>,
    return
  }
  func.func @transform_0(%arg0: i32) -> (i32, i32) {
    %c0_i32 = arith.constant 0 : i32
    %c0_i32_0 = arith.constant 0 : i32
    return %arg0, %c0_i32 : i32, i32
  }
  func.func @transform_1(%arg0: i32) -> (i32, i32) {
    %c0_i32 = arith.constant 0 : i32
    %c0_i32_0 = arith.constant 0 : i32
    %c0_i32_1 = arith.constant 0 : i32
    return %c0_i32, %c0_i32_0 : i32, i32
  }
  func.func @transform_2(%arg0: i32) -> (i32, i32) {
    %c0_i32 = arith.constant 0 : i32
    %c0_i32_0 = arith.constant 0 : i32
    %c0_i32_1 = arith.constant 0 : i32
    return %c0_i32, %c0_i32_0 : i32, i32
  }
  func.func @transform_3(%arg0: i32) -> (i32, i32) {
    %c0_i32 = arith.constant 0 : i32
    %c0_i32_0 = arith.constant 0 : i32
    %c0_i32_1 = arith.constant 0 : i32
    return %c0_i32, %c0_i32_0 : i32, i32
  }
  func.func @transform_4(%arg0: i32) -> (i32, i32) {
    %c0_i32 = arith.constant 0 : i32
    %c0_i32_0 = arith.constant 0 : i32
    %c0_i32_1 = arith.constant 0 : i32
    return %c0_i32, %c0_i32_0 : i32, i32
  }
  func.func @transform_5(%arg0: i32) -> (i32, i32) {
    %c0_i32 = arith.constant 0 : i32
    %c0_i32_0 = arith.constant 0 : i32
    %c0_i32_1 = arith.constant 0 : i32
    return %c0_i32, %c0_i32_0 : i32, i32
  }
  func.func @transform_6(%arg0: i32) -> (i32, i32) {
    %c0_i32 = arith.constant 0 : i32
    %c0_i32_0 = arith.constant 0 : i32
    %c0_i32_1 = arith.constant 0 : i32
    return %c0_i32, %c0_i32_0 : i32, i32
  }
  func.func @transform_7(%arg0: i32) -> (i32, i32) {
    %c0_i32 = arith.constant 0 : i32
    %c0_i32_0 = arith.constant 0 : i32
    return %arg0, %c0_i32 : i32, i32
  }
  func.func @transform_8(%arg0: i32) -> (i32, i32) {
    %c0_i32 = arith.constant 0 : i32
    %c0_i32_0 = arith.constant 0 : i32
    %c0_i32_1 = arith.constant 0 : i32
    return %c0_i32, %c0_i32_0 : i32, i32
  }
  func.func @transform_9(%arg0: i32) -> (i32, i32) {
    %c0_i32 = arith.constant 0 : i32
    %c0_i32_0 = arith.constant 0 : i32
    return %arg0, %c0_i32 : i32, i32
  }
}

</mosaic_0001>

<bundles_post_ra>
// kernel: my_model_forward.1
= control target key start
LH: loop header
LB: loop body
LE: loop exit
PB: predicated region body
PF: predicated region fallthrough
CT: control target
= control target key end

     0   :  { %15 = vsyncpa [#allocation3], 0  ;;  %s8436_s0 = inlined_call_operand.hbm [shape: f32[256,768], index: 0, kind: input, shape index: {}]   ;;  %s8437_s1 = inlined_call_operand.hbm [shape: bf16[768,512], index: 1, kind: input, shape index: {}]   ;;  %s8438_s2 = inlined_call_operand.vmem [shape: f32[1,512], index: 2, kind: input, shape index: {}]   ;;  %s8439_s3 = inlined_call_operand.hbm [shape: bf16[512,512], index: 3, kind: input, shape index: {}]   ;;  %s8440_s4 = inlined_call_operand.vmem [shape: f32[1,512], index: 4, kind: input, shape index: {}]   ;;  %s8441_s5 = inlined_call_operand.vmem [shape: bf16[512,2], index: 5, kind: input, shape index: {}]   ;;  %s8442_s6 = inlined_call_operand.vmem [shape: f32[1,2], index: 6, kind: input, shape index: {}]   ;;  %s8443_s7 = inlined_call_operand.vmem [shape: s32[256,1], index: 7, kind: input, shape index: {}]   ;;  %s8444_s8 = inlined_call_operand.hbm [shape: f32[1,1], index: 8, kind: output, shape index: {0}]   ;;  %s8445_s9 = inlined_call_operand.vmem [shape: f32[256,2], index: 9, kind: output, shape index: {1}]  }
   0x1   :  { %17 = vsyncpa [#allocation3 + $0x1], 0 }
   0x2   :  { %18 = vsyncpa [#allocation6], 0 }
   0x3   :  { %19 = vsyncpa [#allocation4], 0  ;;  %s6795_s30 = smov 0   ;;  %s6797_s10 = smov 0  }
   0x4   :  { %s6799_s11 = smov 0   ;;  %s6801_s12 = smov 0  }
   0x5 LB: > { %s6814_s13 = sadd.s32 4294967295, %s6733_s12   ;;  %p45_p0 = scmp.ne.s32.totalorder %s6725_s10, %s6721_s30  ;;  %s6733_s12 = sphi %s6801_s12, %s8520_s12   ;;  %s6729_s11 = sphi %s6799_s11, %s8519_s11   ;;  %s6725_s10 = sphi %s6797_s10, %s8518_s10   ;;  %s6721_s30 = sphi %s6795_s30, %s8517_s30  }
   0x6   : > { %p8446_p1 = scmp.eq.s32.totalorder %s6814_s13, 0  ;;  %p5103_p2 = scmp.ge.s32.totalorder %s6733_s12, 1 }
   0x7   : > { %p255_p3 = scmp.lt.s32.totalorder %s6733_s12, 3  ;;  %s6735_s16 = smov [#allocation5]  }
   0x8   : > { %p6823_p5 = por %p8446_p1, %p45_p0  ;;  %s267_s17 = sshll.u32 %s6735_s16, 4  ;;  %s268_s17 = int_to_ptr.vmem [resolvable:$true] %s267_s17 }
   0x9   : > { %p6827_p6 = pnand %p5103_p2, %p255_p3  ;;  %s6736_s19 = smov [#allocation7]  }
   0xa   : > { %s8462_s14 = scalar_select %p6823_p5, 1, 0 }
   0xb   : > { %s8463_s15 = scalar_select %p6827_p6, 1, 0 }
   0xc   : > { %p5942_p7 = pneg %p6827_p6  ;;  %s283_s20 = sshll.u32 %s6736_s19, 4  ;;  %s6839_s20 = int_to_ptr.vmem [resolvable:$true] %s283_s20 }
   0xd   : > { %s6579_s23 = scalar_lea.hbm %s8437_s1, 24576 }
   0xe   : > { %p6835_p8 = pnand %p5942_p7, %p8446_p1  ;;  %p6580_p9 = scmp.ne.s32.totalorder %s8437_s1, %s6579_s23 }
   0xf   : > { %p6586_p13 = scmp.lt.u32.totalorder %s6579_s23, %s8437_s1 }
  0x10   : > { %p6581_p10 = pneg %p6835_p8 }
  0x12   : > { %p6582_p11 = pnand %p6581_p10, %p6580_p9 }
  0x14   : > { %p6583_p12 = pneg %p6582_p11 }
  0x16   : > { %p6588_p0 = pnand %p6586_p13, %p6583_p12 }
  0x18   : > { %6591 = shalt.err (!%p6588_p0)
}
  0x19   : > { %s6592_s28 = scalar_lea.vmem %s268_s17, 24576  ;;  %p6600_p4 = scmp.lt.s32.totalorder %s268_s17, %s268_s17 }
  0x1a   : > { %p6593_p2 = scmp.ne.s32.totalorder %s268_s17, %s6592_s28  ;;  %p6601_p1 = scmp.lt.s32.totalorder %s6592_s28, %s6592_s28 }
  0x1c   : > { %p6595_p3 = pnand %p6593_p2, %p6581_p10  ;;  %p6602_p5 = por %p6601_p1, %p6600_p4 }
  0x1e   : > { %p6596_p7 = pneg %p6595_p3 }
  0x20   : > { %p6603_p6 = pnand %p6602_p5, %p6596_p7 }
  0x22   : > { %6606 = shalt.err (!%p6603_p6)
}
  0x23   : > { %s6737_s29 = smov 256   ;;  %s6738_s30 = smov 16  }
  0x24   : > { %5945 = dma.hbm_to_vmem [thread:$0]  (!%p6835_p8), %s8437_s1, 24576, %s268_s17, [#allocation6], %s6737_s29, %s6737_s29, %s6738_s30  }
  0x25   : > { %s6607_s23 = scalar_lea.hbm %s8439_s3, 16384 }
  0x26   : > { %p6608_p9 = scmp.ne.s32.totalorder %s8439_s3, %s6607_s23  ;;  %p6614_p5 = scmp.lt.u32.totalorder %s6607_s23, %s8439_s3 }
  0x28   : > { %p6610_p1 = pnand %p6608_p9, %p6581_p10 }
  0x2a   : > { %p6611_p4 = pneg %p6610_p1 }
  0x2c   : > { %p6616_p6 = pnand %p6614_p5, %p6611_p4 }
  0x2e   : > { %6619 = shalt.err (!%p6616_p6)
}
  0x2f   : > { %s6620_s17 = scalar_lea.vmem %s6839_s20, 16384  ;;  %p6628_p0 = scmp.lt.s32.totalorder %s6839_s20, %s6839_s20 }
  0x30   : > { %p6621_p11 = scmp.ne.s32.totalorder %s6839_s20, %s6620_s17  ;;  %p6629_p2 = scmp.lt.s32.totalorder %s6620_s17, %s6620_s17 }
  0x32   : > { %p6623_p12 = pnand %p6621_p11, %p6581_p10  ;;  %p6630_p3 = por %p6629_p2, %p6628_p0 }
  0x34   : > { %p6624_p13 = pneg %p6623_p12 }
  0x36   : > { %p6631_p7 = pnand %p6630_p3, %p6624_p13 }
  0x38   : > { %6634 = shalt.err (!%p6631_p7)
}
  0x39   : > { %5948 = dma.hbm_to_vmem [thread:$0]  (!%p6835_p8), %s8439_s3, 16384, %s6839_s20, [#allocation6], %s6737_s29, %s6737_s29, %s6738_s30  }
  0x3a   : > { %s6889_s19 = sadd.s32 1, %s6733_s12   ;;  %s32_s21 = sadd.s32 1, %s6729_s11 }
  0x3b   : > { %s29_s18 = ssub.s32 %s6733_s12, %s6889_s19  ;;  %p39_p10 = scmp.ne.s32.totalorder %s6729_s11, %s6725_s10 }
  0x3c   : > { %p30_p9 = scmp.eq.s32.totalorder %s29_s18, 0  ;;  %p40_p1 = scmp.eq.s32.totalorder %s6733_s12, 0 }
  0x3d   : > { %p5955_p4 = scmp.lt.s32.totalorder %s6733_s12, 2  ;;  %s306_s22 = sand.u32 1, %s6729_s11  }
  0x3e   : > { %s6900_s23 = scalar_select %p30_p9, %s6729_s11, %s32_s21  }
  0x3f   : > { %p41_p5 = por %p40_p1, %p39_p10  ;;  %s5923_s24 = smul.u32 768, %s306_s22 }
  0x40   : > { %s5924_s25 = smul.u32 12288, %s6733_s12  ;;  %s6914_s12 = scalar_lea.sflag [#allocation3], %s306_s22 }
  0x41   : > { %p6903_p6 = pnand %p5955_p4, %p41_p5  ;;  %s310_s27 = scalar_lea.vmem [#allocation2], %s5923_s24 }
  0x42   : > { %s6910_s30 = scalar_lea.hbm %s8436_s0, %s5924_s25  ;;  %s318_s17 = sshll.u32 %s310_s27, 4  ;;  %s6912_s17 = int_to_ptr.vmem [resolvable:$true] %s318_s17 }
  0x43   : > { %s6635_s28 = scalar_lea.hbm %s6910_s30, 12288  ;;  %p6637_p11 = pneg %p6903_p6 }
  0x44   : > { %p6636_p8 = scmp.ne.s32.totalorder %s6910_s30, %s6635_s28  ;;  %s6640_s18 = scalar_lea.hbm %s8436_s0, 24576 }
  0x45   : > { %p6641_p0 = scmp.lt.u32.totalorder %s6910_s30, %s8436_s0  ;;  %p6642_p2 = scmp.lt.u32.totalorder %s6640_s18, %s6635_s28 }
  0x46   : > { %p6638_p12 = pnand %p6637_p11, %p6636_p8  ;;  %p6644_p7 = scmp.lt.u32.totalorder %s6635_s28, %s6910_s30 }
  0x47   : > { %p6643_p3 = por %p6642_p2, %p6641_p0 }
  0x48   : > { %p6639_p13 = pneg %p6638_p12 }
  0x49   : > { %p6645_p10 = por %p6644_p7, %p6643_p3 }
  0x4b   : > { %p6646_p9 = pnand %p6645_p10, %p6639_p13 }
  0x4d   : > { %6649 = shalt.err (!%p6646_p9)
}
  0x4e   : > { %s6650_s22 = scalar_lea.vmem %s6912_s17, 12288  ;;  %s6739_s24 = smov [#allocation2]  }
  0x4f   : > { %p6651_p1 = scmp.ne.s32.totalorder %s6912_s17, %s6650_s22  ;;  %s6655_s29 = sshll.u32 %s6739_s24, 4  ;;  %s6656_s29 = int_to_ptr.vmem [resolvable:$false] %s6655_s29 }
  0x50   : > { %s6657_s27 = scalar_lea.vmem %s6656_s29, 24576  ;;  %p6658_p8 = scmp.lt.s32.totalorder %s6912_s17, %s6656_s29 }
  0x51   : > { %p6653_p4 = pnand %p6651_p1, %p6637_p11  ;;  %p6659_p12 = scmp.lt.s32.totalorder %s6657_s27, %s6650_s22 }
  0x53   : > { %p6654_p5 = pneg %p6653_p4  ;;  %p6660_p0 = por %p6659_p12, %p6658_p8 }
  0x55   : > { %p6661_p2 = pnand %p6660_p0, %p6654_p5 }
  0x57   : > { %6664 = shalt.err (!%p6661_p2)
}
  0x58   : > { %s6740_s28 = smov 768   ;;  %s6741_s16 = smov 48  }
  0x59   : > { %5952 = dma.hbm_to_vmem [thread:$0]  (!%p6903_p6), %s6910_s30, 12288, %s6912_s17, %s6914_s12, %s6740_s28, %s6740_s28, %s6741_s16  }
  0x5a   : > { %p8466_p11 = scmp.ne.s32.totalorder %s8463_s15, 0 }
  0x5c   : > { %339 = sbr.rel (%p8466_p11) target bundleno = 1666 (0x682), region = 52 }
  0x63   : > { %s341_s21 = sand.u32 1, %s6725_s10   ;;  %p8467_p13 = scmp.ne.s32.totalorder %s8462_s14, 0 }
  0x64   : > { %s5925_s18 = smul.u32 768, %s341_s21  ;;  %s342_s25 = scalar_lea.sflag [#allocation3], %s341_s21 }
  0x66   : > { %s6945_s20 = scalar_lea.vmem [#allocation2], %s5925_s18 }
  0x67   : > { %6708 = dma.done.wait (%p8467_p13), %s342_s25, 12288  }
  0x68   : > { %6710 = vsyncadd (%p8467_p13), %s342_s25, 4294955008  ;;  %p8468_p3 = scmp.eq.s32.totalorder %s6814_s13, 0 }
  0x6a   : > { %6712 = dma.done.wait (%p8468_p3), [#allocation6], 40960   ;;  %p8469_p6 = pmov %p8468_p3 }
  0x6b   : > { %s5113_s15 = sshll.u32 %s6814_s13, 4  ;;  %p8470_p10 = scmp.ne.s32.totalorder %s6814_s13, 0 }
  0x6c   : > { %6714 = vsyncadd (%p8469_p6), [#allocation6], 4294926336  ;;  %p395_p7 = scmp.lt.s32.totalorder %s5113_s15, 31  ;;  %vm411_vm0 = vcmask (!%p8470_p10), 0   ;;  %v6742_v0 = vmov (!%p8470_p10), 0.0  }
  0x6d   : > { %410 = sbr.rel (%p8470_p10) target bundleno = 116 (0x74), region = 68  ;;  %412 = vst.msk [vmem:[#allocation8] sm:$0x1] (!%p8470_p10), %vm411_vm0, %v6742_v0 }
  0x6e   : > { %s8522_s15 = smov (!%p395_p7, %s5113_s15), 31 }
  0x6f   : > { %s5114_s26 = sshll.u32 %s8522_s15, 3 }
  0x70   : > { %s6959_s12 = scalar_lea.vmem %s8443_s7, %s5114_s26  ;;  %s6964_s14 = scalar_lea.vmem %s8445_s9, %s5114_s26 }
  0x74 PF: > { %v6003_v1 = vld [vmem:[#allocation5 + $0x4] ss:$16 sps:$4 sm:$0xff]   ;;  %v6005_v2 = vld [vmem:[#allocation5 + $0xc] ss:$16 sps:$4 sm:$0xff]   ;;  %v6007_v3 = vld [vmem:[#allocation5] ss:$16 sps:$4 sm:$0xff]  }
  0x75   : > { %1731 = vmatprep.subr.bf16.mxu0 %v6003_v1  ;;  %v6008_v4 = vld [vmem:[#allocation5 + $0x8] ss:$16 sps:$4 sm:$0xff]   ;;  %2070 = vmatprep.subr.bf16.mxu1 %v6005_v2  ;;  %v6009_v5 = vld [vmem:[#allocation5 + $0x24] ss:$16 sps:$4 sm:$0xff]   ;;  %v6011_v6 = vld [vmem:[#allocation5 + $0x2c] ss:$16 sps:$4 sm:$0xff]  }
  0x76   : > { %1732 = vmatpush1.bf16.msra.mxu0 %v6007_v3  ;;  %2071 = vmatpush1.bf16.msra.mxu1 %v6008_v4  ;;  %v6013_v7 = vld [vmem:[#allocation5 + $0x20] ss:$16 sps:$4 sm:$0xff]   ;;  %v6014_v8 = vld [vmem:[#allocation5 + $0x28] ss:$16 sps:$4 sm:$0xff]   ;;  %v6015_v9 = vld [vmem:[#allocation5 + $0x44] ss:$16 sps:$4 sm:$0xff]  }
  0x77   : > { %1733 = vmatprep.subr.bf16.mxu0 %v6009_v5  ;;  %2072 = vmatprep.subr.bf16.mxu1 %v6011_v6  ;;  %v6017_v10 = vld [vmem:[#allocation5 + $0x4c] ss:$16 sps:$4 sm:$0xff]   ;;  %v6019_v11 = vld [vmem:[#allocation5 + $0x40] ss:$16 sps:$4 sm:$0xff]   ;;  %v6020_v12 = vld [vmem:[#allocation5 + $0x48] ss:$16 sps:$4 sm:$0xff]  }
  0x78   : > { %v6021_v13 = vld [vmem:[#allocation5 + $0x64] ss:$16 sps:$4 sm:$0xff]   ;;  %v6023_v14 = vld [vmem:[#allocation5 + $0x6c] ss:$16 sps:$4 sm:$0xff]   ;;  %v6025_v15 = vld [vmem:[#allocation5 + $0x60] ss:$16 sps:$4 sm:$0xff]  }
  0x79   : > { %v6026_v16 = vld [vmem:[#allocation5 + $0x68] ss:$16 sps:$4 sm:$0xff]   ;;  %v6027_v17 = vld [vmem:[#allocation5 + $0x84] ss:$16 sps:$4 sm:$0xff]   ;;  %v6029_v18 = vld [vmem:[#allocation5 + $0x8c] ss:$16 sps:$4 sm:$0xff]  }
  0x7a   : > { %1734 = vmatpush1.bf16.msra.mxu0 %v6013_v7  ;;  %2073 = vmatpush1.bf16.msra.mxu1 %v6014_v8  ;;  %v6031_v19 = vld [vmem:[#allocation5 + $0x80] ss:$16 sps:$4 sm:$0xff]   ;;  %v6032_v20 = vld [vmem:[#allocation5 + $0x88] ss:$16 sps:$4 sm:$0xff]   ;;  %v6033_v21 = vld [vmem:[#allocation5 + $0xa4] ss:$16 sps:$4 sm:$0xff]  }
  0x7b   : > { %1735 = vmatprep.subr.bf16.mxu0 %v6015_v9  ;;  %2074 = vmatprep.subr.bf16.mxu1 %v6017_v10  ;;  %v6035_v22 = vld [vmem:[#allocation5 + $0xac] ss:$16 sps:$4 sm:$0xff]   ;;  %v6037_v23 = vld [vmem:[#allocation5 + $0xa0] ss:$16 sps:$4 sm:$0xff]   ;;  %v6038_v24 = vld [vmem:[#allocation5 + $0xa8] ss:$16 sps:$4 sm:$0xff]  }
  0x7c   : > { %v6039_v25 = vld [vmem:[#allocation5 + $0xc4] ss:$16 sps:$4 sm:$0xff]   ;;  %v6041_v26 = vld [vmem:[#allocation5 + $0xcc] ss:$16 sps:$4 sm:$0xff]   ;;  %v6043_v27 = vld [vmem:[#allocation5 + $0xc0] ss:$16 sps:$4 sm:$0xff]  }
  0x7d   : > { %v6044_v28 = vld [vmem:[#allocation5 + $0xc8] ss:$16 sps:$4 sm:$0xff]   ;;  %v6045_v29 = vld [vmem:[#allocation5 + $0xe4] ss:$16 sps:$4 sm:$0xff]   ;;  %v6047_v30 = vld [vmem:[#allocation5 + $0xec] ss:$16 sps:$4 sm:$0xff]  }
  0x7e   : > { %1736 = vmatpush1.bf16.msra.mxu0 %v6019_v11  ;;  %2075 = vmatpush1.bf16.msra.mxu1 %v6020_v12  ;;  %v6049_v31 = vld [vmem:[#allocation5 + $0xe0] ss:$16 sps:$4 sm:$0xff]   ;;  %v6050_v32 = vld [vmem:[#allocation5 + $0xe8] ss:$16 sps:$4 sm:$0xff]   ;;  %v6051_v33 = vld [vmem:[#allocation5 + $0x104] ss:$16 sps:$4 sm:$0xff]  }
  0x7f   : > { %1737 = vmatprep.subr.bf16.mxu0 %v6021_v13  ;;  %2076 = vmatprep.subr.bf16.mxu1 %v6023_v14  ;;  %v6053_v34 = vld [vmem:[#allocation5 + $0x10c] ss:$16 sps:$4 sm:$0xff]   ;;  %v6055_v35 = vld [vmem:[#allocation5 + $0x100] ss:$16 sps:$4 sm:$0xff]   ;;  %v6056_v36 = vld [vmem:[#allocation5 + $0x108] ss:$16 sps:$4 sm:$0xff]  }
  0x80   : > { %v6057_v37 = vld [vmem:[#allocation5 + $0x124] ss:$16 sps:$4 sm:$0xff]   ;;  %v6059_v38 = vld [vmem:[#allocation5 + $0x12c] ss:$16 sps:$4 sm:$0xff]   ;;  %v6061_v39 = vld [vmem:[#allocation5 + $0x120] ss:$16 sps:$4 sm:$0xff]  }
  0x81   : > { %v6062_v40 = vld [vmem:[#allocation5 + $0x128] ss:$16 sps:$4 sm:$0xff]   ;;  %v6063_v41 = vld [vmem:[#allocation5 + $0x144] ss:$16 sps:$4 sm:$0xff]   ;;  %v6065_v42 = vld [vmem:[#allocation5 + $0x14c] ss:$16 sps:$4 sm:$0xff]  }
  0x82   : > { %1738 = vmatpush1.bf16.msra.mxu0 %v6025_v15  ;;  %2077 = vmatpush1.bf16.msra.mxu1 %v6026_v16  ;;  %v6067_v43 = vld [vmem:[#allocation5 + $0x140] ss:$16 sps:$4 sm:$0xff]   ;;  %v6068_v44 = vld [vmem:[#allocation5 + $0x148] ss:$16 sps:$4 sm:$0xff]   ;;  %v6069_v45 = vld [vmem:[#allocation5 + $0x164] ss:$16 sps:$4 sm:$0xff]  }
  0x83   : > { %1739 = vmatprep.subr.bf16.mxu0 %v6027_v17  ;;  %2078 = vmatprep.subr.bf16.mxu1 %v6029_v18  ;;  %v6071_v46 = vld [vmem:[#allocation5 + $0x16c] ss:$16 sps:$4 sm:$0xff]   ;;  %v6073_v48 = vld [vmem:[#allocation5 + $0x160] ss:$16 sps:$4 sm:$0xff]   ;;  %v6074_v49 = vld [vmem:[#allocation5 + $0x168] ss:$16 sps:$4 sm:$0xff]  }
  0x84   : > { %v414_v47 = vld [vmem:[%s6945_s20 + $0x8] sm:$0xff]  ;;  %v420_v50 = vld [vmem:[%s6945_s20 + $0x38] sm:$0xff]  ;;  %v6075_v51 = vld [vmem:[#allocation5 + $0x184] ss:$16 sps:$4 sm:$0xff]   ;;  %s6744_s27 = smov [#allocation8]   ;;  %p5958_p9 = scmp.eq.s32.totalorder %s6814_s13, 1 }
  0x85   : > { %v510_v52 = vpack.c.bf16 %v420_v50, %v414_v47  ;;  %v6077_v53 = vld [vmem:[#allocation5 + $0x18c] ss:$16 sps:$4 sm:$0xff]   ;;  %v6079_v54 = vld [vmem:[#allocation5 + $0x180] ss:$16 sps:$4 sm:$0xff]   ;;  %v6080_v55 = vld [vmem:[#allocation5 + $0x188] ss:$16 sps:$4 sm:$0xff]  }
  0x86   : > { %1740 = vmatpush1.bf16.msra.mxu0 %v6031_v19  ;;  %2079 = vmatpush1.bf16.msra.mxu1 %v6032_v20  ;;  %v6081_v56 = vld [vmem:[#allocation5 + $0x1a4] ss:$16 sps:$4 sm:$0xff]   ;;  %v6083_v57 = vld [vmem:[#allocation5 + $0x1ac] ss:$16 sps:$4 sm:$0xff]   ;;  %v6085_v58 = vld [vmem:[#allocation5 + $0x1a0] ss:$16 sps:$4 sm:$0xff]  }
  0x87   : > { %1741 = vmatprep.subr.bf16.mxu0 %v6033_v21  ;;  %2080 = vmatprep.subr.bf16.mxu1 %v6035_v22  ;;  %v6086_v59 = vld [vmem:[#allocation5 + $0x1a8] ss:$16 sps:$4 sm:$0xff]   ;;  %v6087_v60 = vld [vmem:[#allocation5 + $0x1c4] ss:$16 sps:$4 sm:$0xff]   ;;  %v6089_v61 = vld [vmem:[#allocation5 + $0x1cc] ss:$16 sps:$4 sm:$0xff]  }
  0x88   : > { %1763 = vmatprep.mubr.bf16.mxu0 %v510_v52  ;;  %2102 = vmatprep.mubr.bf16.mxu1 %v510_v52  ;;  %v6091_v62 = vld [vmem:[#allocation5 + $0x1c0] ss:$16 sps:$4 sm:$0xff]   ;;  %v6092_v63 = vld [vmem:[#allocation5 + $0x1c8] ss:$16 sps:$4 sm:$0xff]   ;;  %v6093_v0 = vld [vmem:[#allocation5 + $0x1e4] ss:$16 sps:$4 sm:$0xff]  }
  0x89   : > { %v6095_v1 = vld [vmem:[#allocation5 + $0x1ec] ss:$16 sps:$4 sm:$0xff]   ;;  %v6097_v2 = vld [vmem:[#allocation5 + $0x1e0] ss:$16 sps:$4 sm:$0xff]   ;;  %v6098_v3 = vld [vmem:[#allocation5 + $0x1e8] ss:$16 sps:$4 sm:$0xff]  }
  0x8a   : > { %1742 = vmatpush1.bf16.msra.mxu0 %v6037_v23  ;;  %2081 = vmatpush1.bf16.msra.mxu1 %v6038_v24  ;;  %v413_v4 = vld [vmem:[%s6945_s20] sm:$0xff]  ;;  %v419_v5 = vld [vmem:[%s6945_s20 + $0x30] sm:$0xff]  ;;  %v6104_v7 = vld [vmem:[#allocation5 + $0x20c] ss:$16 sps:$4 sm:$0xff]   ;;  %s4991_s28 = sshll.u32 %s6744_s27, 4  ;;  %s4992_s28 = int_to_ptr.vmem [resolvable:$true] %s4991_s28 }
  0x8b   : > { %1743 = vmatprep.subr.bf16.mxu0 %v6039_v25  ;;  %2082 = vmatprep.subr.bf16.mxu1 %v6041_v26  ;;  %v6101_v6 = vld [vmem:[#allocation5 + $0x204] ss:$16 sps:$4 sm:$0xff]   ;;  %v6099_v8 = vld [vmem:[#allocation5 + $0x200] ss:$16 sps:$4 sm:$0xff]   ;;  %v509_v9 = vpack.c.bf16 %v419_v5, %v413_v4  ;;  %v6102_v10 = vld [vmem:[#allocation5 + $0x208] ss:$16 sps:$4 sm:$0xff]   ;;  %p6672_p8 = scmp.lt.s32.totalorder %s4992_s28, %s4992_s28 }
  0x8c   : > { %v426_v11 = vld [vmem:[%s6945_s20 + $0x68] sm:$0xff]  ;;  %v432_v12 = vld [vmem:[%s6945_s20 + $0x98] sm:$0xff]  ;;  %v6107_v13 = vld [vmem:[#allocation5 + $0x224] ss:$16 sps:$4 sm:$0xff]   ;;  %s6665_s16 = scalar_lea.vmem %s4992_s28, 16  ;;  %s6671_s21 = scalar_lea.vmem %s4992_s28, 32 }
  0x8d   : > { %v6110_v14 = vld [vmem:[#allocation5 + $0x22c] ss:$16 sps:$4 sm:$0xff]   ;;  %v6105_v15 = vld [vmem:[#allocation5 + $0x220] ss:$16 sps:$4 sm:$0xff]   ;;  %v516_v16 = vpack.c.bf16 %v432_v12, %v426_v11  ;;  %v6108_v17 = vld [vmem:[#allocation5 + $0x228] ss:$16 sps:$4 sm:$0xff]   ;;  %p6666_p1 = scmp.ne.s32.totalorder %s4992_s28, %s6665_s16  ;;  %p6673_p12 = scmp.lt.s32.totalorder %s6671_s21, %s6665_s16 }
  0x8e   : > { %1744 = vmatpush1.bf16.msra.mxu0 %v6043_v27  ;;  %2083 = vmatpush1.bf16.msra.mxu1 %v6044_v28  ;;  %v425_v18 = vld [vmem:[%s6945_s20 + $0x60] sm:$0xff]  ;;  %v431_v19 = vld [vmem:[%s6945_s20 + $0x90] sm:$0xff]  ;;  %v6116_v21 = vld [vmem:[#allocation5 + $0x24c] ss:$16 sps:$4 sm:$0xff]  }
  0x8f   : > { %1745 = vmatprep.subr.bf16.mxu0 %v6045_v29  ;;  %2084 = vmatprep.subr.bf16.mxu1 %v6047_v30  ;;  %v6113_v20 = vld [vmem:[#allocation5 + $0x244] ss:$16 sps:$4 sm:$0xff]   ;;  %v6111_v22 = vld [vmem:[#allocation5 + $0x240] ss:$16 sps:$4 sm:$0xff]   ;;  %v6114_v23 = vld [vmem:[#allocation5 + $0x248] ss:$16 sps:$4 sm:$0xff]   ;;  %v515_v24 = vpack.c.bf16 %v431_v19, %v425_v18  ;;  %p6667_p4 = pnand %p6666_p1, %p5958_p9  ;;  %p6674_p0 = por %p6673_p12, %p6672_p8 }
  0x90   : > { %v438_v25 = vld [vmem:[%s6945_s20 + $0xc8] sm:$0xff]  ;;  %v444_v26 = vld [vmem:[%s6945_s20 + $0xf8] sm:$0xff]  ;;  %v6119_v27 = vld [vmem:[#allocation5 + $0x264] ss:$16 sps:$4 sm:$0xff]  }
  0x91   : > { %v6122_v28 = vld [vmem:[#allocation5 + $0x26c] ss:$16 sps:$4 sm:$0xff]   ;;  %v522_v29 = vpack.c.bf16 %v444_v26, %v438_v25  ;;  %v6117_v30 = vld [vmem:[#allocation5 + $0x260] ss:$16 sps:$4 sm:$0xff]   ;;  %v6150_v4 = vld [vmem:[#allocation5 + $0x308] ss:$16 sps:$4 sm:$0xff]   ;;  %p6668_p5 = pneg %p6667_p4 }
  0x92   : > { %1746 = vmatpush1.bf16.msra.mxu0 %v6049_v31  ;;  %2085 = vmatpush1.bf16.msra.mxu1 %v6050_v32  ;;  %v6120_v31 = vld [vmem:[#allocation5 + $0x268] ss:$16 sps:$4 sm:$0xff]   ;;  %v437_v32 = vld [vmem:[%s6945_s20 + $0xc0] sm:$0xff]  ;;  %v455_v47 = vld [vmem:[%s6945_s20 + $0x150] sm:$0xff] }
  0x93   : > { %1747 = vmatprep.subr.bf16.mxu0 %v6051_v33  ;;  %2086 = vmatprep.subr.bf16.mxu1 %v6053_v34  ;;  %v443_v33 = vld [vmem:[%s6945_s20 + $0xf0] sm:$0xff]  ;;  %v462_v52 = vld [vmem:[%s6945_s20 + $0x188] sm:$0xff]  ;;  %v492_v18 = vld [vmem:[%s6945_s20 + $0x278] sm:$0xff]  ;;  %p6675_p2 = pnand %p6674_p0, %p6668_p5 }
  0x94   : > { %v6125_v34 = vld [vmem:[#allocation5 + $0x284] ss:$16 sps:$4 sm:$0xff]   ;;  %v6135_v50 = vld [vmem:[#allocation5 + $0x2c0] ss:$16 sps:$4 sm:$0xff]  }
  0x95   : > { %v6155_v5 = vld [vmem:[#allocation5 + $0x324] ss:$16 sps:$4 sm:$0xff]  }
  0x96   : > { %1748 = vmatpush1.bf16.msra.mxu0 %v6055_v35  ;;  %2087 = vmatpush1.bf16.msra.mxu1 %v6056_v36  ;;  %v6128_v35 = vld [vmem:[#allocation5 + $0x28c] ss:$16 sps:$4 sm:$0xff]   ;;  %v6123_v36 = vld [vmem:[#allocation5 + $0x280] ss:$16 sps:$4 sm:$0xff]   ;;  %v6161_v12 = vld [vmem:[#allocation5 + $0x344] ss:$16 sps:$4 sm:$0xff]  }
  0x97   : > { %1749 = vmatprep.subr.bf16.mxu0 %v6057_v37  ;;  %2088 = vmatprep.subr.bf16.mxu1 %v6059_v38  ;;  %v6126_v37 = vld [vmem:[#allocation5 + $0x288] ss:$16 sps:$4 sm:$0xff]   ;;  %v521_v38 = vpack.c.bf16 %v443_v33, %v437_v32  ;;  %v479_v11 = vld [vmem:[%s6945_s20 + $0x210] sm:$0xff] }
  0x98   : > { %v6167_v19 = vld [vmem:[#allocation5 + $0x364] ss:$16 sps:$4 sm:$0xff]   ;;  %v504_v32 = vld [vmem:[%s6945_s20 + $0x2d8] sm:$0xff] }
  0x99   : > { %v491_v25 = vld [vmem:[%s6945_s20 + $0x270] sm:$0xff] }
  0x9a   : > { %1750 = vmatpush1.bf16.msra.mxu0 %v6061_v39  ;;  %2089 = vmatpush1.bf16.msra.mxu1 %v6062_v40  ;;  %v450_v39 = vld [vmem:[%s6945_s20 + $0x128] sm:$0xff]  ;;  %v456_v40 = vld [vmem:[%s6945_s20 + $0x158] sm:$0xff]  ;;  %v6173_v26 = vld [vmem:[#allocation5 + $0x384] ss:$16 sps:$4 sm:$0xff]  }
  0x9b   : > { %1751 = vmatprep.subr.bf16.mxu0 %v6063_v41  ;;  %2090 = vmatprep.subr.bf16.mxu1 %v6065_v42  ;;  %v6131_v41 = vld [vmem:[#allocation5 + $0x2a4] ss:$16 sps:$4 sm:$0xff]   ;;  %v6134_v42 = vld [vmem:[#allocation5 + $0x2ac] ss:$16 sps:$4 sm:$0xff]  }
  0x9c   : > { %v6179_v33 = vld [vmem:[#allocation5 + $0x3a4] ss:$16 sps:$4 sm:$0xff]  }
  0x9e   : > { %1752 = vmatpush1.bf16.msra.mxu0 %v6067_v43  ;;  %2091 = vmatpush1.bf16.msra.mxu1 %v6068_v44  ;;  %v6129_v43 = vld [vmem:[#allocation5 + $0x2a0] ss:$16 sps:$4 sm:$0xff]   ;;  %v528_v44 = vpack.c.bf16 %v456_v40, %v450_v39  ;;  %v6185_v40 = vld [vmem:[#allocation5 + $0x3c4] ss:$16 sps:$4 sm:$0xff]  }
  0x9f   : > { %1753 = vmatprep.subr.bf16.mxu0 %v6069_v45  ;;  %2092 = vmatprep.subr.bf16.mxu1 %v6071_v46  ;;  %v6132_v45 = vld [vmem:[#allocation5 + $0x2a8] ss:$16 sps:$4 sm:$0xff]   ;;  %v449_v46 = vld [vmem:[%s6945_s20 + $0x120] sm:$0xff]  ;;  %v503_v39 = vld [vmem:[%s6945_s20 + $0x2d0] sm:$0xff] }
  0xa2   : > { %1754 = vmatpush1.bf16.msra.mxu0 %v6073_v48  ;;  %2093 = vmatpush1.bf16.msra.mxu1 %v6074_v49  ;;  %v6137_v48 = vld [vmem:[#allocation5 + $0x2c4] ss:$16 sps:$4 sm:$0xff]   ;;  %v6140_v49 = vld [vmem:[#allocation5 + $0x2cc] ss:$16 sps:$4 sm:$0xff]  }
  0xa3   : > { %1755 = vmatprep.subr.bf16.mxu0 %v6075_v51  ;;  %2094 = vmatprep.subr.bf16.mxu1 %v6077_v53  ;;  %v527_v51 = vpack.c.bf16 %v455_v47, %v449_v46  ;;  %v468_v53 = vld [vmem:[%s6945_s20 + $0x1b8] sm:$0xff]  ;;  %v422_v46 = vld [vmem:[%s6945_s20 + $0x48] sm:$0xff]  ;;  %v6191_v47 = vld [vmem:[#allocation5 + $0x3e4] ss:$16 sps:$4 sm:$0xff]  }
  0xa6   : > { %1756 = vmatpush1.bf16.msra.mxu0 %v6079_v54  ;;  %2095 = vmatpush1.bf16.msra.mxu1 %v6080_v55  ;;  %v6138_v54 = vld [vmem:[#allocation5 + $0x2c8] ss:$16 sps:$4 sm:$0xff]   ;;  %v6143_v55 = vld [vmem:[#allocation5 + $0x2e4] ss:$16 sps:$4 sm:$0xff]  }
  0xa7   : > { %1757 = vmatprep.subr.bf16.mxu0 %v6081_v56  ;;  %2096 = vmatprep.subr.bf16.mxu1 %v6083_v57  ;;  %v6146_v56 = vld [vmem:[#allocation5 + $0x2ec] ss:$16 sps:$4 sm:$0xff]   ;;  %v6141_v57 = vld [vmem:[#allocation5 + $0x2e0] ss:$16 sps:$4 sm:$0xff]  }
  0xaa   : > { %1758 = vmatpush1.bf16.msra.mxu0 %v6085_v58  ;;  %2097 = vmatpush1.bf16.msra.mxu1 %v6086_v59  ;;  %v6144_v58 = vld [vmem:[#allocation5 + $0x2e8] ss:$16 sps:$4 sm:$0xff]   ;;  %v534_v59 = vpack.c.bf16 %v468_v53, %v462_v52  ;;  %v415_v52 = vld [vmem:[%s6945_s20 + $0x10] sm:$0xff]  ;;  %v421_v53 = vld [vmem:[%s6945_s20 + $0x40] sm:$0xff] }
  0xab   : > { %1759 = vmatprep.subr.bf16.mxu0 %v6087_v60  ;;  %2098 = vmatprep.subr.bf16.mxu1 %v6089_v61  ;;  %v461_v60 = vld [vmem:[%s6945_s20 + $0x180] sm:$0xff]  ;;  %v467_v61 = vld [vmem:[%s6945_s20 + $0x1b0] sm:$0xff] }
  0xae   : > { %1760 = vmatpush1.bf16.msra.mxu0 %v6091_v62  ;;  %2099 = vmatpush1.bf16.msra.mxu1 %v6092_v63  ;;  %v6149_v62 = vld [vmem:[#allocation5 + $0x304] ss:$16 sps:$4 sm:$0xff]   ;;  %v6152_v63 = vld [vmem:[#allocation5 + $0x30c] ss:$16 sps:$4 sm:$0xff]  }
  0xaf   : > { %1761 = vmatprep.subr.bf16.mxu0 %v6093_v0  ;;  %2100 = vmatprep.subr.bf16.mxu1 %v6095_v1  ;;  %v533_v0 = vpack.c.bf16 %v467_v61, %v461_v60  ;;  %v474_v1 = vld [vmem:[%s6945_s20 + $0x1e8] sm:$0xff]  ;;  %v6203_v61 = vld [vmem:[#allocation5 + $0x424] ss:$16 sps:$4 sm:$0xff]  }
  0xb0   : > { %v6198_v60 = vld [vmem:[#allocation5 + $0x408] ss:$16 sps:$4 sm:$0xff]  }
  0xb2   : > { %1762 = vmatpush1.bf16.msra.mxu0 %v6097_v2  ;;  %2101 = vmatpush1.bf16.msra.mxu1 %v6098_v3  ;;  %v480_v2 = vld [vmem:[%s6945_s20 + $0x218] sm:$0xff]  ;;  %v6147_v3 = vld [vmem:[#allocation5 + $0x300] ss:$16 sps:$4 sm:$0xff]  }
  0xb3   : > { %1844 = vmatprep.subr.bf16.mxu0 %v6101_v6  ;;  %2183 = vmatprep.subr.bf16.mxu1 %v6104_v7  ;;  %v6158_v6 = vld [vmem:[#allocation5 + $0x32c] ss:$16 sps:$4 sm:$0xff]   ;;  %v6153_v7 = vld [vmem:[#allocation5 + $0x320] ss:$16 sps:$4 sm:$0xff]  }
  0xb5   : > { %1764 = vmatmul.mubr.bf16.vlgmr.msra.gmra.mrb[0].mxu0 %v509_v9  ;;  %2103 = vmatmul.mubr.bf16.vlgmr.msra.gmra.mrb[0].mxu1 %v509_v9  ;;  %v540_v9 = vpack.c.bf16 %v480_v2, %v474_v1  ;;  %v427_v2 = vld [vmem:[%s6945_s20 + $0x70] sm:$0xff] }
  0xb6   : > { %1845 = vmatpush1.bf16.msra.mxu0 %v6099_v8  ;;  %2184 = vmatpush1.bf16.msra.mxu1 %v6102_v10  ;;  %v6156_v8 = vld [vmem:[#allocation5 + $0x328] ss:$16 sps:$4 sm:$0xff]   ;;  %v473_v10 = vld [vmem:[%s6945_s20 + $0x1e0] sm:$0xff] }
  0xb7   : > { %1846 = vmatprep.subr.bf16.mxu0 %v6107_v13  ;;  %2185 = vmatprep.subr.bf16.mxu1 %v6110_v14  ;;  %v6164_v13 = vld [vmem:[#allocation5 + $0x34c] ss:$16 sps:$4 sm:$0xff]   ;;  %v6159_v14 = vld [vmem:[#allocation5 + $0x340] ss:$16 sps:$4 sm:$0xff]  }
  0xb8   : > { %1773 = vmatprep.mubr.bf16.mxu0 %v516_v16  ;;  %2112 = vmatprep.mubr.bf16.mxu1 %v516_v16  ;;  %v6162_v16 = vld [vmem:[#allocation5 + $0x348] ss:$16 sps:$4 sm:$0xff]  }
  0xba   : > { %1847 = vmatpush1.bf16.msra.mxu0 %v6105_v15  ;;  %2186 = vmatpush1.bf16.msra.mxu1 %v6108_v17  ;;  %v539_v15 = vpack.c.bf16 %v479_v11, %v473_v10  ;;  %v486_v17 = vld [vmem:[%s6945_s20 + $0x248] sm:$0xff]  ;;  %v6215_v11 = vld [vmem:[#allocation5 + $0x464] ss:$16 sps:$4 sm:$0xff]  }
  0xbb   : > { %1848 = vmatprep.subr.bf16.mxu0 %v6113_v20  ;;  %2187 = vmatprep.subr.bf16.mxu1 %v6116_v21  ;;  %v6170_v20 = vld [vmem:[#allocation5 + $0x36c] ss:$16 sps:$4 sm:$0xff]   ;;  %v6165_v21 = vld [vmem:[#allocation5 + $0x360] ss:$16 sps:$4 sm:$0xff]   ;;  %v6210_v10 = vld [vmem:[#allocation5 + $0x448] ss:$16 sps:$4 sm:$0xff]  }
  0xbd   : > { %1774 = vmatmul.mubr.bf16.gmra.mrb[4].mxu0 %v515_v24  ;;  %2113 = vmatmul.mubr.bf16.gmra.mrb[4].mxu1 %v515_v24  ;;  %v485_v24 = vld [vmem:[%s6945_s20 + $0x240] sm:$0xff] }
  0xbe   : > { %1849 = vmatpush1.bf16.msra.mxu0 %v6111_v22  ;;  %2188 = vmatpush1.bf16.msra.mxu1 %v6114_v23  ;;  %v546_v22 = vpack.c.bf16 %v492_v18, %v486_v17  ;;  %v6168_v23 = vld [vmem:[#allocation5 + $0x368] ss:$16 sps:$4 sm:$0xff]   ;;  %v445_v17 = vld [vmem:[%s6945_s20 + $0x100] sm:$0xff] }
  0xbf   : > { %1850 = vmatprep.subr.bf16.mxu0 %v6119_v27  ;;  %2189 = vmatprep.subr.bf16.mxu1 %v6122_v28  ;;  %v6176_v27 = vld [vmem:[#allocation5 + $0x38c] ss:$16 sps:$4 sm:$0xff]   ;;  %v6171_v28 = vld [vmem:[#allocation5 + $0x380] ss:$16 sps:$4 sm:$0xff]   ;;  %v6221_v18 = vld [vmem:[#allocation5 + $0x484] ss:$16 sps:$4 sm:$0xff]  }
  0xc0   : > { %1783 = vmatprep.mubr.bf16.mxu0 %v522_v29  ;;  %2122 = vmatprep.mubr.bf16.mxu1 %v522_v29  ;;  %v6174_v29 = vld [vmem:[#allocation5 + $0x388] ss:$16 sps:$4 sm:$0xff]  }
  0xc2   : > { %1851 = vmatpush1.bf16.msra.mxu0 %v6117_v30  ;;  %2190 = vmatpush1.bf16.msra.mxu1 %v6120_v31  ;;  %v545_v30 = vpack.c.bf16 %v491_v25, %v485_v24  ;;  %v498_v31 = vld [vmem:[%s6945_s20 + $0x2a8] sm:$0xff]  ;;  %v6227_v25 = vld [vmem:[#allocation5 + $0x4a4] ss:$16 sps:$4 sm:$0xff]  }
  0xc3   : > { %1852 = vmatprep.subr.bf16.mxu0 %v6125_v34  ;;  %2191 = vmatprep.subr.bf16.mxu1 %v6128_v35  ;;  %v6182_v34 = vld [vmem:[#allocation5 + $0x3ac] ss:$16 sps:$4 sm:$0xff]   ;;  %v552_v35 = vpack.c.bf16 %v504_v32, %v498_v31  ;;  %v457_v31 = vld [vmem:[%s6945_s20 + $0x160] sm:$0xff] }
  0xc4   : > { %v458_v24 = vld [vmem:[%s6945_s20 + $0x168] sm:$0xff]  ;;  %v6233_v32 = vld [vmem:[#allocation5 + $0x4c4] ss:$16 sps:$4 sm:$0xff]  }
  0xc5   : > { %1784 = vmatmul.mubr.bf16.gmra.mrb[8].mxu0 %v521_v38  ;;  %2123 = vmatmul.mubr.bf16.gmra.mrb[8].mxu1 %v521_v38  ;;  %v497_v38 = vld [vmem:[%s6945_s20 + $0x2a0] sm:$0xff] }
  0xc6   : > { %1853 = vmatpush1.bf16.msra.mxu0 %v6123_v36  ;;  %2192 = vmatpush1.bf16.msra.mxu1 %v6126_v37  ;;  %v6177_v36 = vld [vmem:[#allocation5 + $0x3a0] ss:$16 sps:$4 sm:$0xff]   ;;  %v6180_v37 = vld [vmem:[#allocation5 + $0x3a8] ss:$16 sps:$4 sm:$0xff]  }
  0xc7   : > { %1854 = vmatprep.subr.bf16.mxu0 %v6131_v41  ;;  %2193 = vmatprep.subr.bf16.mxu1 %v6134_v42  ;;  %v6188_v41 = vld [vmem:[#allocation5 + $0x3cc] ss:$16 sps:$4 sm:$0xff]   ;;  %v6183_v42 = vld [vmem:[#allocation5 + $0x3c0] ss:$16 sps:$4 sm:$0xff]  }
  0xc8   : > { %1793 = vmatprep.mubr.bf16.mxu0 %v528_v44  ;;  %2132 = vmatprep.mubr.bf16.mxu1 %v528_v44  ;;  %v551_v44 = vpack.c.bf16 %v503_v39, %v497_v38  ;;  %v6234_v38 = vld [vmem:[#allocation5 + $0x4c8] ss:$16 sps:$4 sm:$0xff]   ;;  %v6239_v39 = vld [vmem:[#allocation5 + $0x4e4] ss:$16 sps:$4 sm:$0xff]  }
  0xca   : > { %1855 = vmatpush1.bf16.msra.mxu0 %v6129_v43  ;;  %2194 = vmatpush1.bf16.msra.mxu1 %v6132_v45  ;;  %v6186_v43 = vld [vmem:[#allocation5 + $0x3c8] ss:$16 sps:$4 sm:$0xff]  }
  0xcb   : > { %1856 = vmatprep.subr.bf16.mxu0 %v6137_v48  ;;  %2195 = vmatprep.subr.bf16.mxu1 %v6140_v49  ;;  %v416_v45 = vld [vmem:[%s6945_s20 + $0x18] sm:$0xff]  ;;  %v6189_v49 = vld [vmem:[#allocation5 + $0x3e0] ss:$16 sps:$4 sm:$0xff]  }
  0xcc   : > { %v6194_v48 = vld [vmem:[#allocation5 + $0x3ec] ss:$16 sps:$4 sm:$0xff]  }
  0xcd   : > { %1794 = vmatmul.mubr.bf16.gmra.mrb[12].mxu0 %v527_v51  ;;  %2133 = vmatmul.mubr.bf16.gmra.mrb[12].mxu1 %v527_v51  ;;  %v6192_v51 = vld [vmem:[#allocation5 + $0x3e8] ss:$16 sps:$4 sm:$0xff]  }
  0xce   : > { %1857 = vmatpush1.bf16.msra.mxu0 %v6135_v50  ;;  %2196 = vmatpush1.bf16.msra.mxu1 %v6138_v54  ;;  %v512_v50 = vpack.c.bf16 %v422_v46, %v416_v45  ;;  %v6197_v54 = vld [vmem:[#allocation5 + $0x404] ss:$16 sps:$4 sm:$0xff]  }
  0xcf   : > { %1858 = vmatprep.subr.bf16.mxu0 %v6143_v55  ;;  %2197 = vmatprep.subr.bf16.mxu1 %v6146_v56  ;;  %v6200_v55 = vld [vmem:[#allocation5 + $0x40c] ss:$16 sps:$4 sm:$0xff]   ;;  %v6195_v56 = vld [vmem:[#allocation5 + $0x400] ss:$16 sps:$4 sm:$0xff]   ;;  %v6245_v46 = vld [vmem:[#allocation5 + $0x504] ss:$16 sps:$4 sm:$0xff]  }
  0xd0   : > { %1803 = vmatprep.mubr.bf16.mxu0 %v534_v59  ;;  %2142 = vmatprep.mubr.bf16.mxu1 %v534_v59  ;;  %v434_v59 = vld [vmem:[%s6945_s20 + $0xa8] sm:$0xff]  ;;  %v469_v45 = vld [vmem:[%s6945_s20 + $0x1c0] sm:$0xff] }
  0xd2   : > { %1859 = vmatpush1.bf16.msra.mxu0 %v6141_v57  ;;  %2198 = vmatpush1.bf16.msra.mxu1 %v6144_v58  ;;  %v511_v57 = vpack.c.bf16 %v421_v53, %v415_v52  ;;  %v428_v58 = vld [vmem:[%s6945_s20 + $0x78] sm:$0xff]  ;;  %v482_v52 = vld [vmem:[%s6945_s20 + $0x228] sm:$0xff]  ;;  %v6251_v53 = vld [vmem:[#allocation5 + $0x524] ss:$16 sps:$4 sm:$0xff]  }
  0xd3   : > { %1860 = vmatprep.subr.bf16.mxu0 %v6149_v62  ;;  %2199 = vmatprep.subr.bf16.mxu1 %v6152_v63  ;;  %v6206_v62 = vld [vmem:[#allocation5 + $0x42c] ss:$16 sps:$4 sm:$0xff]   ;;  %v6201_v63 = vld [vmem:[#allocation5 + $0x420] ss:$16 sps:$4 sm:$0xff]   ;;  %v518_v1 = vpack.c.bf16 %v434_v59, %v428_v58 }
  0xd4   : > { %v475_v58 = vld [vmem:[%s6945_s20 + $0x1f0] sm:$0xff]  ;;  %v481_v59 = vld [vmem:[%s6945_s20 + $0x220] sm:$0xff] }
  0xd5   : > { %1804 = vmatmul.mubr.bf16.gmra.mrb[16].mxu0 %v533_v0  ;;  %2143 = vmatmul.mubr.bf16.gmra.mrb[16].mxu1 %v533_v0  ;;  %v6204_v0 = vld [vmem:[#allocation5 + $0x428] ss:$16 sps:$4 sm:$0xff]  }
  0xd6   : > { %1861 = vmatpush1.bf16.msra.mxu0 %v6147_v3  ;;  %2200 = vmatpush1.bf16.msra.mxu1 %v6150_v4  ;;  %v433_v3 = vld [vmem:[%s6945_s20 + $0xa0] sm:$0xff] }
  0xd7   : > { %1862 = vmatprep.subr.bf16.mxu0 %v6155_v5  ;;  %2201 = vmatprep.subr.bf16.mxu1 %v6158_v6  ;;  %v6209_v4 = vld [vmem:[#allocation5 + $0x444] ss:$16 sps:$4 sm:$0xff]   ;;  %v6212_v5 = vld [vmem:[#allocation5 + $0x44c] ss:$16 sps:$4 sm:$0xff]   ;;  %v517_v6 = vpack.c.bf16 %v433_v3, %v427_v2 }
  0xd8   : > { %1813 = vmatprep.mubr.bf16.mxu0 %v540_v9  ;;  %2152 = vmatprep.mubr.bf16.mxu1 %v540_v9  ;;  %v6207_v9 = vld [vmem:[#allocation5 + $0x440] ss:$16 sps:$4 sm:$0xff]   ;;  %v494_v2 = vld [vmem:[%s6945_s20 + $0x288] sm:$0xff]  ;;  %v6263_v3 = vld [vmem:[#allocation5 + $0x564] ss:$16 sps:$4 sm:$0xff]  }
  0xda   : > { %1863 = vmatpush1.bf16.msra.mxu0 %v6153_v7  ;;  %2202 = vmatpush1.bf16.msra.mxu1 %v6156_v8  ;;  %v440_v7 = vld [vmem:[%s6945_s20 + $0xd8] sm:$0xff]  ;;  %v446_v8 = vld [vmem:[%s6945_s20 + $0x108] sm:$0xff] }
  0xdb   : > { %1864 = vmatprep.subr.bf16.mxu0 %v6161_v12  ;;  %2203 = vmatprep.subr.bf16.mxu1 %v6164_v13  ;;  %v6218_v12 = vld [vmem:[#allocation5 + $0x46c] ss:$16 sps:$4 sm:$0xff]   ;;  %v6213_v13 = vld [vmem:[#allocation5 + $0x460] ss:$16 sps:$4 sm:$0xff]  }
  0xdd   : > { %1814 = vmatmul.mubr.bf16.gmra.mrb[20].mxu0 %v539_v15  ;;  %2153 = vmatmul.mubr.bf16.gmra.mrb[20].mxu1 %v539_v15  ;;  %v524_v15 = vpack.c.bf16 %v446_v8, %v440_v7  ;;  %v487_v8 = vld [vmem:[%s6945_s20 + $0x250] sm:$0xff] }
  0xde   : > { %1865 = vmatpush1.bf16.msra.mxu0 %v6159_v14  ;;  %2204 = vmatpush1.bf16.msra.mxu1 %v6162_v16  ;;  %v6216_v14 = vld [vmem:[#allocation5 + $0x468] ss:$16 sps:$4 sm:$0xff]   ;;  %v439_v16 = vld [vmem:[%s6945_s20 + $0xd0] sm:$0xff] }
  0xdf   : > { %1866 = vmatprep.subr.bf16.mxu0 %v6167_v19  ;;  %2205 = vmatprep.subr.bf16.mxu1 %v6170_v20  ;;  %v6224_v19 = vld [vmem:[#allocation5 + $0x48c] ss:$16 sps:$4 sm:$0xff]   ;;  %v6219_v20 = vld [vmem:[#allocation5 + $0x480] ss:$16 sps:$4 sm:$0xff]  }
  0xe0   : > { %1823 = vmatprep.mubr.bf16.mxu0 %v546_v22  ;;  %2162 = vmatprep.mubr.bf16.mxu1 %v546_v22  ;;  %v6222_v22 = vld [vmem:[#allocation5 + $0x488] ss:$16 sps:$4 sm:$0xff]  }
  0xe2   : > { %1867 = vmatpush1.bf16.msra.mxu0 %v6165_v21  ;;  %2206 = vmatpush1.bf16.msra.mxu1 %v6168_v23  ;;  %v523_v21 = vpack.c.bf16 %v445_v17, %v439_v16  ;;  %v452_v23 = vld [vmem:[%s6945_s20 + $0x138] sm:$0xff]  ;;  %v506_v16 = vld [vmem:[%s6945_s20 + $0x2e8] sm:$0xff]  ;;  %v6275_v17 = vld [vmem:[#allocation5 + $0x5a4] ss:$16 sps:$4 sm:$0xff]  }
  0xe3   : > { %1868 = vmatprep.subr.bf16.mxu0 %v6173_v26  ;;  %2207 = vmatprep.subr.bf16.mxu1 %v6176_v27  ;;  %v6230_v26 = vld [vmem:[#allocation5 + $0x4ac] ss:$16 sps:$4 sm:$0xff]   ;;  %v6225_v27 = vld [vmem:[#allocation5 + $0x4a0] ss:$16 sps:$4 sm:$0xff]  }
  0xe5   : > { %1824 = vmatmul.mubr.bf16.gmra.mrb[24].mxu0 %v545_v30  ;;  %2163 = vmatmul.mubr.bf16.gmra.mrb[24].mxu1 %v545_v30  ;;  %v451_v30 = vld [vmem:[%s6945_s20 + $0x130] sm:$0xff] }
  0xe6   : > { %1869 = vmatpush1.bf16.msra.mxu0 %v6171_v28  ;;  %2208 = vmatpush1.bf16.msra.mxu1 %v6174_v29  ;;  %v530_v28 = vpack.c.bf16 %v458_v24, %v452_v23  ;;  %v6228_v29 = vld [vmem:[#allocation5 + $0x4a8] ss:$16 sps:$4 sm:$0xff]   ;;  %v505_v23 = vld [vmem:[%s6945_s20 + $0x2e0] sm:$0xff] }
  0xe7   : > { %1870 = vmatprep.subr.bf16.mxu0 %v6179_v33  ;;  %2209 = vmatprep.subr.bf16.mxu1 %v6182_v34  ;;  %v6236_v33 = vld [vmem:[#allocation5 + $0x4cc] ss:$16 sps:$4 sm:$0xff]   ;;  %v529_v34 = vpack.c.bf16 %v457_v31, %v451_v30  ;;  %v6281_v24 = vld [vmem:[#allocation5 + $0x5c4] ss:$16 sps:$4 sm:$0xff]  }
  0xe8   : > { %1833 = vmatprep.mubr.bf16.mxu0 %v552_v35  ;;  %2172 = vmatprep.mubr.bf16.mxu1 %v552_v35  ;;  %v464_v35 = vld [vmem:[%s6945_s20 + $0x198] sm:$0xff]  ;;  %v6287_v31 = vld [vmem:[#allocation5 + $0x5e4] ss:$16 sps:$4 sm:$0xff]  }
  0xe9   : > { %v424_v30 = vld [vmem:[%s6945_s20 + $0x58] sm:$0xff] }
  0xea   : > { %1871 = vmatpush1.bf16.msra.mxu0 %v6177_v36  ;;  %2210 = vmatpush1.bf16.msra.mxu1 %v6180_v37  ;;  %v470_v36 = vld [vmem:[%s6945_s20 + $0x1c8] sm:$0xff]  ;;  %v6231_v37 = vld [vmem:[#allocation5 + $0x4c0] ss:$16 sps:$4 sm:$0xff]  }
  0xeb   : > { %1872 = vmatprep.subr.bf16.mxu0 %v6185_v40  ;;  %2211 = vmatprep.subr.bf16.mxu1 %v6188_v41  ;;  %v6242_v40 = vld [vmem:[#allocation5 + $0x4ec] ss:$16 sps:$4 sm:$0xff]   ;;  %v536_v41 = vpack.c.bf16 %v470_v36, %v464_v35  ;;  %v417_v36 = vld [vmem:[%s6945_s20 + $0x20] sm:$0xff] }
  0xed   : > { %1834 = vmatmul.mubr.bf16.gmra.mrb[28].mxu0 %v551_v44  ;;  %2173 = vmatmul.mubr.bf16.gmra.mrb[28].mxu1 %v551_v44  ;;  %v463_v44 = vld [vmem:[%s6945_s20 + $0x190] sm:$0xff] }
  0xee   : > { %1873 = vmatpush1.bf16.msra.mxu0 %v6183_v42  ;;  %2212 = vmatpush1.bf16.msra.mxu1 %v6186_v43  ;;  %v6237_v42 = vld [vmem:[#allocation5 + $0x4e0] ss:$16 sps:$4 sm:$0xff]   ;;  %v6240_v43 = vld [vmem:[#allocation5 + $0x4e8] ss:$16 sps:$4 sm:$0xff]  }
  0xef   : > { %1874 = vmatprep.subr.bf16.mxu0 %v6191_v47  ;;  %2213 = vmatprep.subr.bf16.mxu1 %v6194_v48  ;;  %v6248_v47 = vld [vmem:[#allocation5 + $0x50c] ss:$16 sps:$4 sm:$0xff]   ;;  %v6243_v48 = vld [vmem:[#allocation5 + $0x500] ss:$16 sps:$4 sm:$0xff]  }
  0xf0   : > { %1876 = vmatprep.mubr.bf16.mxu0 %v512_v50  ;;  %2215 = vmatprep.mubr.bf16.mxu1 %v512_v50  ;;  %v6246_v50 = vld [vmem:[#allocation5 + $0x508] ss:$16 sps:$4 sm:$0xff]  }
  0xf2   : > { %1875 = vmatpush1.bf16.msra.mxu0 %v6189_v49  ;;  %2214 = vmatpush1.bf16.msra.mxu1 %v6192_v51  ;;  %v535_v49 = vpack.c.bf16 %v469_v45, %v463_v44  ;;  %v476_v51 = vld [vmem:[%s6945_s20 + $0x1f8] sm:$0xff]  ;;  %v6291_v44 = vld [vmem:[#allocation7] ss:$16 sps:$4 sm:$0xff]  }
  0xf3   : > { %1957 = vmatprep.subr.bf16.mxu0 %v6197_v54  ;;  %2296 = vmatprep.subr.bf16.mxu1 %v6200_v55  ;;  %v6254_v54 = vld [vmem:[#allocation5 + $0x52c] ss:$16 sps:$4 sm:$0xff]   ;;  %v6249_v55 = vld [vmem:[#allocation5 + $0x520] ss:$16 sps:$4 sm:$0xff]   ;;  %v6294_v45 = vld [vmem:[#allocation7 + $0x8] ss:$16 sps:$4 sm:$0xff]  }
  0xf5   : > { %1877 = vmatmul.mubr.bf16.vlgmr.msra.gmra.mrb[0].mxu0 %v511_v57  ;;  %2216 = vmatmul.mubr.bf16.vlgmr.msra.gmra.mrb[0].mxu1 %v511_v57  ;;  %v542_v57 = vpack.c.bf16 %v482_v52, %v476_v51  ;;  %v448_v51 = vld [vmem:[%s6945_s20 + $0x118] sm:$0xff]  ;;  %v6297_v52 = vld [vmem:[#allocation7 + $0x20] ss:$16 sps:$4 sm:$0xff]  }
  0xf6   : > { %1958 = vmatpush1.bf16.msra.mxu0 %v6195_v56  ;;  %2297 = vmatpush1.bf16.msra.mxu1 %v6198_v60  ;;  %v6252_v56 = vld [vmem:[#allocation5 + $0x528] ss:$16 sps:$4 sm:$0xff]   ;;  %v6257_v60 = vld [vmem:[#allocation5 + $0x544] ss:$16 sps:$4 sm:$0xff]  }
  0xf7   : > { %1959 = vmatprep.subr.bf16.mxu0 %v6203_v61  ;;  %2298 = vmatprep.subr.bf16.mxu1 %v6206_v62  ;;  %v6260_v61 = vld [vmem:[#allocation5 + $0x54c] ss:$16 sps:$4 sm:$0xff]   ;;  %v6255_v62 = vld [vmem:[#allocation5 + $0x540] ss:$16 sps:$4 sm:$0xff]  }
  0xf8   : > { %1886 = vmatprep.mubr.bf16.mxu0 %v518_v1  ;;  %2225 = vmatprep.mubr.bf16.mxu1 %v518_v1  ;;  %v488_v1 = vld [vmem:[%s6945_s20 + $0x258] sm:$0xff] }
  0xf9   : > { %v548_v7 = vpack.c.bf16 %v494_v2, %v488_v1  ;;  %v460_v1 = vld [vmem:[%s6945_s20 + $0x178] sm:$0xff]  ;;  %v6309_v2 = vld [vmem:[#allocation7 + $0x60] ss:$16 sps:$4 sm:$0xff]  }
  0xfa   : > { %1960 = vmatpush1.bf16.msra.mxu0 %v6201_v63  ;;  %2299 = vmatpush1.bf16.msra.mxu1 %v6204_v0  ;;  %v6258_v63 = vld [vmem:[#allocation5 + $0x548] ss:$16 sps:$4 sm:$0xff]   ;;  %v541_v0 = vpack.c.bf16 %v481_v59, %v475_v58 }
  0xfb   : > { %1961 = vmatprep.subr.bf16.mxu0 %v6209_v4  ;;  %2300 = vmatprep.subr.bf16.mxu1 %v6212_v5  ;;  %v6266_v4 = vld [vmem:[#allocation5 + $0x56c] ss:$16 sps:$4 sm:$0xff]   ;;  %v6261_v5 = vld [vmem:[#allocation5 + $0x560] ss:$16 sps:$4 sm:$0xff]   ;;  %v6306_v58 = vld [vmem:[#allocation7 + $0x48] ss:$16 sps:$4 sm:$0xff]  }
  0xfd   : > { %1887 = vmatmul.mubr.bf16.gmra.mrb[4].mxu0 %v517_v6  ;;  %2226 = vmatmul.mubr.bf16.gmra.mrb[4].mxu1 %v517_v6  ;;  %v6264_v6 = vld [vmem:[#allocation5 + $0x568] ss:$16 sps:$4 sm:$0xff]  }
  0xfe   : > { %1962 = vmatpush1.bf16.msra.mxu0 %v6207_v9  ;;  %2301 = vmatpush1.bf16.msra.mxu1 %v6210_v10  ;;  %v493_v9 = vld [vmem:[%s6945_s20 + $0x280] sm:$0xff] }
  0xff   : > { %1963 = vmatprep.subr.bf16.mxu0 %v6215_v11  ;;  %2302 = vmatprep.subr.bf16.mxu1 %v6218_v12  ;;  %v6269_v10 = vld [vmem:[#allocation5 + $0x584] ss:$16 sps:$4 sm:$0xff]   ;;  %v6272_v11 = vld [vmem:[#allocation5 + $0x58c] ss:$16 sps:$4 sm:$0xff]   ;;  %v6267_v12 = vld [vmem:[#allocation5 + $0x580] ss:$16 sps:$4 sm:$0xff]  }
 0x100   : > { %1896 = vmatprep.mubr.bf16.mxu0 %v524_v15  ;;  %2235 = vmatprep.mubr.bf16.mxu1 %v524_v15  ;;  %v500_v15 = vld [vmem:[%s6945_s20 + $0x2b8] sm:$0xff] }
 0x102   : > { %1964 = vmatpush1.bf16.msra.mxu0 %v6213_v13  ;;  %2303 = vmatpush1.bf16.msra.mxu1 %v6216_v14  ;;  %v6270_v13 = vld [vmem:[#allocation5 + $0x588] ss:$16 sps:$4 sm:$0xff]   ;;  %v547_v14 = vpack.c.bf16 %v493_v9, %v487_v8 }
 0x103   : > { %1965 = vmatprep.subr.bf16.mxu0 %v6221_v18  ;;  %2304 = vmatprep.subr.bf16.mxu1 %v6224_v19  ;;  %v6278_v18 = vld [vmem:[#allocation5 + $0x5ac] ss:$16 sps:$4 sm:$0xff]   ;;  %v6273_v19 = vld [vmem:[#allocation5 + $0x5a0] ss:$16 sps:$4 sm:$0xff]   ;;  %v6318_v8 = vld [vmem:[#allocation7 + $0x88] ss:$16 sps:$4 sm:$0xff]  }
 0x105   : > { %1897 = vmatmul.mubr.bf16.gmra.mrb[8].mxu0 %v523_v21  ;;  %2236 = vmatmul.mubr.bf16.gmra.mrb[8].mxu1 %v523_v21  ;;  %v554_v21 = vpack.c.bf16 %v506_v16, %v500_v15  ;;  %v472_v15 = vld [vmem:[%s6945_s20 + $0x1d8] sm:$0xff]  ;;  %v6321_v16 = vld [vmem:[#allocation7 + $0xa0] ss:$16 sps:$4 sm:$0xff]  }
 0x106   : > { %1966 = vmatpush1.bf16.msra.mxu0 %v6219_v20  ;;  %2305 = vmatpush1.bf16.msra.mxu1 %v6222_v22  ;;  %v6276_v20 = vld [vmem:[#allocation5 + $0x5a8] ss:$16 sps:$4 sm:$0xff]   ;;  %v499_v22 = vld [vmem:[%s6945_s20 + $0x2b0] sm:$0xff] }
 0x107   : > { %1967 = vmatprep.subr.bf16.mxu0 %v6227_v25  ;;  %2306 = vmatprep.subr.bf16.mxu1 %v6230_v26  ;;  %v6284_v25 = vld [vmem:[#allocation5 + $0x5cc] ss:$16 sps:$4 sm:$0xff]   ;;  %v6279_v26 = vld [vmem:[#allocation5 + $0x5c0] ss:$16 sps:$4 sm:$0xff]  }
 0x108   : > { %1906 = vmatprep.mubr.bf16.mxu0 %v530_v28  ;;  %2245 = vmatprep.mubr.bf16.mxu1 %v530_v28  ;;  %v553_v28 = vpack.c.bf16 %v505_v23, %v499_v22  ;;  %v6330_v22 = vld [vmem:[#allocation7 + $0xc8] ss:$16 sps:$4 sm:$0xff]  }
 0x10a   : > { %1968 = vmatpush1.bf16.msra.mxu0 %v6225_v27  ;;  %2307 = vmatpush1.bf16.msra.mxu1 %v6228_v29  ;;  %v6282_v27 = vld [vmem:[#allocation5 + $0x5c8] ss:$16 sps:$4 sm:$0xff]  }
 0x10b   : > { %1969 = vmatprep.subr.bf16.mxu0 %v6233_v32  ;;  %2308 = vmatprep.subr.bf16.mxu1 %v6236_v33  ;;  %v418_v29 = vld [vmem:[%s6945_s20 + $0x28] sm:$0xff]  ;;  %v6285_v33 = vld [vmem:[#allocation5 + $0x5e0] ss:$16 sps:$4 sm:$0xff]  }
 0x10c   : > { %v6290_v32 = vld [vmem:[#allocation5 + $0x5ec] ss:$16 sps:$4 sm:$0xff]   ;;  %v514_v35 = vpack.c.bf16 %v424_v30, %v418_v29  ;;  %v6333_v30 = vld [vmem:[#allocation7 + $0xe0] ss:$16 sps:$4 sm:$0xff]  }
 0x10d   : > { %1907 = vmatmul.mubr.bf16.gmra.mrb[12].mxu0 %v529_v34  ;;  %2246 = vmatmul.mubr.bf16.gmra.mrb[12].mxu1 %v529_v34  ;;  %v6288_v34 = vld [vmem:[#allocation5 + $0x5e8] ss:$16 sps:$4 sm:$0xff]  }
 0x10e   : > { %1970 = vmatpush1.bf16.msra.mxu0 %v6231_v37  ;;  %2309 = vmatpush1.bf16.msra.mxu1 %v6234_v38  ;;  %v423_v37 = vld [vmem:[%s6945_s20 + $0x50] sm:$0xff]  ;;  %v430_v38 = vld [vmem:[%s6945_s20 + $0x88] sm:$0xff]  ;;  %v484_v29 = vld [vmem:[%s6945_s20 + $0x238] sm:$0xff] }
 0x10f   : > { %1971 = vmatprep.subr.bf16.mxu0 %v6239_v39  ;;  %2310 = vmatprep.subr.bf16.mxu1 %v6242_v40  ;;  %v436_v39 = vld [vmem:[%s6945_s20 + $0xb8] sm:$0xff]  ;;  %v6293_v40 = vld [vmem:[#allocation7 + $0x4] ss:$16 sps:$4 sm:$0xff]  }
 0x110   : > { %1916 = vmatprep.mubr.bf16.mxu0 %v536_v41  ;;  %2255 = vmatprep.mubr.bf16.mxu1 %v536_v41  ;;  %v6296_v41 = vld [vmem:[#allocation7 + $0xc] ss:$16 sps:$4 sm:$0xff]  }
 0x112   : > { %1972 = vmatpush1.bf16.msra.mxu0 %v6237_v42  ;;  %2311 = vmatpush1.bf16.msra.mxu1 %v6240_v43  ;;  %v513_v42 = vpack.c.bf16 %v423_v37, %v417_v36  ;;  %v520_v43 = vpack.c.bf16 %v436_v39, %v430_v38  ;;  %v6342_v36 = vld [vmem:[#allocation7 + $0x108] ss:$16 sps:$4 sm:$0xff]   ;;  %v6347_v38 = vld [vmem:[#allocation7 + $0x124] ss:$16 sps:$4 sm:$0xff]   ;;  %v6350_v39 = vld [vmem:[#allocation7 + $0x12c] ss:$16 sps:$4 sm:$0xff]  }
 0x113   : > { %1973 = vmatprep.subr.bf16.mxu0 %v6245_v46  ;;  %2312 = vmatprep.subr.bf16.mxu1 %v6248_v47  ;;  %v429_v46 = vld [vmem:[%s6945_s20 + $0x80] sm:$0xff]  ;;  %v435_v47 = vld [vmem:[%s6945_s20 + $0xb0] sm:$0xff] }
 0x115   : > { %1917 = vmatmul.mubr.bf16.gmra.mrb[16].mxu0 %v535_v49  ;;  %2256 = vmatmul.mubr.bf16.gmra.mrb[16].mxu1 %v535_v49  ;;  %v6302_v49 = vld [vmem:[#allocation7 + $0x2c] ss:$16 sps:$4 sm:$0xff]  }
 0x116   : > { %1974 = vmatpush1.bf16.msra.mxu0 %v6243_v48  ;;  %2313 = vmatpush1.bf16.msra.mxu1 %v6246_v50  ;;  %v6299_v48 = vld [vmem:[#allocation7 + $0x24] ss:$16 sps:$4 sm:$0xff]   ;;  %v442_v50 = vld [vmem:[%s6945_s20 + $0xe8] sm:$0xff] }
 0x117   : > { %1975 = vmatprep.subr.bf16.mxu0 %v6251_v53  ;;  %2314 = vmatprep.subr.bf16.mxu1 %v6254_v54  ;;  %v6300_v53 = vld [vmem:[#allocation7 + $0x28] ss:$16 sps:$4 sm:$0xff]   ;;  %v6305_v54 = vld [vmem:[#allocation7 + $0x44] ss:$16 sps:$4 sm:$0xff]   ;;  %v526_v59 = vpack.c.bf16 %v448_v51, %v442_v50 }
 0x118   : > { %1926 = vmatprep.mubr.bf16.mxu0 %v542_v57  ;;  %2265 = vmatprep.mubr.bf16.mxu1 %v542_v57  ;;  %v6303_v57 = vld [vmem:[#allocation7 + $0x40] ss:$16 sps:$4 sm:$0xff]   ;;  %v6354_v50 = vld [vmem:[#allocation7 + $0x148] ss:$16 sps:$4 sm:$0xff]  }
 0x11a   : > { %1976 = vmatpush1.bf16.msra.mxu0 %v6249_v55  ;;  %2315 = vmatpush1.bf16.msra.mxu1 %v6252_v56  ;;  %v6308_v55 = vld [vmem:[#allocation7 + $0x4c] ss:$16 sps:$4 sm:$0xff]   ;;  %v519_v56 = vpack.c.bf16 %v435_v47, %v429_v46  ;;  %v6353_v46 = vld [vmem:[#allocation7 + $0x144] ss:$16 sps:$4 sm:$0xff]  }
 0x11b   : > { %1977 = vmatprep.subr.bf16.mxu0 %v6257_v60  ;;  %2316 = vmatprep.subr.bf16.mxu1 %v6260_v61  ;;  %v6311_v60 = vld [vmem:[#allocation7 + $0x64] ss:$16 sps:$4 sm:$0xff]   ;;  %v6314_v61 = vld [vmem:[#allocation7 + $0x6c] ss:$16 sps:$4 sm:$0xff]  }
 0x11c   : > { %v6356_v47 = vld [vmem:[#allocation7 + $0x14c] ss:$16 sps:$4 sm:$0xff]  }
 0x11d   : > { %1927 = vmatmul.mubr.bf16.gmra.mrb[20].mxu0 %v541_v0  ;;  %2266 = vmatmul.mubr.bf16.gmra.mrb[20].mxu1 %v541_v0  ;;  %v454_v0 = vld [vmem:[%s6945_s20 + $0x148] sm:$0xff] }
 0x11e   : > { %1978 = vmatpush1.bf16.msra.mxu0 %v6255_v62  ;;  %2317 = vmatpush1.bf16.msra.mxu1 %v6258_v63  ;;  %v441_v62 = vld [vmem:[%s6945_s20 + $0xe0] sm:$0xff]  ;;  %v447_v63 = vld [vmem:[%s6945_s20 + $0x110] sm:$0xff]  ;;  %v532_v9 = vpack.c.bf16 %v460_v1, %v454_v0  ;;  %v6366_v1 = vld [vmem:[#allocation7 + $0x188] ss:$16 sps:$4 sm:$0xff]  }
 0x11f   : > { %1979 = vmatprep.subr.bf16.mxu0 %v6263_v3  ;;  %2318 = vmatprep.subr.bf16.mxu1 %v6266_v4  ;;  %v6312_v3 = vld [vmem:[#allocation7 + $0x68] ss:$16 sps:$4 sm:$0xff]   ;;  %v6317_v4 = vld [vmem:[#allocation7 + $0x84] ss:$16 sps:$4 sm:$0xff]  }
 0x120   : > { %1936 = vmatprep.mubr.bf16.mxu0 %v548_v7  ;;  %2275 = vmatprep.mubr.bf16.mxu1 %v548_v7  ;;  %v6315_v7 = vld [vmem:[#allocation7 + $0x80] ss:$16 sps:$4 sm:$0xff]  }
 0x122   : > { %1980 = vmatpush1.bf16.msra.mxu0 %v6261_v5  ;;  %2319 = vmatpush1.bf16.msra.mxu1 %v6264_v6  ;;  %v6320_v5 = vld [vmem:[#allocation7 + $0x8c] ss:$16 sps:$4 sm:$0xff]   ;;  %v525_v6 = vpack.c.bf16 %v447_v63, %v441_v62  ;;  %v6363_v63 = vld [vmem:[#allocation7 + $0x180] ss:$16 sps:$4 sm:$0xff]  }
 0x123   : > { %1981 = vmatprep.subr.bf16.mxu0 %v6269_v10  ;;  %2320 = vmatprep.subr.bf16.mxu1 %v6272_v11  ;;  %v6323_v10 = vld [vmem:[#allocation7 + $0xa4] ss:$16 sps:$4 sm:$0xff]   ;;  %v6326_v11 = vld [vmem:[#allocation7 + $0xac] ss:$16 sps:$4 sm:$0xff]  }
 0x125   : > { %1937 = vmatmul.mubr.bf16.gmra.mrb[24].mxu0 %v547_v14  ;;  %2276 = vmatmul.mubr.bf16.gmra.mrb[24].mxu1 %v547_v14  ;;  %v466_v14 = vld [vmem:[%s6945_s20 + $0x1a8] sm:$0xff] }
 0x126   : > { %1982 = vmatpush1.bf16.msra.mxu0 %v6267_v12  ;;  %2321 = vmatpush1.bf16.msra.mxu1 %v6270_v13  ;;  %v453_v12 = vld [vmem:[%s6945_s20 + $0x140] sm:$0xff]  ;;  %v459_v13 = vld [vmem:[%s6945_s20 + $0x170] sm:$0xff]  ;;  %v538_v23 = vpack.c.bf16 %v472_v15, %v466_v14  ;;  %v6386_v14 = vld [vmem:[#allocation7 + $0x1ec] ss:$16 sps:$4 sm:$0xff]  }
 0x127   : > { %1983 = vmatprep.subr.bf16.mxu0 %v6275_v17  ;;  %2322 = vmatprep.subr.bf16.mxu1 %v6278_v18  ;;  %v6324_v17 = vld [vmem:[#allocation7 + $0xa8] ss:$16 sps:$4 sm:$0xff]   ;;  %v6329_v18 = vld [vmem:[#allocation7 + $0xc4] ss:$16 sps:$4 sm:$0xff]   ;;  %v6381_v15 = vld [vmem:[#allocation7 + $0x1e0] ss:$16 sps:$4 sm:$0xff]  }
 0x128   : > { %1946 = vmatprep.mubr.bf16.mxu0 %v554_v21  ;;  %2285 = vmatprep.mubr.bf16.mxu1 %v554_v21  ;;  %v6327_v21 = vld [vmem:[#allocation7 + $0xc0] ss:$16 sps:$4 sm:$0xff]  }
 0x12a   : > { %1984 = vmatpush1.bf16.msra.mxu0 %v6273_v19  ;;  %2323 = vmatpush1.bf16.msra.mxu1 %v6276_v20  ;;  %v6332_v19 = vld [vmem:[#allocation7 + $0xcc] ss:$16 sps:$4 sm:$0xff]   ;;  %v531_v20 = vpack.c.bf16 %v459_v13, %v453_v12  ;;  %v6378_v12 = vld [vmem:[#allocation7 + $0x1c8] ss:$16 sps:$4 sm:$0xff]   ;;  %v6383_v13 = vld [vmem:[#allocation7 + $0x1e4] ss:$16 sps:$4 sm:$0xff]  }
 0x12b   : > { %1985 = vmatprep.subr.bf16.mxu0 %v6281_v24  ;;  %2324 = vmatprep.subr.bf16.mxu1 %v6284_v25  ;;  %v6335_v24 = vld [vmem:[#allocation7 + $0xe4] ss:$16 sps:$4 sm:$0xff]   ;;  %v6338_v25 = vld [vmem:[#allocation7 + $0xec] ss:$16 sps:$4 sm:$0xff]  }
 0x12d   : > { %1947 = vmatmul.mubr.bf16.gmra.mrb[28].mxu0 %v553_v28  ;;  %2286 = vmatmul.mubr.bf16.gmra.mrb[28].mxu1 %v553_v28  ;;  %v478_v28 = vld [vmem:[%s6945_s20 + $0x208] sm:$0xff] }
 0x12e   : > { %1986 = vmatpush1.bf16.msra.mxu0 %v6279_v26  ;;  %2325 = vmatpush1.bf16.msra.mxu1 %v6282_v27  ;;  %v465_v26 = vld [vmem:[%s6945_s20 + $0x1a0] sm:$0xff]  ;;  %v471_v27 = vld [vmem:[%s6945_s20 + $0x1d0] sm:$0xff]  ;;  %v544_v37 = vpack.c.bf16 %v484_v29, %v478_v28 }
 0x12f   : > { %1987 = vmatprep.subr.bf16.mxu0 %v6287_v31  ;;  %2326 = vmatprep.subr.bf16.mxu1 %v6290_v32  ;;  %v6336_v31 = vld [vmem:[#allocation7 + $0xe8] ss:$16 sps:$4 sm:$0xff]   ;;  %v6341_v32 = vld [vmem:[#allocation7 + $0x104] ss:$16 sps:$4 sm:$0xff]  }
 0x130   : > { %1989 = vmatprep.mubr.bf16.mxu0 %v514_v35  ;;  %2328 = vmatprep.mubr.bf16.mxu1 %v514_v35  ;;  %v6339_v35 = vld [vmem:[#allocation7 + $0x100] ss:$16 sps:$4 sm:$0xff]  }
 0x132   : > { %1988 = vmatpush1.bf16.msra.mxu0 %v6285_v33  ;;  %2327 = vmatpush1.bf16.msra.mxu1 %v6288_v34  ;;  %v6344_v33 = vld [vmem:[#allocation7 + $0x10c] ss:$16 sps:$4 sm:$0xff]   ;;  %v537_v34 = vpack.c.bf16 %v471_v27, %v465_v26 }
 0x133   : > { %3423 = vmatprep.subr.bf16.mxu0 %v6293_v40  ;;  %3649 = vmatprep.subr.bf16.mxu1 %v6296_v41  ;;  %v477_v40 = vld [vmem:[%s6945_s20 + $0x200] sm:$0xff]  ;;  %v483_v41 = vld [vmem:[%s6945_s20 + $0x230] sm:$0xff] }
 0x135   : > { %1990 = vmatmul.mubr.bf16.vlgmr.msra.gmra.mrb[0].mxu0 %v513_v42  ;;  %2329 = vmatmul.mubr.bf16.vlgmr.msra.gmra.mrb[0].mxu1 %v513_v42  ;;  %v490_v42 = vld [vmem:[%s6945_s20 + $0x268] sm:$0xff] }
 0x136   : > { %1999 = vmatprep.mubr.bf16.mxu0 %v520_v43  ;;  %2338 = vmatprep.mubr.bf16.mxu1 %v520_v43  ;;  %v496_v43 = vld [vmem:[%s6945_s20 + $0x298] sm:$0xff] }
 0x137   : > { %3424 = vmatpush1.bf16.msra.mxu0 %v6291_v44  ;;  %3650 = vmatpush1.bf16.msra.mxu1 %v6294_v45  ;;  %v6345_v44 = vld [vmem:[#allocation7 + $0x120] ss:$16 sps:$4 sm:$0xff]   ;;  %v6348_v45 = vld [vmem:[#allocation7 + $0x128] ss:$16 sps:$4 sm:$0xff]   ;;  %v550_v51 = vpack.c.bf16 %v496_v43, %v490_v42 }
 0x138   : > { %3425 = vmatprep.subr.bf16.mxu0 %v6299_v48  ;;  %3651 = vmatprep.subr.bf16.mxu1 %v6302_v49  ;;  %v543_v48 = vpack.c.bf16 %v483_v41, %v477_v40  ;;  %v6351_v49 = vld [vmem:[#allocation7 + $0x140] ss:$16 sps:$4 sm:$0xff]  }
 0x13b   : > { %3426 = vmatpush1.bf16.msra.mxu0 %v6297_v52  ;;  %3652 = vmatpush1.bf16.msra.mxu1 %v6300_v53  ;;  %v6359_v52 = vld [vmem:[#allocation7 + $0x164] ss:$16 sps:$4 sm:$0xff]   ;;  %v6362_v53 = vld [vmem:[#allocation7 + $0x16c] ss:$16 sps:$4 sm:$0xff]  }
 0x13c   : > { %3427 = vmatprep.subr.bf16.mxu0 %v6305_v54  ;;  %3653 = vmatprep.subr.bf16.mxu1 %v6308_v55  ;;  %v489_v54 = vld [vmem:[%s6945_s20 + $0x260] sm:$0xff]  ;;  %v495_v55 = vld [vmem:[%s6945_s20 + $0x290] sm:$0xff] }
 0x13d   : > { %2000 = vmatmul.mubr.bf16.gmra.mrb[4].mxu0 %v519_v56  ;;  %2339 = vmatmul.mubr.bf16.gmra.mrb[4].mxu1 %v519_v56  ;;  %v502_v56 = vld [vmem:[%s6945_s20 + $0x2c8] sm:$0xff]  ;;  %v549_v62 = vpack.c.bf16 %v495_v55, %v489_v54 }
 0x13e   : > { %2009 = vmatprep.mubr.bf16.mxu0 %v526_v59  ;;  %2348 = vmatprep.mubr.bf16.mxu1 %v526_v59  ;;  %v6360_v59 = vld [vmem:[#allocation7 + $0x168] ss:$16 sps:$4 sm:$0xff]  }
 0x13f   : > { %3428 = vmatpush1.bf16.msra.mxu0 %v6303_v57  ;;  %3654 = vmatpush1.bf16.msra.mxu1 %v6306_v58  ;;  %v508_v57 = vld [vmem:[%s6945_s20 + $0x2f8] sm:$0xff]  ;;  %v6357_v58 = vld [vmem:[#allocation7 + $0x160] ss:$16 sps:$4 sm:$0xff]  }
 0x140   : > { %3429 = vmatprep.subr.bf16.mxu0 %v6311_v60  ;;  %3655 = vmatprep.subr.bf16.mxu1 %v6314_v61  ;;  %v6365_v60 = vld [vmem:[#allocation7 + $0x184] ss:$16 sps:$4 sm:$0xff]   ;;  %v6368_v61 = vld [vmem:[#allocation7 + $0x18c] ss:$16 sps:$4 sm:$0xff]   ;;  %v556_v0 = vpack.c.bf16 %v508_v57, %v502_v56 }
 0x143   : > { %3430 = vmatpush1.bf16.msra.mxu0 %v6309_v2  ;;  %3656 = vmatpush1.bf16.msra.mxu1 %v6312_v3  ;;  %v501_v2 = vld [vmem:[%s6945_s20 + $0x2c0] sm:$0xff]  ;;  %v507_v3 = vld [vmem:[%s6945_s20 + $0x2f0] sm:$0xff] }
 0x144   : > { %3431 = vmatprep.subr.bf16.mxu0 %v6317_v4  ;;  %3657 = vmatprep.subr.bf16.mxu1 %v6320_v5  ;;  %v555_v4 = vpack.c.bf16 %v507_v3, %v501_v2  ;;  %v6371_v5 = vld [vmem:[#allocation7 + $0x1a4] ss:$16 sps:$4 sm:$0xff]  }
 0x145   : > { %2010 = vmatmul.mubr.bf16.gmra.mrb[8].mxu0 %v525_v6  ;;  %2349 = vmatmul.mubr.bf16.gmra.mrb[8].mxu1 %v525_v6  ;;  %v6374_v6 = vld [vmem:[#allocation7 + $0x1ac] ss:$16 sps:$4 sm:$0xff]  }
 0x146   : > { %2019 = vmatprep.mubr.bf16.mxu0 %v532_v9  ;;  %2358 = vmatprep.mubr.bf16.mxu1 %v532_v9  ;;  %v6377_v9 = vld [vmem:[#allocation7 + $0x1c4] ss:$16 sps:$4 sm:$0xff]  }
 0x147   : > { %3432 = vmatpush1.bf16.msra.mxu0 %v6315_v7  ;;  %3658 = vmatpush1.bf16.msra.mxu1 %v6318_v8  ;;  %v6369_v7 = vld [vmem:[#allocation7 + $0x1a0] ss:$16 sps:$4 sm:$0xff]   ;;  %v6372_v8 = vld [vmem:[#allocation7 + $0x1a8] ss:$16 sps:$4 sm:$0xff]  }
 0x148   : > { %3433 = vmatprep.subr.bf16.mxu0 %v6323_v10  ;;  %3659 = vmatprep.subr.bf16.mxu1 %v6326_v11  ;;  %v6380_v10 = vld [vmem:[#allocation7 + $0x1cc] ss:$16 sps:$4 sm:$0xff]   ;;  %v6375_v11 = vld [vmem:[#allocation7 + $0x1c0] ss:$16 sps:$4 sm:$0xff]  }
 0x14b   : > { %3434 = vmatpush1.bf16.msra.mxu0 %v6321_v16  ;;  %3660 = vmatpush1.bf16.msra.mxu1 %v6324_v17  ;;  %v6384_v16 = vld [vmem:[#allocation7 + $0x1e8] ss:$16 sps:$4 sm:$0xff]   ;;  %v6389_v17 = vld [vmem:[#allocation7 + $0x204] ss:$16 sps:$4 sm:$0xff]  }
 0x14c   : > { %3435 = vmatprep.subr.bf16.mxu0 %v6329_v18  ;;  %3661 = vmatprep.subr.bf16.mxu1 %v6332_v19  ;;  %v6392_v18 = vld [vmem:[#allocation7 + $0x20c] ss:$16 sps:$4 sm:$0xff]   ;;  %v8449_v19 = vlaneseq }
 0x14d   : > { %2020 = vmatmul.mubr.bf16.gmra.mrb[12].mxu0 %v531_v20  ;;  %2359 = vmatmul.mubr.bf16.gmra.mrb[12].mxu1 %v531_v20 }
 0x14e   : > { %2029 = vmatprep.mubr.bf16.mxu0 %v538_v23  ;;  %2368 = vmatprep.mubr.bf16.mxu1 %v538_v23  ;;  %v7065_v20 = vshrl.u32 %v8449_v19, 7  ;;  %v749_v23 = vld [vmem:[%s8438_s2] sm:$0xf] }
 0x14f   : > { %3436 = vmatpush1.bf16.msra.mxu0 %v6327_v21  ;;  %3662 = vmatpush1.bf16.msra.mxu1 %v6330_v22 }
 0x150   : > { %3437 = vmatprep.subr.bf16.mxu0 %v6335_v24  ;;  %3663 = vmatprep.subr.bf16.mxu1 %v6338_v25  ;;  %8471 = vst [vmem:[#allocation12_spill] sm:$0xff] %v7065_v20  ;;  %v8453_v21 = vsub.s32 0, %v7065_v20  ;;  %v8452_v22 = vsub.s32 2, %v7065_v20  ;;  %v8451_v24 = vsub.s32 1, %v7065_v20  ;;  %v8450_v25 = vsub.s32 3, %v7065_v20 }
 0x152   : > { %v7076_v26 = vrot.slane %v749_v23, %v8453_v21  ;;  %v7080_v27 = vrot.slane %v749_v23, %v8452_v22  ;;  %v7084_v28 = vrot.slane %v749_v23, %v8451_v24 }
 0x153   : > { %3438 = vmatpush1.bf16.msra.mxu0 %v6333_v30  ;;  %3664 = vmatpush1.bf16.msra.mxu1 %v6336_v31  ;;  %v7088_v31 = vrot.slane %v749_v23, %v8450_v25 }
 0x154   : > { %3439 = vmatprep.subr.bf16.mxu0 %v6341_v32  ;;  %3665 = vmatprep.subr.bf16.mxu1 %v6344_v33 }
 0x155   : > { %2030 = vmatmul.mubr.bf16.gmra.mrb[16].mxu0 %v537_v34  ;;  %2369 = vmatmul.mubr.bf16.gmra.mrb[16].mxu1 %v537_v34 }
 0x156   : > { %2039 = vmatprep.mubr.bf16.mxu0 %v544_v37  ;;  %2378 = vmatprep.mubr.bf16.mxu1 %v544_v37 }
 0x157   : > { %3440 = vmatpush1.bf16.msra.mxu0 %v6339_v35  ;;  %3666 = vmatpush1.bf16.msra.mxu1 %v6342_v36 }
 0x158   : > { %3441 = vmatprep.subr.bf16.mxu0 %v6347_v38  ;;  %3667 = vmatprep.subr.bf16.mxu1 %v6350_v39 }
 0x15b   : > { %3442 = vmatpush1.bf16.msra.mxu0 %v6345_v44  ;;  %3668 = vmatpush1.bf16.msra.mxu1 %v6348_v45 }
 0x15c   : > { %3443 = vmatprep.subr.bf16.mxu0 %v6353_v46  ;;  %3669 = vmatprep.subr.bf16.mxu1 %v6356_v47 }
 0x15d   : > { %2040 = vmatmul.mubr.bf16.gmra.mrb[20].mxu0 %v543_v48  ;;  %2379 = vmatmul.mubr.bf16.gmra.mrb[20].mxu1 %v543_v48 }
 0x15e   : > { %2049 = vmatprep.mubr.bf16.mxu0 %v550_v51  ;;  %2388 = vmatprep.mubr.bf16.mxu1 %v550_v51 }
 0x15f   : > { %3444 = vmatpush1.bf16.msra.mxu0 %v6351_v49  ;;  %3670 = vmatpush1.bf16.msra.mxu1 %v6354_v50 }
 0x160   : > { %3445 = vmatprep.subr.bf16.mxu0 %v6359_v52  ;;  %3671 = vmatprep.subr.bf16.mxu1 %v6362_v53 }
 0x163   : > { %3446 = vmatpush1.bf16.msra.mxu0 %v6357_v58  ;;  %3672 = vmatpush1.bf16.msra.mxu1 %v6360_v59 }
 0x164   : > { %3447 = vmatprep.subr.bf16.mxu0 %v6365_v60  ;;  %3673 = vmatprep.subr.bf16.mxu1 %v6368_v61 }
 0x165   : > { %2050 = vmatmul.mubr.bf16.gmra.mrb[24].mxu0 %v549_v62  ;;  %2389 = vmatmul.mubr.bf16.gmra.mrb[24].mxu1 %v549_v62 }
 0x166   : > { %2059 = vmatprep.mubr.bf16.mxu0 %v556_v0  ;;  %2398 = vmatprep.mubr.bf16.mxu1 %v556_v0 }
 0x167   : > { %3448 = vmatpush1.bf16.msra.mxu0 %v6363_v63  ;;  %3674 = vmatpush1.bf16.msra.mxu1 %v6366_v1 }
 0x168   : > { %3449 = vmatprep.subr.bf16.mxu0 %v6371_v5  ;;  %3675 = vmatprep.subr.bf16.mxu1 %v6374_v6 }
 0x16b   : > { %3450 = vmatpush1.bf16.msra.mxu0 %v6369_v7  ;;  %3676 = vmatpush1.bf16.msra.mxu1 %v6372_v8  ;;  %v6387_v7 = vld [vmem:[#allocation7 + $0x200] ss:$16 sps:$4 sm:$0xff]   ;;  %v6390_v8 = vld [vmem:[#allocation7 + $0x208] ss:$16 sps:$4 sm:$0xff]  }
 0x16c   : > { %3451 = vmatprep.subr.bf16.mxu0 %v6377_v9  ;;  %3677 = vmatprep.subr.bf16.mxu1 %v6380_v10 }
 0x16d   : > { %2060 = vmatmul.mubr.bf16.gmra.mrb[28].mxu0 %v555_v4  ;;  %2399 = vmatmul.mubr.bf16.gmra.mrb[28].mxu1 %v555_v4 }
 0x16f   : > { %3452 = vmatpush1.bf16.msra.mxu0 %v6375_v11  ;;  %3678 = vmatpush1.bf16.msra.mxu1 %v6378_v12 }
 0x170   : > { %3453 = vmatprep.subr.bf16.mxu0 %v6383_v13  ;;  %3679 = vmatprep.subr.bf16.mxu1 %v6386_v14  ;;  %v6395_v14 = vld [vmem:[#allocation7 + $0x224] ss:$16 sps:$4 sm:$0xff]  }
 0x173   : > { %3454 = vmatpush1.bf16.msra.mxu0 %v6381_v15  ;;  %3680 = vmatpush1.bf16.msra.mxu1 %v6384_v16 }
 0x174   : > { %3536 = vmatprep.subr.bf16.mxu0 %v6389_v17  ;;  %3762 = vmatprep.subr.bf16.mxu1 %v6392_v18  ;;  %v6398_v18 = vld [vmem:[#allocation7 + $0x22c] ss:$16 sps:$4 sm:$0xff]  }
 0x208   : > { %v1991_v29 = vpop.f32.mrb[0].mxu0  ;;  %v2330_v30 = vpop.f32.mrb[0].mxu1 }
 0x209   : > { %v5603_v32 = vadd.f32 %v1991_v29, %v7076_v26  ;;  %v5635_v33 = vadd.f32 %v2330_v30, %v7080_v27  ;;  %v1993_v34 = vpop.f32.mrb[1].mxu0  ;;  %v2332_v35 = vpop.f32.mrb[1].mxu1 }
 0x20a   : > { %v5604_v36 = vadd.f32 %v1993_v34, %v7084_v28  ;;  %v1995_v37 = vpop.f32.mrb[2].mxu0  ;;  %v2334_v38 = vpop.f32.mrb[2].mxu1  ;;  %v5636_v40 = vadd.f32 %v2332_v35, %v7088_v31  ;;  %v6393_v34 = vld [vmem:[#allocation7 + $0x220] ss:$16 sps:$4 sm:$0xff]   ;;  %v6396_v35 = vld [vmem:[#allocation7 + $0x228] ss:$16 sps:$4 sm:$0xff]  }
 0x20b   : > { %vm2409_vm1 = vcmp.gt.f32.partialorder %v5603_v32, 0.0  ;;  %v2473_v39 = vmul.f32 0.01, %v5603_v32  ;;  %vm2411_vm2 = vcmp.gt.f32.partialorder %v5635_v33, 0.0  ;;  %v2475_v41 = vmul.f32 0.01, %v5635_v33 }
 0x20c   : > { %v5605_v42 = vadd.f32 %v1995_v37, %v7076_v26  ;;  %v5637_v43 = vadd.f32 %v2334_v38, %v7080_v27  ;;  %v1997_v44 = vpop.f32.mrb[3].mxu0  ;;  %v2336_v45 = vpop.f32.mrb[3].mxu1  ;;  %vm2410_vm3 = vcmp.gt.f32.partialorder %v5604_v36, 0.0  ;;  %v2474_v46 = vmul.f32 0.01, %v5604_v36 }
 0x20d   : > { %v5606_v47 = vadd.f32 %v1997_v44, %v7084_v28  ;;  %v5638_v48 = vadd.f32 %v2336_v45, %v7088_v31  ;;  %v2537_v51 = vsel %vm2409_vm1, %v5603_v32, %v2473_v39  ;;  %v2539_v54 = vsel %vm2411_vm2, %v5635_v33, %v2475_v41 }
 0x20e   : > { %vm2413_vm4 = vcmp.gt.f32.partialorder %v5605_v42, 0.0  ;;  %v2477_v49 = vmul.f32 0.01, %v5605_v42  ;;  %vm2415_vm5 = vcmp.gt.f32.partialorder %v5637_v43, 0.0  ;;  %v2479_v50 = vmul.f32 0.01, %v5637_v43 }
 0x20f   : > { %vm2414_vm6 = vcmp.gt.f32.partialorder %v5606_v47, 0.0  ;;  %v2478_v52 = vmul.f32 0.01, %v5606_v47  ;;  %v2480_v53 = vmul.f32 0.01, %v5638_v48  ;;  %vm2416_vm7 = vcmp.gt.f32.partialorder %v5638_v48, 0.0 }
 0x210   : > { %v2541_v55 = vsel %vm2413_vm4, %v5605_v42, %v2477_v49  ;;  %v2543_v56 = vsel %vm2415_vm5, %v5637_v43, %v2479_v50  ;;  %v2001_v57 = vpop.f32.mrb[4].mxu0  ;;  %v7100_v58 = vpop.f32.mrb[4].mxu1  ;;  %v2476_v59 = vmul.f32 0.01, %v5636_v40  ;;  %vm2412_vm8 = vcmp.gt.f32.partialorder %v5636_v40, 0.0 }
 0x211   : > { %v2601_v60 = vpack.c.bf16 %v2541_v55, %v2537_v51  ;;  %v7102_v61 = vpack.c.bf16 %v2543_v56, %v2539_v54  ;;  %v5607_v62 = vadd.f32 %v2001_v57, %v7076_v26  ;;  %v2003_v63 = vpop.f32.mrb[5].mxu0  ;;  %v7105_v0 = vpop.f32.mrb[5].mxu1  ;;  %v2542_v4 = vsel %vm2414_vm6, %v5606_v47, %v2478_v52  ;;  %v6401_v47 = vld [vmem:[#allocation7 + $0x244] ss:$16 sps:$4 sm:$0xff]   ;;  %v6399_v50 = vld [vmem:[#allocation7 + $0x240] ss:$16 sps:$4 sm:$0xff]  }
 0x212   : > { %v5608_v1 = vadd.f32 %v2003_v63, %v7084_v28  ;;  %v2005_v2 = vpop.f32.mrb[6].mxu0  ;;  %v7108_v3 = vpop.f32.mrb[6].mxu1  ;;  %v2544_v5 = vsel %vm2416_vm7, %v5638_v48, %v2480_v53  ;;  %v2538_v6 = vsel %vm2410_vm3, %v5604_v36, %v2474_v46  ;;  %v2540_v15 = vsel %vm2412_vm8, %v5636_v40, %v2476_v59  ;;  %v6404_v48 = vld [vmem:[#allocation7 + $0x24c] ss:$16 sps:$4 sm:$0xff]   ;;  %v6402_v51 = vld [vmem:[#allocation7 + $0x248] ss:$16 sps:$4 sm:$0xff]  }
 0x213   : > { %8472 = vst [vmem:[#allocation13_spill] sm:$0xff] %v7102_v61  ;;  %v2481_v9 = vmul.f32 0.01, %v5607_v62  ;;  %v5609_v10 = vadd.f32 %v2005_v2, %v7076_v26  ;;  %v2007_v11 = vpop.f32.mrb[7].mxu0  ;;  %v7113_v12 = vpop.f32.mrb[7].mxu1  ;;  %v2602_v13 = vpack.c.bf16 %v2542_v4, %v2538_v6  ;;  %vm2417_vm9 = vcmp.gt.f32.partialorder %v5607_v62, 0.0 }
 0x214   : > { %v2482_v16 = vmul.f32 0.01, %v5608_v1  ;;  %v5610_v17 = vadd.f32 %v2007_v11, %v7084_v28  ;;  %v7116_v23 = vpack.c.bf16 %v2544_v5, %v2540_v15  ;;  %vm2418_vm10 = vcmp.gt.f32.partialorder %v5608_v1, 0.0  ;;  %v6407_v52 = vld [vmem:[#allocation7 + $0x264] ss:$16 sps:$4 sm:$0xff]  }
 0x215   : > { %vm2421_vm11 = vcmp.gt.f32.partialorder %v5609_v10, 0.0  ;;  %v2485_v29 = vmul.f32 0.01, %v5609_v10  ;;  %3455 = vmatprep.mubr.bf16.mxu0 %v2602_v13  ;;  %3681 = vmatprep.mubr.bf16.mxu1 %v2602_v13  ;;  %v2545_v36 = vsel %vm2417_vm9, %v5607_v62, %v2481_v9  ;;  %v6410_v57 = vld [vmem:[#allocation7 + $0x26c] ss:$16 sps:$4 sm:$0xff]  }
 0x216   : > { %8473 = vst [vmem:[#allocation14_spill] sm:$0xff] %v7116_v23  ;;  %vm2422_vm12 = vcmp.gt.f32.partialorder %v5610_v17, 0.0  ;;  %v2486_v30 = vmul.f32 0.01, %v5610_v17  ;;  %3456 = vmatmul.mubr.bf16.vlgmr.msra.gmra.mrb[32].mxu0 %v2601_v60  ;;  %3682 = vmatmul.mubr.bf16.vlgmr.msra.gmra.mrb[32].mxu1 %v2601_v60  ;;  %v2546_v41 = vsel %vm2418_vm10, %v5608_v1, %v2482_v16  ;;  %v6405_v63 = vld [vmem:[#allocation7 + $0x260] ss:$16 sps:$4 sm:$0xff]  }
 0x217   : > { %3537 = vmatpush1.bf16.msra.mxu0 %v6387_v7  ;;  %3763 = vmatpush1.bf16.msra.mxu1 %v6390_v8  ;;  %v2549_v37 = vsel %vm2421_vm11, %v5609_v10, %v2485_v29  ;;  %v6408_v1 = vld [vmem:[#allocation7 + $0x268] ss:$16 sps:$4 sm:$0xff]   ;;  %v6413_v4 = vld [vmem:[#allocation7 + $0x284] ss:$16 sps:$4 sm:$0xff]   ;;  %v6416_v11 = vld [vmem:[#allocation7 + $0x28c] ss:$16 sps:$4 sm:$0xff]  }
 0x218   : > { %v2011_v32 = vpop.f32.mrb[8].mxu0  ;;  %v7118_v33 = vpop.f32.mrb[8].mxu1  ;;  %3538 = vmatprep.subr.bf16.mxu0 %v6395_v14  ;;  %3764 = vmatprep.subr.bf16.mxu1 %v6398_v18  ;;  %v2550_v42 = vsel %vm2422_vm12, %v5610_v17, %v2486_v30  ;;  %v2605_v46 = vpack.c.bf16 %v2549_v37, %v2545_v36  ;;  %v6411_v36 = vld [vmem:[#allocation7 + $0x280] ss:$16 sps:$4 sm:$0xff]   ;;  %v6414_v37 = vld [vmem:[#allocation7 + $0x288] ss:$16 sps:$4 sm:$0xff]  }
 0x219   : > { %v5611_v38 = vadd.f32 %v2011_v32, %v7076_v26  ;;  %v2013_v39 = vpop.f32.mrb[9].mxu0  ;;  %v7122_v40 = vpop.f32.mrb[9].mxu1  ;;  %v2606_v45 = vpack.c.bf16 %v2550_v42, %v2546_v41  ;;  %v6419_v42 = vld [vmem:[#allocation7 + $0x2a4] ss:$16 sps:$4 sm:$0xff]  }
 0x21a   : > { %v2015_v43 = vpop.f32.mrb[10].mxu0  ;;  %v7126_v44 = vpop.f32.mrb[10].mxu1  ;;  %v5612_v49 = vadd.f32 %v2013_v39, %v7084_v28 }
 0x21b   : > { %3539 = vmatpush1.bf16.msra.mxu0 %v6393_v34  ;;  %3765 = vmatpush1.bf16.msra.mxu1 %v6396_v35  ;;  %v2489_v53 = vmul.f32 0.01, %v5611_v38  ;;  %v5613_v54 = vadd.f32 %v2015_v43, %v7076_v26  ;;  %v2017_v55 = vpop.f32.mrb[11].mxu0  ;;  %v7130_v56 = vpop.f32.mrb[11].mxu1  ;;  %vm2425_vm13 = vcmp.gt.f32.partialorder %v5611_v38, 0.0 }
 0x21c   : > { %3465 = vmatprep.mubr.bf16.mxu0 %v2606_v45  ;;  %3691 = vmatprep.mubr.bf16.mxu1 %v2606_v45  ;;  %v5614_v59 = vadd.f32 %v2017_v55, %v7084_v28  ;;  %v2490_v5 = vmul.f32 0.01, %v5612_v49  ;;  %vm2426_vm0 = vcmp.gt.f32.partialorder %v5612_v49, 0.0  ;;  %v6422_v43 = vld [vmem:[#allocation7 + $0x2ac] ss:$16 sps:$4 sm:$0xff]   ;;  %v7153_v45 = vadd.f32 %v7100_v58, %v7080_v27 }
 0x21d   : > { %3540 = vmatprep.subr.bf16.mxu0 %v6401_v47  ;;  %3766 = vmatprep.subr.bf16.mxu1 %v6404_v48  ;;  %vm2429_vm14 = vcmp.gt.f32.partialorder %v5613_v54, 0.0  ;;  %v2493_v2 = vmul.f32 0.01, %v5613_v54  ;;  %v2553_v9 = vsel %vm2425_vm13, %v5611_v38, %v2489_v53  ;;  %v6417_v47 = vld [vmem:[#allocation7 + $0x2a0] ss:$16 sps:$4 sm:$0xff]  }
 0x21e   : > { %3466 = vmatmul.mubr.bf16.gmra.mrb[36].mxu0 %v2605_v46  ;;  %3692 = vmatmul.mubr.bf16.gmra.mrb[36].mxu1 %v2605_v46  ;;  %vm2430_vm15 = vcmp.gt.f32.partialorder %v5614_v59, 0.0  ;;  %v2494_v6 = vmul.f32 0.01, %v5614_v59  ;;  %v2554_v18 = vsel %vm2426_vm0, %v5612_v49, %v2490_v5  ;;  %v6420_v48 = vld [vmem:[#allocation7 + $0x2a8] ss:$16 sps:$4 sm:$0xff]   ;;  %v7182_v5 = vadd.f32 %v7122_v40, %v7088_v31 }
 0x21f   : > { %3541 = vmatpush1.bf16.msra.mxu0 %v6399_v50  ;;  %3767 = vmatpush1.bf16.msra.mxu1 %v6402_v51  ;;  %v2557_v10 = vsel %vm2429_vm14, %v5613_v54, %v2493_v2  ;;  %v6425_v51 = vld [vmem:[#allocation7 + $0x2c4] ss:$16 sps:$4 sm:$0xff]   ;;  %vm2419_vm6 = vcmp.gt.f32.partialorder %v7153_v45, 0.0 }
 0x220   : > { %v2021_v60 = vpop.f32.mrb[12].mxu0  ;;  %v7133_v62 = vpop.f32.mrb[12].mxu1  ;;  %3542 = vmatprep.subr.bf16.mxu0 %v6407_v52  ;;  %3768 = vmatprep.subr.bf16.mxu1 %v6410_v57  ;;  %v2558_v15 = vsel %vm2430_vm15, %v5614_v59, %v2494_v6  ;;  %v2609_v16 = vpack.c.bf16 %v2557_v10, %v2553_v9  ;;  %v7157_v52 = vadd.f32 %v7105_v0, %v7088_v31 }
 0x221   : > { %v2023_v7 = vpop.f32.mrb[13].mxu0  ;;  %v7135_v8 = vpop.f32.mrb[13].mxu1  ;;  %v5615_v29 = vadd.f32 %v2021_v60, %v7076_v26  ;;  %v2610_v35 = vpack.c.bf16 %v2558_v15, %v2554_v18  ;;  %v6428_v60 = vld [vmem:[#allocation7 + $0x2cc] ss:$16 sps:$4 sm:$0xff]   ;;  %v7166_v0 = vadd.f32 %v7108_v3, %v7080_v27  ;;  %v6431_v15 = vld [vmem:[#allocation7 + $0x2e4] ss:$16 sps:$4 sm:$0xff]  }
 0x222   : > { %v2025_v13 = vpop.f32.mrb[14].mxu0  ;;  %v7139_v14 = vpop.f32.mrb[14].mxu1  ;;  %v5616_v17 = vadd.f32 %v2023_v7, %v7084_v28  ;;  %v6426_v7 = vld [vmem:[#allocation7 + $0x2c8] ss:$16 sps:$4 sm:$0xff]   ;;  %v2484_v9 = vmul.f32 0.01, %v7157_v52 }
 0x223   : > { %3543 = vmatpush1.bf16.msra.mxu0 %v6405_v63  ;;  %3769 = vmatpush1.bf16.msra.mxu1 %v6408_v1  ;;  %v5617_v30 = vadd.f32 %v2025_v13, %v7076_v26  ;;  %v2027_v32 = vpop.f32.mrb[15].mxu0  ;;  %v7144_v34 = vpop.f32.mrb[15].mxu1  ;;  %v2497_v53 = vmul.f32 0.01, %v5615_v29  ;;  %vm2433_vm4 = vcmp.gt.f32.partialorder %v5615_v29, 0.0  ;;  %v7170_v63 = vadd.f32 %v7113_v12, %v7088_v31 }
 0x224   : > { %3544 = vmatprep.subr.bf16.mxu0 %v6413_v4  ;;  %3770 = vmatprep.subr.bf16.mxu1 %v6416_v11  ;;  %v5618_v38 = vadd.f32 %v2027_v32, %v7084_v28  ;;  %v2498_v49 = vmul.f32 0.01, %v5616_v17  ;;  %vm2434_vm3 = vcmp.gt.f32.partialorder %v5616_v17, 0.0  ;;  %v7174_v1 = vadd.f32 %v7118_v33, %v7080_v27  ;;  %v6423_v12 = vld [vmem:[#allocation7 + $0x2c0] ss:$16 sps:$4 sm:$0xff]  }
 0x225   : > { %v2501_v46 = vmul.f32 0.01, %v5617_v30  ;;  %3475 = vmatprep.mubr.bf16.mxu0 %v2610_v35  ;;  %3701 = vmatprep.mubr.bf16.mxu1 %v2610_v35  ;;  %vm2437_vm1 = vcmp.gt.f32.partialorder %v5617_v30, 0.0  ;;  %v7178_v4 = vmul.f32 0.01, %v7153_v45  ;;  %v7191_v33 = vadd.f32 %v7126_v44, %v7080_v27 }
 0x226   : > { %vm2438_vm2 = vcmp.gt.f32.partialorder %v5618_v38, 0.0  ;;  %v2502_v50 = vmul.f32 0.01, %v5618_v38  ;;  %3476 = vmatmul.mubr.bf16.gmra.mrb[40].mxu0 %v2609_v16  ;;  %3702 = vmatmul.mubr.bf16.gmra.mrb[40].mxu1 %v2609_v16  ;;  %v2562_v6 = vsel %vm2434_vm3, %v5616_v17, %v2498_v49  ;;  %v2561_v13 = vsel %vm2433_vm4, %v5615_v29, %v2497_v53  ;;  %v6434_v32 = vld [vmem:[#allocation7 + $0x2ec] ss:$16 sps:$4 sm:$0xff]  }
 0x227   : > { %3545 = vmatpush1.bf16.msra.mxu0 %v6411_v36  ;;  %3771 = vmatpush1.bf16.msra.mxu1 %v6414_v37  ;;  %v2565_v2 = vsel %vm2437_vm1, %v5617_v30, %v2501_v46  ;;  %vm2420_vm5 = vcmp.gt.f32.partialorder %v7157_v52, 0.0  ;;  %v7207_v29 = vmul.f32 0.01, %v7166_v0  ;;  %v7210_v35 = vmul.f32 0.01, %v7170_v63 }
 0x228   : > { %v7147_v39 = vpop.f32.mrb[16].mxu0  ;;  %v7149_v41 = vpop.f32.mrb[16].mxu1  ;;  %3546 = vmatprep.subr.bf16.mxu0 %v6419_v42  ;;  %3772 = vmatprep.subr.bf16.mxu1 %v6422_v43  ;;  %v2566_v59 = vsel %vm2438_vm2, %v5618_v38, %v2502_v50  ;;  %v2613_v18 = vpack.c.bf16 %v2565_v2, %v2561_v13  ;;  %v7213_v36 = vmul.f32 0.01, %v7174_v1  ;;  %v6429_v37 = vld [vmem:[#allocation7 + $0x2e0] ss:$16 sps:$4 sm:$0xff]   ;;  %v7225_v49 = vadd.f32 %v7130_v56, %v7088_v31 }
 0x229   : > { %v2033_v58 = vpop.f32.mrb[17].mxu0  ;;  %v7159_v54 = vpop.f32.mrb[17].mxu1  ;;  %v2614_v40 = vpack.c.bf16 %v2566_v59, %v2562_v6  ;;  %v6432_v38 = vld [vmem:[#allocation7 + $0x2e8] ss:$16 sps:$4 sm:$0xff]   ;;  %v7217_v42 = vadd.f32 %v7147_v39, %v7076_v26  ;;  %v7236_v53 = vmul.f32 0.01, %v7191_v33  ;;  %v7252_v2 = vadd.f32 %v7139_v14, %v7080_v27 }
 0x22a   : > { %v2035_v55 = vpop.f32.mrb[18].mxu0  ;;  %v7161_v57 = vpop.f32.mrb[18].mxu1  ;;  %v7185_v3 = vadd.f32 %v2033_v58, %v7084_v28  ;;  %v7240_v58 = vadd.f32 %v7133_v62, %v7080_v27  ;;  %v7256_v62 = vadd.f32 %v7144_v34, %v7088_v31  ;;  %v6435_v6 = vld [vmem:[#allocation7 + $0x300] ss:$16 sps:$4 sm:$0xff]   ;;  %v6440_v34 = vld [vmem:[#allocation7 + $0x30c] ss:$16 sps:$4 sm:$0xff]  }
 0x22b   : > { %3547 = vmatpush1.bf16.msra.mxu0 %v6417_v47  ;;  %3773 = vmatpush1.bf16.msra.mxu1 %v6420_v48  ;;  %v2037_v10 = vpop.f32.mrb[19].mxu0  ;;  %v7193_v11 = vpop.f32.mrb[19].mxu1  ;;  %v7198_v16 = vadd.f32 %v2035_v55, %v7076_v26  ;;  %v6437_v47 = vld [vmem:[#allocation7 + $0x304] ss:$16 sps:$4 sm:$0xff]   ;;  %v7221_v48 = vmul.f32 0.01, %v7182_v5 }
 0x22c   : > { %v5622_v17 = vadd.f32 %v2037_v10, %v7084_v28  ;;  %3548 = vmatprep.subr.bf16.mxu0 %v6425_v51  ;;  %3774 = vmatprep.subr.bf16.mxu1 %v6428_v60  ;;  %v2506_v43 = vmul.f32 0.01, %v7185_v3  ;;  %vm2442_vm8 = vcmp.gt.f32.partialorder %v7185_v3, 0.0  ;;  %v7233_v51 = vsel %vm2420_vm5, %v7157_v52, %v2484_v9  ;;  %8474 = vst [vmem:[#allocation15_spill] sm:$0xff] %v7252_v2  ;;  %v6443_v10 = vld [vmem:[#allocation7 + $0x324] ss:$16 sps:$4 sm:$0xff]  }
 0x22d   : > { %3485 = vmatprep.mubr.bf16.mxu0 %v2614_v40  ;;  %3711 = vmatprep.mubr.bf16.mxu1 %v2614_v40  ;;  %v2509_v56 = vmul.f32 0.01, %v7198_v16  ;;  %v7248_v52 = vadd.f32 %v7135_v8, %v7088_v31  ;;  %vm2445_vm9 = vcmp.gt.f32.partialorder %v7198_v16, 0.0  ;;  %v7262_v9 = vadd.f32 %v7149_v41, %v7080_v27 }
 0x22e   : > { %vm2446_vm7 = vcmp.gt.f32.partialorder %v5622_v17, 0.0  ;;  %v2510_v46 = vmul.f32 0.01, %v5622_v17  ;;  %3486 = vmatmul.mubr.bf16.gmra.mrb[44].mxu0 %v2613_v18  ;;  %3712 = vmatmul.mubr.bf16.gmra.mrb[44].mxu1 %v2613_v18  ;;  %v7266_v8 = vadd.f32 %v7159_v54, %v7088_v31  ;;  %v2570_v14 = vsel %vm2442_vm8, %v7185_v3, %v2506_v43 }
 0x22f   : > { %3549 = vmatpush1.bf16.msra.mxu0 %v6423_v12  ;;  %3775 = vmatpush1.bf16.msra.mxu1 %v6426_v7  ;;  %v6438_v12 = vld [vmem:[#allocation7 + $0x308] ss:$16 sps:$4 sm:$0xff]   ;;  %v2505_v7 = vmul.f32 0.01, %v7217_v42  ;;  %v7272_v40 = vmul.f32 0.01, %v7225_v49  ;;  %v7283_v3 = vadd.f32 %v7161_v57, %v7080_v27  ;;  %v7300_v57 = vadd.f32 %v7193_v11, %v7088_v31 }
 0x230   : > { %v7201_v44 = vpop.f32.mrb[20].mxu0  ;;  %v7203_v30 = vpop.f32.mrb[20].mxu1  ;;  %3550 = vmatprep.subr.bf16.mxu0 %v6431_v15  ;;  %3776 = vmatprep.subr.bf16.mxu1 %v6434_v32  ;;  %v2574_v60 = vsel %vm2446_vm7, %v5622_v17, %v2510_v46  ;;  %8475 = vst [vmem:[#allocation16_spill] sm:$0xff] %v7266_v8  ;;  %vm2441_vm10 = vcmp.gt.f32.partialorder %v7217_v42, 0.0  ;;  %v7279_v17 = vmul.f32 0.01, %v7240_v58  ;;  %v2573_v32 = vsel %vm2445_vm9, %v7198_v16, %v2509_v56 }
 0x231   : > { %v2043_v39 = vpop.f32.mrb[21].mxu0  ;;  %v7228_v50 = vpop.f32.mrb[21].mxu1  ;;  %v2618_v54 = vpack.c.bf16 %v2574_v60, %v2570_v14  ;;  %v7290_v46 = vmul.f32 0.01, %v7248_v52  ;;  %v7296_v60 = vmul.f32 0.01, %v7256_v62  ;;  %v2569_v19 = vsel %vm2441_vm10, %v7217_v42, %v2505_v7 }
 0x232   : > { %v2045_v55 = vpop.f32.mrb[22].mxu0  ;;  %v7243_v59 = vpop.f32.mrb[22].mxu1  ;;  %v7276_v13 = vadd.f32 %v2043_v39, %v7084_v28  ;;  %v7293_v39 = vmul.f32 0.01, %v7252_v2  ;;  %v6441_v16 = vld [vmem:[#allocation7 + $0x320] ss:$16 sps:$4 sm:$0xff]   ;;  %v2617_v22 = vpack.c.bf16 %v2573_v32, %v2569_v19  ;;  %v7329_v19 = vsel %vm2419_vm6, %v7153_v45, %v7178_v4 }
 0x233   : > { %3551 = vmatpush1.bf16.msra.mxu0 %v6429_v37  ;;  %3777 = vmatpush1.bf16.msra.mxu1 %v6432_v38  ;;  %v2047_v41 = vpop.f32.mrb[23].mxu0  ;;  %v2386_v15 = vpop.f32.mrb[23].mxu1  ;;  %v6446_v38 = vld [vmem:[#allocation7 + $0x32c] ss:$16 sps:$4 sm:$0xff]   ;;  %v7303_v56 = vmul.f32 0.01, %v7262_v9  ;;  %v7317_v25 = vadd.f32 %v2045_v55, %v7076_v26 }
 0x234   : > { %v5626_v18 = vadd.f32 %v2047_v41, %v7084_v28  ;;  %3552 = vmatprep.subr.bf16.mxu0 %v6437_v47  ;;  %3495 = vmatprep.mubr.bf16.mxu0 %v2618_v54  ;;  %v6444_v47 = vld [vmem:[#allocation7 + $0x328] ss:$16 sps:$4 sm:$0xff]   ;;  %v7306_v14 = vmul.f32 0.01, %v7266_v8  ;;  %v7310_v41 = vadd.f32 %v7201_v44, %v7076_v26  ;;  %v6449_v11 = vld [vmem:[#allocation7 + $0x344] ss:$16 sps:$4 sm:$0xff]   ;;  %v7349_v32 = vadd.f32 %v2386_v15, %v7088_v31 }
 0x235   : > { %3721 = vmatprep.mubr.bf16.mxu1 %v2618_v54  ;;  %8476 = vst [vmem:[#allocation17_spill] sm:$0xff] %v7303_v56  ;;  %3778 = vmatprep.subr.bf16.mxu1 %v6440_v34  ;;  %v2514_v54 = vmul.f32 0.01, %v7276_v13  ;;  %v7320_v44 = vmul.f32 0.01, %v7283_v3  ;;  %vm2450_vm11 = vcmp.gt.f32.partialorder %v7276_v13, 0.0  ;;  %v7344_v34 = vadd.f32 %v7243_v59, %v7080_v27 }
 0x236   : > { %8477 = vst [vmem:[#allocation18_spill] sm:$0xff] %v7306_v14  ;;  %v2518_v24 = vmul.f32 0.01, %v5626_v18  ;;  %vm2454_vm12 = vcmp.gt.f32.partialorder %v5626_v18, 0.0  ;;  %v7332_v55 = vmul.f32 0.01, %v7300_v57  ;;  %3496 = vmatmul.mubr.bf16.gmra.mrb[48].mxu0 %v2617_v22  ;;  %3722 = vmatmul.mubr.bf16.gmra.mrb[48].mxu1 %v2617_v22 }
 0x237   : > { %3553 = vmatpush1.bf16.msra.mxu0 %v6435_v6  ;;  %3779 = vmatpush1.bf16.msra.mxu1 %v6438_v12  ;;  %8478 = vst [vmem:[#allocation19_spill] sm:$0xff] %v7320_v44  ;;  %v7336_v6 = vadd.f32 %v7203_v30, %v7080_v27  ;;  %v7340_v12 = vadd.f32 %v7228_v50, %v7088_v31  ;;  %v6452_v45 = vld [vmem:[#allocation7 + $0x34c] ss:$16 sps:$4 sm:$0xff]   ;;  %vm2449_vm13 = vcmp.gt.f32.partialorder %v7310_v41, 0.0  ;;  %v2513_v4 = vmul.f32 0.01, %v7310_v41 }
 0x238   : > { %v2051_v43 = vpop.f32.mrb[24].mxu0  ;;  %v2390_v37 = vpop.f32.mrb[24].mxu1  ;;  %3554 = vmatprep.subr.bf16.mxu0 %v6443_v10  ;;  %3780 = vmatprep.subr.bf16.mxu1 %v6446_v38  ;;  %8479 = vst [vmem:[#allocation20_spill] sm:$0xff] %v7332_v55  ;;  %v6447_v10 = vld [vmem:[#allocation7 + $0x340] ss:$16 sps:$4 sm:$0xff]   ;;  %v2578_v23 = vsel %vm2450_vm11, %v7276_v13, %v2514_v54  ;;  %v2582_v15 = vsel %vm2454_vm12, %v5626_v18, %v2518_v24  ;;  %vm2453_vm14 = vcmp.gt.f32.partialorder %v7317_v25, 0.0 }
 0x239   : > { %v2053_v21 = vpop.f32.mrb[25].mxu0  ;;  %v2392_v20 = vpop.f32.mrb[25].mxu1  ;;  %v7352_v30 = vadd.f32 %v2051_v43, %v7076_v26  ;;  %v6450_v50 = vld [vmem:[#allocation7 + $0x348] ss:$16 sps:$4 sm:$0xff]   ;;  %v2517_v38 = vmul.f32 0.01, %v7317_v25  ;;  %v7356_v59 = vadd.f32 %v2390_v37, %v7080_v27  ;;  %v2622_v37 = vpack.c.bf16 %v2582_v15, %v2578_v23 }
 0x23a   : > { %v2055_v42 = vpop.f32.mrb[26].mxu0  ;;  %v7323_v7 = vpop.f32.mrb[26].mxu1  ;;  %v6455_v44 = vld [vmem:[#allocation7 + $0x364] ss:$16 sps:$4 sm:$0xff]   ;;  %v7364_v43 = vadd.f32 %v2053_v21, %v7084_v28  ;;  %v6458_v55 = vld [vmem:[#allocation7 + $0x36c] ss:$16 sps:$4 sm:$0xff]   ;;  %v7379_v21 = vadd.f32 %v2392_v20, %v7088_v31  ;;  %v2577_v15 = vsel %vm2449_vm13, %v7310_v41, %v2513_v4 }
 0x23b   : > { %3555 = vmatpush1.bf16.msra.mxu0 %v6441_v16  ;;  %3781 = vmatpush1.bf16.msra.mxu1 %v6444_v47  ;;  %v2057_v22 = vpop.f32.mrb[27].mxu0  ;;  %v2396_v61 = vpop.f32.mrb[27].mxu1  ;;  %v7370_v14 = vmul.f32 0.01, %v7336_v6  ;;  %v7373_v13 = vmul.f32 0.01, %v7340_v12 }
 0x23c   : > { %v7367_v56 = vadd.f32 %v2057_v22, %v7084_v28  ;;  %3556 = vmatprep.subr.bf16.mxu0 %v6449_v11  ;;  %v7376_v24 = vmul.f32 0.01, %v7344_v34  ;;  %3782 = vmatprep.subr.bf16.mxu1 %v6452_v45  ;;  %v6453_v18 = vld [vmem:[#allocation7 + $0x360] ss:$16 sps:$4 sm:$0xff]   ;;  %v6456_v54 = vld [vmem:[#allocation7 + $0x368] ss:$16 sps:$4 sm:$0xff]   ;;  %v7390_v22 = vadd.f32 %v2055_v42, %v7076_v26 }
 0x23d   : > { %8480 = vst [vmem:[#allocation21_spill] sm:$0xff] %v7370_v14  ;;  %8481 = vst [vmem:[#allocation22_spill] sm:$0xff] %v7373_v13  ;;  %vm2424_vm15 = vcmp.gt.f32.partialorder %v7170_v63, 0.0  ;;  %v7383_v23 = vmul.f32 0.01, %v7349_v32  ;;  %vm2457_vm0 = vcmp.gt.f32.partialorder %v7352_v30, 0.0  ;;  %3505 = vmatprep.mubr.bf16.mxu0 %v2622_v37  ;;  %3731 = vmatprep.mubr.bf16.mxu1 %v2622_v37 }
 0x23e   : > { %8482 = vst [vmem:[#allocation23_spill] sm:$0xff] %v7376_v24  ;;  %v7387_v11 = vmul.f32 0.01, %v7352_v30  ;;  %v6461_v20 = vld [vmem:[#allocation7 + $0x384] ss:$16 sps:$4 sm:$0xff]   ;;  %vm2423_vm1 = vcmp.gt.f32.partialorder %v7166_v0, 0.0  ;;  %v2581_v24 = vsel %vm2453_vm14, %v7317_v25, %v2517_v38 }
 0x23f   : > { %8483 = vst [vmem:[#allocation24_spill] sm:$0xff] %v7383_v23  ;;  %v7394_v45 = vmul.f32 0.01, %v7356_v59  ;;  %3557 = vmatpush1.bf16.msra.mxu0 %v6447_v10  ;;  %3783 = vmatpush1.bf16.msra.mxu1 %v6450_v50  ;;  %v6464_v23 = vld [vmem:[#allocation7 + $0x38c] ss:$16 sps:$4 sm:$0xff]   ;;  %vm2428_vm2 = vcmp.gt.f32.partialorder %v7182_v5, 0.0  ;;  %v2621_v4 = vpack.c.bf16 %v2581_v24, %v2577_v15  ;;  %v7426_v15 = vadd.f32 %v2396_v61, %v7088_v31 }
 0x240   : > { %v2061_v16 = vpop.f32.mrb[28].mxu0  ;;  %v2400_v47 = vpop.f32.mrb[28].mxu1  ;;  %vm2432_vm3 = vcmp.gt.f32.partialorder %v7225_v49, 0.0  ;;  %vm2458_vm4 = vcmp.gt.f32.partialorder %v7364_v43, 0.0  ;;  %v2526_v41 = vmul.f32 0.01, %v7367_v56  ;;  %3558 = vmatprep.subr.bf16.mxu0 %v6455_v44  ;;  %3784 = vmatprep.subr.bf16.mxu1 %v6458_v55 }
 0x241   : > { %8484 = vst [vmem:[#allocation25_spill] sm:$0xff] %v7394_v45  ;;  %v7403_v42 = vadd.f32 %v2061_v16, %v7076_v26  ;;  %v2063_v37 = vpop.f32.mrb[29].mxu0  ;;  %v2402_v14 = vpop.f32.mrb[29].mxu1  ;;  %vm2427_vm5 = vcmp.gt.f32.partialorder %v7174_v1, 0.0  ;;  %v2522_v38 = vmul.f32 0.01, %v7364_v43  ;;  %v7418_v45 = vadd.f32 %v7323_v7, %v7080_v27  ;;  %3506 = vmatmul.mubr.bf16.gmra.mrb[52].mxu0 %v2621_v4  ;;  %3732 = vmatmul.mubr.bf16.gmra.mrb[52].mxu1 %v2621_v4 }
 0x242   : > { %v5632_v25 = vadd.f32 %v2063_v37, %v7084_v28  ;;  %v2065_v10 = vpop.f32.mrb[30].mxu0  ;;  %v2404_v50 = vpop.f32.mrb[30].mxu1  ;;  %v7414_v16 = vmul.f32 0.01, %v7379_v21  ;;  %vm2462_vm7 = vcmp.gt.f32.partialorder %v7367_v56, 0.0  ;;  %vm2461_vm10 = vcmp.gt.f32.partialorder %v7390_v22, 0.0 }
 0x243   : > { %v6459_v44 = vld [vmem:[#allocation7 + $0x380] ss:$16 sps:$4 sm:$0xff]   ;;  %v6462_v55 = vld [vmem:[#allocation7 + $0x388] ss:$16 sps:$4 sm:$0xff]   ;;  %v2525_v24 = vmul.f32 0.01, %v7390_v22  ;;  %v7429_v7 = vadd.f32 %v2400_v47, %v7080_v27  ;;  %v7436_v13 = vadd.f32 %v2402_v14, %v7088_v31  ;;  %3559 = vmatpush1.bf16.msra.mxu0 %v6453_v18  ;;  %3785 = vmatpush1.bf16.msra.mxu1 %v6456_v54  ;;  %v5633_v61 = vadd.f32 %v2065_v10, %v7076_v26 }
 0x244   : > { %8485 = vst [vmem:[#allocation26_spill] sm:$0xff] %v7414_v16  ;;  %v6467_v37 = vld [vmem:[#allocation7 + $0x3a4] ss:$16 sps:$4 sm:$0xff]   ;;  %vm2465_vm14 = vcmp.gt.f32.partialorder %v7403_v42, 0.0  ;;  %v2530_v16 = vmul.f32 0.01, %v5632_v25  ;;  %v2590_v14 = vsel %vm2462_vm7, %v7367_v56, %v2526_v41  ;;  %3560 = vmatprep.subr.bf16.mxu0 %v6461_v20  ;;  %v7449_v54 = vadd.f32 %v2404_v50, %v7080_v27  ;;  %3786 = vmatprep.subr.bf16.mxu1 %v6464_v23 }
 0x245   : > { %v2067_v4 = vpop.f32.mrb[31].mxu0  ;;  %v2406_v47 = vpop.f32.mrb[31].mxu1  ;;  %v2529_v2 = vmul.f32 0.01, %v7403_v42  ;;  %vm2466_vm12 = vcmp.gt.f32.partialorder %v5632_v25, 0.0  ;;  %vm2451_vm7 = vcmp.gt.f32.partialorder %v7336_v6, 0.0  ;;  %v2585_v27 = vsel %vm2457_vm0, %v7352_v30, %v7387_v11 }
 0x246   : > { %v5634_v8 = vadd.f32 %v2067_v4, %v7084_v28  ;;  %v6470_v18 = vld [vmem:[#allocation7 + $0x3ac] ss:$16 sps:$4 sm:$0xff]   ;;  %v2533_v26 = vmul.f32 0.01, %v5633_v61  ;;  %v7452_v10 = vadd.f32 %v2406_v47, %v7088_v31  ;;  %v2586_v28 = vsel %vm2458_vm4, %v7364_v43, %v2522_v38  ;;  %v6465_v20 = vld [vmem:[#allocation7 + $0x3a0] ss:$16 sps:$4 sm:$0xff]  }
 0x247   : > { %vm2455_vm9 = vcmp.gt.f32.partialorder %v7344_v34, 0.0  ;;  %vm2456_vm13 = vcmp.gt.f32.partialorder %v7349_v32, 0.0  ;;  %vm2469_vm11 = vcmp.gt.f32.partialorder %v5633_v61, 0.0  ;;  %v7466_v31 = vmul.f32 0.01, %v7418_v45  ;;  %3561 = vmatpush1.bf16.msra.mxu0 %v6459_v44  ;;  %3787 = vmatpush1.bf16.msra.mxu1 %v6462_v55 }
 0x248   : > { %vm2470_vm8 = vcmp.gt.f32.partialorder %v5634_v8, 0.0  ;;  %v2534_v56 = vmul.f32 0.01, %v5634_v8  ;;  %v2626_v43 = vpack.c.bf16 %v2590_v14, %v2586_v28  ;;  %v2589_v23 = vsel %vm2461_vm10, %v7390_v22, %v2525_v24  ;;  %v6468_v41 = vld [vmem:[#allocation7 + $0x3a8] ss:$16 sps:$4 sm:$0xff]   ;;  %3562 = vmatprep.subr.bf16.mxu0 %v6467_v37  ;;  %3788 = vmatprep.subr.bf16.mxu1 %v6470_v18 }
 0x249   : > { %v2594_v50 = vsel %vm2466_vm12, %v5632_v25, %v2530_v16  ;;  %vm2459_vm4 = vcmp.gt.f32.partialorder %v7356_v59, 0.0  ;;  %vm2463_vm0 = vcmp.gt.f32.partialorder %v7418_v45, 0.0  ;;  %vm2464_vm6 = vcmp.gt.f32.partialorder %v7426_v15, 0.0  ;;  %v6473_v44 = vld [vmem:[#allocation7 + $0x3c4] ss:$16 sps:$4 sm:$0xff]  }
 0x24a   : > { %v2625_v30 = vpack.c.bf16 %v2589_v23, %v2585_v27  ;;  %v2598_v11 = vsel %vm2470_vm8, %v5634_v8, %v2534_v56  ;;  %v2593_v22 = vsel %vm2465_vm14, %v7403_v42, %v2529_v2  ;;  %v7480_v38 = vmul.f32 0.01, %v7426_v15  ;;  %3515 = vmatprep.mubr.bf16.mxu0 %v2626_v43  ;;  %3741 = vmatprep.mubr.bf16.mxu1 %v2626_v43  ;;  %v6476_v55 = vld [vmem:[#allocation7 + $0x3cc] ss:$16 sps:$4 sm:$0xff]   ;;  %v8492_v18 = vld [vmem:[#allocation18_spill] sm:$0xff] }
 0x24b   : > { %v2630_v25 = vpack.c.bf16 %v2598_v11, %v2594_v50  ;;  %v2597_v16 = vsel %vm2469_vm11, %v5633_v61, %v2533_v26  ;;  %v2552_v24 = vsel %vm2424_vm15, %v7170_v63, %v7210_v35  ;;  %vm2467_vm8 = vcmp.gt.f32.partialorder %v7429_v7, 0.0  ;;  %3563 = vmatpush1.bf16.msra.mxu0 %v6465_v20  ;;  %3789 = vmatpush1.bf16.msra.mxu1 %v6468_v41  ;;  %v6471_v63 = vld [vmem:[#allocation7 + $0x3c0] ss:$16 sps:$4 sm:$0xff]   ;;  %v6474_v35 = vld [vmem:[#allocation7 + $0x3c8] ss:$16 sps:$4 sm:$0xff]  }
 0x24c   : > { %v7489_v8 = vmul.f32 0.01, %v7429_v7  ;;  %3516 = vmatmul.mubr.bf16.gmra.mrb[56].mxu0 %v2625_v30  ;;  %3742 = vmatmul.mubr.bf16.gmra.mrb[56].mxu1 %v2625_v30  ;;  %v2629_v2 = vpack.c.bf16 %v2597_v16, %v2593_v22  ;;  %v7492_v42 = vpack.c.bf16 %v2552_v24, %v7233_v51  ;;  %v2551_v37 = vsel %vm2423_vm1, %v7166_v0, %v7207_v29  ;;  %v6479_v29 = vld [vmem:[#allocation7 + $0x3e4] ss:$16 sps:$4 sm:$0xff]   ;;  %v6482_v47 = vld [vmem:[#allocation7 + $0x3ec] ss:$16 sps:$4 sm:$0xff]  }
 0x24d   : > { %vm2468_vm10 = vcmp.gt.f32.partialorder %v7436_v13, 0.0  ;;  %v7500_v61 = vpack.c.bf16 %v2551_v37, %v7329_v19  ;;  %v2556_v51 = vsel %vm2428_vm2, %v7182_v5, %v7221_v48  ;;  %v2560_v4 = vsel %vm2432_vm3, %v7225_v49, %v7272_v40  ;;  %3525 = vmatprep.mubr.bf16.mxu0 %v2630_v25  ;;  %3751 = vmatprep.mubr.bf16.mxu1 %v2630_v25  ;;  %v8493_v26 = vld [vmem:[#allocation16_spill] sm:$0xff]  ;;  %v8499_v23 = vld [vmem:[#allocation19_spill] sm:$0xff]  ;;  %v8501_v41 = vld [vmem:[#allocation22_spill] sm:$0xff] }
 0x24e   : > { %v2532_v0 = vmul.f32 0.01, %v7436_v13  ;;  %v7511_v14 = vpack.c.bf16 %v2560_v4, %v2556_v51  ;;  %v2555_v19 = vsel %vm2427_vm5, %v7174_v1, %v7213_v36  ;;  %vm8486_vm15 = vcmp.gt.f32.partialorder %v7191_v33, 0.0  ;;  %3564 = vmatprep.subr.bf16.mxu0 %v6473_v44  ;;  %3790 = vmatprep.subr.bf16.mxu1 %v6476_v55  ;;  %v6477_v56 = vld [vmem:[#allocation7 + $0x3e0] ss:$16 sps:$4 sm:$0xff]   ;;  %v6488_v4 = vld [vmem:[%s8441_s5 + $0x8] sm:$0xff]  }
 0x24f   : > { %v2559_v5 = vsel %vm8486_vm15, %v7191_v33, %v7236_v53  ;;  %vm2471_vm1 = vcmp.gt.f32.partialorder %v7449_v54, 0.0  ;;  %vm8487_vm2 = vcmp.gt.f32.partialorder %v7248_v52, 0.0  ;;  %vm8488_vm3 = vcmp.gt.f32.partialorder %v7256_v62, 0.0  ;;  %v8490_v53 = vld [vmem:[#allocation15_spill] sm:$0xff]  ;;  %3565 = vmatpush1.bf16.msra.mxu0 %v6471_v63  ;;  %3791 = vmatpush1.bf16.msra.mxu1 %v6474_v35  ;;  %v8504_v11 = vld [vmem:[#allocation21_spill] sm:$0xff]  ;;  %v8506_v44 = vld [vmem:[#allocation26_spill] sm:$0xff] }
 0x250   : > { %v7522_v48 = vpack.c.bf16 %v2559_v5, %v2555_v19  ;;  %v2564_v49 = vsel %vm8487_vm2, %v7248_v52, %v7290_v46  ;;  %v2568_v1 = vsel %vm8488_vm3, %v7256_v62, %v7296_v60  ;;  %vm8489_vm5 = vcmp.gt.f32.partialorder %v7240_v58, 0.0  ;;  %v8495_v60 = vld [vmem:[#allocation20_spill] sm:$0xff]  ;;  %3566 = vmatprep.subr.bf16.mxu0 %v6479_v29  ;;  %3792 = vmatprep.subr.bf16.mxu1 %v6482_v47  ;;  %v8505_v25 = vld [vmem:[#allocation23_spill] sm:$0xff]  ;;  %v8508_v55 = vld [vmem:[#allocation14_spill] sm:$0xff] }
 0x251   : > { %v7532_v36 = vpack.c.bf16 %v2568_v1, %v2564_v49  ;;  %v2563_v33 = vsel %vm8489_vm5, %v7240_v58, %v7279_v17  ;;  %vm8491_vm11 = vcmp.gt.f32.partialorder %v8490_v53, 0.0  ;;  %vm8494_vm12 = vcmp.gt.f32.partialorder %v8493_v26, 0.0  ;;  %v8497_v17 = vld [vmem:[#allocation17_spill] sm:$0xff]  ;;  %v6485_v16 = vld [vmem:[%s8441_s5 + $0xc0] sm:$0xff]   ;;  %v6495_v5 = vld [vmem:[%s8441_s5 + $0x58] sm:$0xff]  }
 0x252   : > { %v2567_v40 = vsel %vm8491_vm11, %v8490_v53, %v7293_v39  ;;  %v2572_v52 = vsel %vm8494_vm12, %v8493_v26, %v8492_v18  ;;  %v2535_v46 = vmul.f32 0.01, %v7449_v54  ;;  %vm8496_vm14 = vcmp.gt.f32.partialorder %v7300_v57, 0.0  ;;  %v6480_v27 = vld [vmem:[#allocation7 + $0x3e8] ss:$16 sps:$4 sm:$0xff]   ;;  %v6491_v29 = vld [vmem:[%s8441_s5 + $0x50] sm:$0xff]  }
 0x253   : > { %v7547_v62 = vpack.c.bf16 %v2567_v40, %v2563_v33  ;;  %v2576_v58 = vsel %vm8496_vm14, %v7300_v57, %v8495_v60  ;;  %vm8498_vm15 = vcmp.gt.f32.partialorder %v7262_v9, 0.0  ;;  %v2536_v28 = vmul.f32 0.01, %v7452_v10  ;;  %v8509_v37 = vld [vmem:[#allocation25_spill] sm:$0xff]  ;;  %3567 = vmatpush1.bf16.msra.mxu0 %v6477_v56  ;;  %3793 = vmatpush1.bf16.msra.mxu1 %v6480_v27  ;;  %v6497_v49 = vld [vmem:[%s8441_s5 + $0xd8] sm:$0xff]   ;;  %v6500_v53 = vld [vmem:[%s8441_s5 + $0x20] sm:$0xff]  }
 0x254   : > { %v2571_v39 = vsel %vm8498_vm15, %v7262_v9, %v8497_v17  ;;  %v7558_v43 = vpack.c.bf16 %v2576_v58, %v2572_v52  ;;  %vm8500_vm2 = vcmp.gt.f32.partialorder %v7283_v3, 0.0  ;;  %vm8502_vm3 = vcmp.gt.f32.partialorder %v7340_v12, 0.0  ;;  %v8503_v9 = vld [vmem:[#allocation24_spill] sm:$0xff]  ;;  %3526 = vmatmul.mubr.bf16.gmra.mrb[60].mxu0 %v2629_v2  ;;  %3752 = vmatmul.mubr.bf16.gmra.mrb[60].mxu1 %v2629_v2  ;;  %v6492_v47 = vld [vmem:[%s8441_s5 + $0x10] sm:$0xff]   ;;  %v6496_v1 = vld [vmem:[%s8441_s5 + $0x18] sm:$0xff]  }
 0x255   : > { %v2575_v20 = vsel %vm8500_vm2, %v7283_v3, %v8499_v23  ;;  %v2580_v57 = vsel %vm8502_vm3, %v7340_v12, %v8501_v41  ;;  %v2584_v30 = vsel %vm2456_vm13, %v7349_v32, %v8503_v9  ;;  %v2579_v22 = vsel %vm2451_vm7, %v7336_v6, %v8504_v11  ;;  %v6483_v12 = vld [vmem:[%s8441_s5 + $0x40] sm:$0xff]   ;;  %3568 = vmatprep.mubr.bf16.mxu0 %v8508_v55  ;;  %v6494_v19 = vld [vmem:[%s8441_s5 + $0x90] sm:$0xff]   ;;  %v6498_v33 = vld [vmem:[%s8441_s5 + $0x98] sm:$0xff]  }
 0x256   : > { %v7568_v50 = vpack.c.bf16 %v2575_v20, %v2571_v39  ;;  %v2583_v3 = vsel %vm2455_vm9, %v7344_v34, %v8505_v25  ;;  %vm2472_vm13 = vcmp.gt.f32.partialorder %v7452_v10, 0.0  ;;  %v7589_v32 = vpack.c.bf16 %v2584_v30, %v2580_v57  ;;  %3794 = vmatprep.mubr.bf16.mxu1 %v8508_v55  ;;  %5475 = vmatprep.subr.bf16.mxu0 %v6483_v12  ;;  %v6502_v40 = vld [vmem:[%s8441_s5 + $0xa0] sm:$0xff]   ;;  %v6503_v18 = vld [vmem:[%s8441_s5 + $0x68] sm:$0xff]   ;;  %v6508_v60 = vld [vmem:[%s8441_s5 + $0x30] sm:$0xff]  }
 0x257   : > { %v7591_v6 = vpack.c.bf16 %v2583_v3, %v2579_v22  ;;  %vm8507_vm9 = vcmp.gt.f32.partialorder %v7379_v21, 0.0  ;;  %v2592_v24 = vsel %vm2464_vm6, %v7426_v15, %v7480_v38  ;;  %v2587_v2 = vsel %vm2459_vm4, %v7356_v59, %v8509_v37  ;;  %5539 = vmatprep.subr.bf16.mxu1 %v6485_v16  ;;  %v6505_v26 = vld [vmem:[%s8441_s5 + $0xe8] sm:$0xff]   ;;  %v6510_v58 = vld [vmem:[%s8441_s5 + $0xb0] sm:$0xff]   ;;  %v6512_v17 = vld [vmem:[%s8441_s5 + $0x38] sm:$0xff]  }
 0x258   : > { %v2588_v34 = vsel %vm8507_vm9, %v7379_v21, %v8506_v44  ;;  %v2591_v63 = vsel %vm2463_vm0, %v7418_v45, %v7466_v31  ;;  %v2596_v15 = vsel %vm2468_vm10, %v7436_v13, %v2532_v0  ;;  %v2600_v38 = vsel %vm2472_vm13, %v7452_v10, %v2536_v28  ;;  %v6484_v13 = vld [vmem:[%s8441_s5] sm:$0xff]   ;;  %v6490_v0 = vld [vmem:[%s8441_s5 + $0x88] sm:$0xff]   ;;  %v6513_v39 = vld [vmem:[%s8441_s5 + $0xf8] sm:$0xff]  }
 0x259   : > { %v7611_v21 = vpack.c.bf16 %v2592_v24, %v2588_v34  ;;  %v7613_v35 = vpack.c.bf16 %v2591_v63, %v2587_v2  ;;  %v2595_v59 = vsel %vm2467_vm8, %v7429_v7, %v7489_v8  ;;  %v2599_v45 = vsel %vm2471_vm1, %v7449_v54, %v2535_v46  ;;  %v6486_v10 = vld [vmem:[%s8441_s5 + $0x80] sm:$0xff]   ;;  %v6487_v7 = vld [vmem:[%s8441_s5 + $0x48] sm:$0xff]   ;;  %v6514_v28 = vld [vmem:[%s8441_s5 + $0xb8] sm:$0xff]  }
 0x25a   : > { %v7628_v31 = vpack.c.bf16 %v2600_v38, %v2596_v15  ;;  %v7630_v51 = vpack.c.bf16 %v2599_v45, %v2595_v59  ;;  %v6489_v54 = vld [vmem:[%s8441_s5 + $0xc8] sm:$0xff]   ;;  %v4767_v56 = vld [vmem:[%s6959_s12] sm:$0xff]  ;;  %v4769_v23 = vld [vmem:[%s6959_s12 + $0x10] sm:$0xff] }
 0x25b   : > { %v8510_v8 = vld [vmem:[#allocation13_spill] sm:$0xff]  ;;  %v4770_v41 = vld [vmem:[%s6959_s12 + $0x18] sm:$0xff]  ;;  %v4775_v25 = vld [vmem:[%s6959_s12 + $0x40] sm:$0xff] }
 0x25c   : > { %3569 = vmatmul.mubr.bf16.vlgmr.msra.gmra.mrb[32].mxu0 %v8510_v8  ;;  %3795 = vmatmul.mubr.bf16.vlgmr.msra.gmra.mrb[32].mxu1 %v8510_v8  ;;  %v6504_v52 = vld [vmem:[%s8441_s5 + $0x28] sm:$0xff]   ;;  %v4778_v57 = vld [vmem:[%s6959_s12 + $0x58] sm:$0xff]  ;;  %v4773_v11 = vld [vmem:[%s6959_s12 + $0x30] sm:$0xff] }
 0x25d   : > { %3578 = vmatprep.mubr.bf16.mxu0 %v7492_v42  ;;  %3804 = vmatprep.mubr.bf16.mxu1 %v7492_v42  ;;  %v6493_v42 = vld [vmem:[%s8441_s5 + $0xd0] sm:$0xff]   ;;  %v6506_v46 = vld [vmem:[%s8441_s5 + $0xa8] sm:$0xff]   ;;  %v4774_v22 = vld [vmem:[%s6959_s12 + $0x38] sm:$0xff] }
 0x25e   : > { %5476 = vmatpush3.bf16.msra.mxu0 %v6484_v13  ;;  %5540 = vmatpush3.bf16.msra.mxu1 %v6486_v10  ;;  %v4768_v27 = vld [vmem:[%s6959_s12 + $0x8] sm:$0xff]  ;;  %v4777_v3 = vld [vmem:[%s6959_s12 + $0x50] sm:$0xff]  ;;  %v4779_v12 = vld [vmem:[%s6959_s12 + $0x60] sm:$0xff] }
 0x25f   : > { %5477 = vmatprep.subr.bf16.mxu0 %v6487_v7  ;;  %5541 = vmatprep.subr.bf16.mxu1 %v6489_v54  ;;  %v4776_v20 = vld [vmem:[%s6959_s12 + $0x48] sm:$0xff]  ;;  %v2761_v16 = vld [vmem:[%s8440_s4] sm:$0xf] }
 0x260   : > { %v4780_v9 = vld [vmem:[%s6959_s12 + $0x68] sm:$0xff] }
 0x261   : > { %v4772_v30 = vld [vmem:[%s6959_s12 + $0x28] sm:$0xff] }
 0x262   : > { %5478 = vmatpush3.bf16.msra.mxu0 %v6488_v4  ;;  %5542 = vmatpush3.bf16.msra.mxu1 %v6490_v0 }
 0x263   : > { %5479 = vmatprep.subr.bf16.mxu0 %v6491_v29  ;;  %5543 = vmatprep.subr.bf16.mxu1 %v6493_v42 }
 0x264   : > { %3579 = vmatmul.mubr.bf16.gmra.mrb[36].mxu0 %v7500_v61  ;;  %3805 = vmatmul.mubr.bf16.gmra.mrb[36].mxu1 %v7500_v61  ;;  %v6499_v61 = vld [vmem:[%s8441_s5 + $0x60] sm:$0xff]  }
 0x265   : > { %3588 = vmatprep.mubr.bf16.mxu0 %v7511_v14  ;;  %3814 = vmatprep.mubr.bf16.mxu1 %v7511_v14  ;;  %v6501_v14 = vld [vmem:[%s8441_s5 + $0xe0] sm:$0xff]  }
 0x266   : > { %5480 = vmatpush3.bf16.msra.mxu0 %v6492_v47  ;;  %5544 = vmatpush3.bf16.msra.mxu1 %v6494_v19 }
 0x267   : > { %5481 = vmatprep.subr.bf16.mxu0 %v6495_v5  ;;  %5545 = vmatprep.subr.bf16.mxu1 %v6497_v49 }
 0x26a   : > { %5482 = vmatpush3.bf16.msra.mxu0 %v6496_v1  ;;  %5546 = vmatpush3.bf16.msra.mxu1 %v6498_v33 }
 0x26b   : > { %5483 = vmatprep.subr.bf16.mxu0 %v6499_v61  ;;  %5547 = vmatprep.subr.bf16.mxu1 %v6501_v14 }
 0x26c   : > { %3589 = vmatmul.mubr.bf16.gmra.mrb[40].mxu0 %v7522_v48  ;;  %3815 = vmatmul.mubr.bf16.gmra.mrb[40].mxu1 %v7522_v48  ;;  %v6507_v48 = vld [vmem:[%s8441_s5 + $0x70] sm:$0xff]  }
 0x26d   : > { %3598 = vmatprep.mubr.bf16.mxu0 %v7532_v36  ;;  %3824 = vmatprep.mubr.bf16.mxu1 %v7532_v36  ;;  %v6509_v36 = vld [vmem:[%s8441_s5 + $0xf0] sm:$0xff]  }
 0x26e   : > { %5484 = vmatpush3.bf16.msra.mxu0 %v6500_v53  ;;  %5548 = vmatpush3.bf16.msra.mxu1 %v6502_v40 }
 0x26f   : > { %5485 = vmatprep.subr.bf16.mxu0 %v6503_v18  ;;  %5549 = vmatprep.subr.bf16.mxu1 %v6505_v26 }
 0x272   : > { %5486 = vmatpush3.bf16.msra.mxu0 %v6504_v52  ;;  %5550 = vmatpush3.bf16.msra.mxu1 %v6506_v46 }
 0x273   : > { %5487 = vmatprep.subr.bf16.mxu0 %v6507_v48  ;;  %5551 = vmatprep.subr.bf16.mxu1 %v6509_v36 }
 0x274   : > { %3599 = vmatmul.mubr.bf16.gmra.mrb[44].mxu0 %v7547_v62  ;;  %3825 = vmatmul.mubr.bf16.gmra.mrb[44].mxu1 %v7547_v62  ;;  %v6511_v62 = vld [vmem:[%s8441_s5 + $0x78] sm:$0xff]  }
 0x275   : > { %3608 = vmatprep.mubr.bf16.mxu0 %v7558_v43  ;;  %3834 = vmatprep.mubr.bf16.mxu1 %v7558_v43  ;;  %v6743_v43 = vmov 0  }
 0x276   : > { %5488 = vmatpush3.bf16.msra.mxu0 %v6508_v60  ;;  %5552 = vmatpush3.bf16.msra.mxu1 %v6510_v58 }
 0x277   : > { %5489 = vmatprep.subr.bf16.mxu0 %v6511_v62  ;;  %5553 = vmatprep.subr.bf16.mxu1 %v6513_v39 }
 0x278   : > { %6001 = vset.pattern.permute.xlu0 %v6743_v43  ;;  %6002 = vset.pattern.permute.xlu1 %v6743_v43 }
 0x279   : > { %4784 = vperm.xlu0 %6001, %v4767_v56   ;;  %4787 = vperm.xlu1 %6002, %v4768_v27  }
 0x27a   : > { %5490 = vmatpush3.bf16.msra.mxu0 %v6512_v17  ;;  %5554 = vmatpush3.bf16.msra.mxu1 %v6514_v28 }
 0x27c   : > { %3609 = vmatmul.mubr.bf16.gmra.mrb[48].mxu0 %v7568_v50  ;;  %3835 = vmatmul.mubr.bf16.gmra.mrb[48].mxu1 %v7568_v50  ;;  %v4771_v50 = vld [vmem:[%s6959_s12 + $0x20] sm:$0xff] }
 0x27d   : > { %3618 = vmatprep.mubr.bf16.mxu0 %v7589_v32  ;;  %3844 = vmatprep.mubr.bf16.mxu1 %v7589_v32  ;;  %v8511_v32 = vld [vmem:[#allocation12_spill] sm:$0xff] }
 0x27e   : > { %4790 = vperm.xlu1 %6002, %v4769_v23   ;;  %4811 = vperm.xlu0 %6001, %v4776_v20   ;;  %v8513_v34 = vsub.s32 2, %v8511_v32  ;;  %v8514_v24 = vsub.s32 1, %v8511_v32  ;;  %v8515_v2 = vsub.s32 3, %v8511_v32 }
 0x280   : > { %v7775_v55 = vrot.slane %v2761_v16, %v8513_v34  ;;  %v7779_v37 = vrot.slane %v2761_v16, %v8514_v24  ;;  %v7783_v63 = vrot.slane %v2761_v16, %v8515_v2 }
 0x282   : > { %4793 = vperm.xlu1 %6002, %v4770_v41   ;;  %4817 = vperm.xlu0 %6001, %v4778_v57  }
 0x284   : > { %3619 = vmatmul.mubr.bf16.gmra.mrb[52].mxu0 %v7591_v6  ;;  %3845 = vmatmul.mubr.bf16.gmra.mrb[52].mxu1 %v7591_v6  ;;  %v8512_v6 = vsub.s32 0, %v8511_v32 }
 0x285   : > { %3628 = vmatprep.mubr.bf16.mxu0 %v7611_v21  ;;  %3854 = vmatprep.mubr.bf16.mxu1 %v7611_v21 }
 0x286   : > { %4796 = vperm.xlu1 %6002, %v4771_v50   ;;  %4823 = vperm.xlu0 %6001, %v4780_v9   ;;  %v7771_v44 = vrot.slane %v2761_v16, %v8512_v6 }
 0x28a   : > { %4799 = vperm.xlu1 %6002, %v4772_v30  }
 0x28c   : > { %3629 = vmatmul.mubr.bf16.gmra.mrb[56].mxu0 %v7613_v35  ;;  %3855 = vmatmul.mubr.bf16.gmra.mrb[56].mxu1 %v7613_v35 }
 0x28d   : > { %3638 = vmatprep.mubr.bf16.mxu0 %v7628_v31  ;;  %3864 = vmatprep.mubr.bf16.mxu1 %v7628_v31 }
 0x28e   : > { %4802 = vperm.xlu1 %6002, %v4773_v11  }
 0x292   : > { %4805 = vperm.xlu1 %6002, %v4774_v22  }
 0x294   : > { %3639 = vmatmul.mubr.bf16.gmra.mrb[60].mxu0 %v7630_v51  ;;  %3865 = vmatmul.mubr.bf16.gmra.mrb[60].mxu1 %v7630_v51 }
 0x296   : > { %4808 = vperm.xlu1 %6002, %v4775_v25  }
 0x29a   : > { %4814 = vperm.xlu1 %6002, %v4777_v3  }
 0x29e   : > { %4820 = vperm.xlu1 %6002, %v4779_v12  }
 0x32f   : > { %v3570_v21 = vpop.f32.mrb[32].mxu0  ;;  %v3796_v35 = vpop.f32.mrb[32].mxu1 }
 0x330   : > { %v5667_v15 = vadd.f32 %v3570_v21, %v7771_v44  ;;  %v5699_v38 = vadd.f32 %v3796_v35, %v7775_v55  ;;  %v3572_v59 = vpop.f32.mrb[33].mxu0  ;;  %v3798_v45 = vpop.f32.mrb[33].mxu1 }
 0x331   : > { %v5668_v31 = vadd.f32 %v3572_v59, %v7779_v37  ;;  %v5700_v51 = vadd.f32 %v3798_v45, %v7783_v63  ;;  %v3574_v13 = vpop.f32.mrb[34].mxu0  ;;  %v3800_v10 = vpop.f32.mrb[34].mxu1 }
 0x332   : > { %vm3875_vm6 = vcmp.gt.f32.partialorder %v5667_v15, 0.0  ;;  %v3939_v7 = vmul.f32 0.01, %v5667_v15  ;;  %vm3877_vm7 = vcmp.gt.f32.partialorder %v5699_v38, 0.0  ;;  %v3941_v54 = vmul.f32 0.01, %v5699_v38 }
 0x333   : > { %vm3876_vm4 = vcmp.gt.f32.partialorder %v5668_v31, 0.0  ;;  %v3940_v8 = vmul.f32 0.01, %v5668_v31  ;;  %v5669_v4 = vadd.f32 %v3574_v13, %v7771_v44  ;;  %v5701_v0 = vadd.f32 %v3800_v10, %v7775_v55  ;;  %v3576_v29 = vpop.f32.mrb[35].mxu0  ;;  %v3802_v42 = vpop.f32.mrb[35].mxu1 }
 0x334   : > { %vm3878_vm0 = vcmp.gt.f32.partialorder %v5700_v51, 0.0  ;;  %v3942_v47 = vmul.f32 0.01, %v5700_v51  ;;  %v5670_v19 = vadd.f32 %v3576_v29, %v7779_v37  ;;  %v5702_v5 = vadd.f32 %v3802_v42, %v7783_v63 }
 0x335   : > { %vm3879_vm8 = vcmp.gt.f32.partialorder %v5669_v4, 0.0  ;;  %v3943_v49 = vmul.f32 0.01, %v5669_v4  ;;  %vm3881_vm10 = vcmp.gt.f32.partialorder %v5701_v0, 0.0  ;;  %v3945_v1 = vmul.f32 0.01, %v5701_v0 }
 0x336   : > { %vm3880_vm1 = vcmp.gt.f32.partialorder %v5670_v19, 0.0  ;;  %v3944_v33 = vmul.f32 0.01, %v5670_v19  ;;  %vm3882_vm5 = vcmp.gt.f32.partialorder %v5702_v5, 0.0  ;;  %v3946_v61 = vmul.f32 0.01, %v5702_v5 }
 0x337   : > { %v4003_v14 = vsel %vm3875_vm6, %v5667_v15, %v3939_v7  ;;  %v4005_v53 = vsel %vm3877_vm7, %v5699_v38, %v3941_v54  ;;  %v4007_v40 = vsel %vm3879_vm8, %v5669_v4, %v3943_v49  ;;  %v4009_v18 = vsel %vm3881_vm10, %v5701_v0, %v3945_v1  ;;  %v3580_v26 = vpop.f32.mrb[36].mxu0  ;;  %v3806_v52 = vpop.f32.mrb[36].mxu1 }
 0x338   : > { %v4067_v46 = vpack.c.bf16 %v4007_v40, %v4003_v14  ;;  %v4069_v48 = vpack.c.bf16 %v4009_v18, %v4005_v53  ;;  %v5671_v36 = vadd.f32 %v3580_v26, %v7771_v44  ;;  %v5703_v60 = vadd.f32 %v3806_v52, %v7775_v55  ;;  %v3582_v58 = vpop.f32.mrb[37].mxu0  ;;  %v3808_v62 = vpop.f32.mrb[37].mxu1 }
 0x339   : > { %v5672_v17 = vadd.f32 %v3582_v58, %v7779_v37  ;;  %v5704_v39 = vadd.f32 %v3808_v62, %v7783_v63  ;;  %v3584_v28 = vpop.f32.mrb[38].mxu0  ;;  %v3810_v56 = vpop.f32.mrb[38].mxu1  ;;  %v4008_v27 = vsel %vm3880_vm1, %v5670_v19, %v3944_v33  ;;  %v4010_v43 = vsel %vm3882_vm5, %v5702_v5, %v3946_v61 }
 0x33a   : > { %v3947_v23 = vmul.f32 0.01, %v5671_v36  ;;  %v4004_v20 = vsel %vm3876_vm4, %v5668_v31, %v3940_v8  ;;  %v4006_v41 = vsel %vm3878_vm0, %v5700_v51, %v3942_v47  ;;  %vm3883_vm11 = vcmp.gt.f32.partialorder %v5671_v36, 0.0  ;;  %v3586_v11 = vpop.f32.mrb[39].mxu0  ;;  %v3812_v22 = vpop.f32.mrb[39].mxu1 }
 0x33b   : > { %vm3885_vm12 = vcmp.gt.f32.partialorder %v5703_v60, 0.0  ;;  %v3948_v57 = vmul.f32 0.01, %v5672_v17  ;;  %v3950_v50 = vmul.f32 0.01, %v5704_v39  ;;  %v5673_v9 = vadd.f32 %v3584_v28, %v7771_v44 }
 0x33c   : > { %v5705_v30 = vadd.f32 %v3810_v56, %v7775_v55  ;;  %v4068_v25 = vpack.c.bf16 %v4008_v27, %v4004_v20  ;;  %v4070_v3 = vpack.c.bf16 %v4010_v43, %v4006_v41  ;;  %vm3884_vm14 = vcmp.gt.f32.partialorder %v5672_v17, 0.0 }
 0x33d   : > { %vm3886_vm15 = vcmp.gt.f32.partialorder %v5704_v39, 0.0  ;;  %v5674_v12 = vadd.f32 %v3586_v11, %v7779_v37  ;;  %v5706_v16 = vadd.f32 %v3812_v22, %v7783_v63  ;;  %vm3887_vm2 = vcmp.gt.f32.partialorder %v5673_v9, 0.0 }
 0x33e   : > { %v3951_v32 = vmul.f32 0.01, %v5673_v9  ;;  %vm3889_vm3 = vcmp.gt.f32.partialorder %v5705_v30, 0.0  ;;  %v3953_v6 = vmul.f32 0.01, %v5705_v30  ;;  %4394 = vmatprep.mubr.bf16.mxu0 %v4068_v25  ;;  %4491 = vmatprep.mubr.bf16.mxu1 %v4070_v3  ;;  %v4012_v15 = vsel %vm3884_vm14, %v5672_v17, %v3948_v57 }
 0x33f   : > { %vm3888_vm13 = vcmp.gt.f32.partialorder %v5674_v12, 0.0  ;;  %v3952_v34 = vmul.f32 0.01, %v5674_v12  ;;  %vm3890_vm9 = vcmp.gt.f32.partialorder %v5706_v16, 0.0  ;;  %v3954_v24 = vmul.f32 0.01, %v5706_v16  ;;  %4395 = vmatmul.mubr.bf16.vlgmr.msra.gmra.mrb[64].mxu0 %v4067_v46  ;;  %4492 = vmatmul.mubr.bf16.vlgmr.msra.gmra.mrb[64].mxu1 %v4069_v48 }
 0x340   : > { %v3949_v2 = vmul.f32 0.01, %v5703_v60  ;;  %v3590_v21 = vpop.f32.mrb[40].mxu0  ;;  %v3816_v35 = vpop.f32.mrb[40].mxu1  ;;  %v4014_v38 = vsel %vm3886_vm15, %v5704_v39, %v3950_v50  ;;  %v4015_v59 = vsel %vm3887_vm2, %v5673_v9, %v3951_v32  ;;  %v4017_v7 = vsel %vm3889_vm3, %v5705_v30, %v3953_v6 }
 0x341   : > { %v5675_v45 = vadd.f32 %v3590_v21, %v7771_v44  ;;  %v3592_v31 = vpop.f32.mrb[41].mxu0  ;;  %v3818_v51 = vpop.f32.mrb[41].mxu1  ;;  %v4016_v13 = vsel %vm3888_vm13, %v5674_v12, %v3952_v34  ;;  %v4018_v10 = vsel %vm3890_vm9, %v5706_v16, %v3954_v24  ;;  %v7815_v19 = vadd.f32 %v3816_v35, %v7775_v55 }
 0x342   : > { %v5676_v54 = vadd.f32 %v3592_v31, %v7779_v37  ;;  %v5708_v8 = vadd.f32 %v3818_v51, %v7783_v63  ;;  %v3594_v4 = vpop.f32.mrb[42].mxu0  ;;  %v3820_v0 = vpop.f32.mrb[42].mxu1  ;;  %v4072_v29 = vpack.c.bf16 %v4016_v13, %v4012_v15  ;;  %v4074_v42 = vpack.c.bf16 %v4018_v10, %v4014_v38 }
 0x343   : > { %v3955_v47 = vmul.f32 0.01, %v5675_v45  ;;  %v4011_v5 = vsel %vm3883_vm11, %v5671_v36, %v3947_v23  ;;  %v4013_v49 = vsel %vm3885_vm12, %v5703_v60, %v3949_v2  ;;  %v5677_v1 = vadd.f32 %v3594_v4, %v7771_v44  ;;  %v3596_v33 = vpop.f32.mrb[43].mxu0  ;;  %v3822_v61 = vpop.f32.mrb[43].mxu1 }
 0x344   : > { %4402 = vmatprep.mubr.bf16.mxu0 %v4072_v29  ;;  %4499 = vmatprep.mubr.bf16.mxu1 %v4074_v42  ;;  %vm3892_vm6 = vcmp.gt.f32.partialorder %v5676_v54, 0.0  ;;  %v4071_v14 = vpack.c.bf16 %v4015_v59, %v4011_v5  ;;  %v4073_v53 = vpack.c.bf16 %v4017_v7, %v4013_v49  ;;  %v3956_v40 = vmul.f32 0.01, %v5676_v54 }
 0x345   : > { %vm3894_vm7 = vcmp.gt.f32.partialorder %v5708_v8, 0.0  ;;  %v5678_v18 = vadd.f32 %v3596_v33, %v7779_v37  ;;  %v5710_v26 = vadd.f32 %v3822_v61, %v7783_v63  ;;  %v3958_v48 = vmul.f32 0.01, %v5708_v8 }
 0x346   : > { %vm3895_vm4 = vcmp.gt.f32.partialorder %v5677_v1, 0.0  ;;  %v3959_v36 = vmul.f32 0.01, %v5677_v1  ;;  %v5709_v60 = vadd.f32 %v3820_v0, %v7775_v55  ;;  %vm3891_vm10 = vcmp.gt.f32.partialorder %v5675_v45, 0.0 }
 0x347   : > { %v3600_v52 = vpop.f32.mrb[44].mxu0  ;;  %v3826_v46 = vpop.f32.mrb[44].mxu1  ;;  %4403 = vmatmul.mubr.bf16.gmra.mrb[68].mxu0 %v4071_v14  ;;  %4500 = vmatmul.mubr.bf16.gmra.mrb[68].mxu1 %v4073_v53  ;;  %vm3896_vm0 = vcmp.gt.f32.partialorder %v5678_v18, 0.0  ;;  %v3960_v58 = vmul.f32 0.01, %v5678_v18  ;;  %vm3898_vm8 = vcmp.gt.f32.partialorder %v5710_v26, 0.0  ;;  %v4020_v50 = vsel %vm3892_vm6, %v5676_v54, %v3956_v40 }
 0x348   : > { %v3962_v62 = vmul.f32 0.01, %v5710_v26  ;;  %vm3893_vm1 = vcmp.gt.f32.partialorder %v7815_v19, 0.0  ;;  %v7825_v17 = vadd.f32 %v3600_v52, %v7771_v44  ;;  %v3602_v39 = vpop.f32.mrb[45].mxu0  ;;  %v3828_v28 = vpop.f32.mrb[45].mxu1  ;;  %v7829_v27 = vadd.f32 %v3826_v46, %v7775_v55 }
 0x349   : > { %v3957_v56 = vmul.f32 0.01, %v7815_v19  ;;  %v3604_v43 = vpop.f32.mrb[46].mxu0  ;;  %v3830_v23 = vpop.f32.mrb[46].mxu1  ;;  %v4024_v20 = vsel %vm3896_vm0, %v5678_v18, %v3960_v58  ;;  %v5680_v57 = vadd.f32 %v3602_v39, %v7779_v37  ;;  %v4022_v9 = vsel %vm3894_vm7, %v5708_v8, %v3958_v48 }
 0x34a   : > { %v4026_v41 = vsel %vm3898_vm8, %v5710_v26, %v3962_v62  ;;  %v4023_v30 = vsel %vm3895_vm4, %v5677_v1, %v3959_v36  ;;  %vm3897_vm5 = vcmp.gt.f32.partialorder %v5709_v60, 0.0  ;;  %v3961_v11 = vmul.f32 0.01, %v5709_v60  ;;  %v3606_v12 = vpop.f32.mrb[47].mxu0  ;;  %v3832_v16 = vpop.f32.mrb[47].mxu1 }
 0x34b   : > { %v7836_v22 = vadd.f32 %v3828_v28, %v7783_v63  ;;  %v4019_v25 = vsel %vm3891_vm10, %v5675_v45, %v3955_v47  ;;  %vm3899_vm11 = vcmp.gt.f32.partialorder %v7825_v17, 0.0  ;;  %v7841_v3 = vmul.f32 0.01, %v7825_v17 }
 0x34c   : > { %v4076_v32 = vpack.c.bf16 %v4024_v20, %v4020_v50  ;;  %v4078_v6 = vpack.c.bf16 %v4026_v41, %v4022_v9  ;;  %vm3901_vm12 = vcmp.gt.f32.partialorder %v7829_v27, 0.0  ;;  %v5682_v34 = vadd.f32 %v3606_v12, %v7779_v37 }
 0x34d   : > { %v5714_v24 = vadd.f32 %v3832_v16, %v7783_v63  ;;  %v4075_v2 = vpack.c.bf16 %v4023_v30, %v4019_v25  ;;  %v3965_v15 = vmul.f32 0.01, %v7829_v27  ;;  %vm3900_vm14 = vcmp.gt.f32.partialorder %v5680_v57, 0.0 }
 0x34e   : > { %v3964_v38 = vmul.f32 0.01, %v5680_v57  ;;  %v5681_v59 = vadd.f32 %v3604_v43, %v7771_v44  ;;  %4410 = vmatprep.mubr.bf16.mxu0 %v4076_v32  ;;  %4507 = vmatprep.mubr.bf16.mxu1 %v4078_v6  ;;  %vm3902_vm15 = vcmp.gt.f32.partialorder %v7836_v22, 0.0  ;;  %v5713_v45 = vadd.f32 %v3830_v23, %v7775_v55 }
 0x34f   : > { %v3610_v21 = vpop.f32.mrb[48].mxu0  ;;  %v3836_v35 = vpop.f32.mrb[48].mxu1  ;;  %vm3904_vm2 = vcmp.gt.f32.partialorder %v5682_v34, 0.0  ;;  %v3968_v31 = vmul.f32 0.01, %v5682_v34  ;;  %4411 = vmatmul.mubr.bf16.gmra.mrb[72].mxu0 %v4075_v2  ;;  %v4021_v51 = vsel %vm3893_vm1, %v7815_v19, %v3957_v56  ;;  %v4025_v13 = vsel %vm3897_vm5, %v5709_v60, %v3961_v11 }
 0x350   : > { %v7855_v10 = vadd.f32 %v3610_v21, %v7771_v44  ;;  %v7858_v7 = vadd.f32 %v3836_v35, %v7775_v55  ;;  %v3612_v54 = vpop.f32.mrb[49].mxu0  ;;  %v3838_v8 = vpop.f32.mrb[49].mxu1  ;;  %v3970_v4 = vmul.f32 0.01, %v5714_v24  ;;  %v4077_v0 = vpack.c.bf16 %v4025_v13, %v4021_v51 }
 0x351   : > { %v7861_v29 = vadd.f32 %v3612_v54, %v7779_v37  ;;  %v3614_v42 = vpop.f32.mrb[50].mxu0  ;;  %v3840_v47 = vpop.f32.mrb[50].mxu1  ;;  %v4032_v5 = vsel %vm3904_vm2, %v5682_v34, %v3968_v31  ;;  %v3966_v19 = vmul.f32 0.01, %v7836_v22  ;;  %vm3903_vm3 = vcmp.gt.f32.partialorder %v5681_v59, 0.0 }
 0x352   : > { %vm3906_vm13 = vcmp.gt.f32.partialorder %v5714_v24, 0.0  ;;  %v7865_v49 = vadd.f32 %v3838_v8, %v7783_v63  ;;  %v3967_v1 = vmul.f32 0.01, %v5681_v59  ;;  %vm3905_vm9 = vcmp.gt.f32.partialorder %v5713_v45, 0.0  ;;  %4508 = vmatmul.mubr.bf16.gmra.mrb[72].mxu1 %v4077_v0  ;;  %v3616_v18 = vpop.f32.mrb[51].mxu0  ;;  %v3842_v26 = vpop.f32.mrb[51].mxu1 }
 0x353   : > { %v3969_v33 = vmul.f32 0.01, %v5713_v45  ;;  %v4028_v61 = vsel %vm3900_vm14, %v5680_v57, %v3964_v38  ;;  %v7869_v14 = vmul.f32 0.01, %v7855_v10  ;;  %v7872_v53 = vmul.f32 0.01, %v7858_v7 }
 0x354   : > { %v7875_v40 = vadd.f32 %v3614_v42, %v7771_v44  ;;  %v4080_v52 = vpack.c.bf16 %v4032_v5, %v4028_v61  ;;  %vm3907_vm6 = vcmp.gt.f32.partialorder %v7855_v10, 0.0  ;;  %vm3908_vm7 = vcmp.gt.f32.partialorder %v7861_v29, 0.0 }
 0x355   : > { %v3972_v46 = vmul.f32 0.01, %v7861_v29  ;;  %v4034_v48 = vsel %vm3906_vm13, %v5714_v24, %v3970_v4  ;;  %vm3909_vm4 = vcmp.gt.f32.partialorder %v7858_v7, 0.0  ;;  %vm3910_vm0 = vcmp.gt.f32.partialorder %v7865_v49, 0.0 }
 0x356   : > { %v3974_v58 = vmul.f32 0.01, %v7865_v49  ;;  %v7885_v62 = vadd.f32 %v3840_v47, %v7775_v55  ;;  %v5686_v39 = vadd.f32 %v3616_v18, %v7779_v37  ;;  %4418 = vmatprep.mubr.bf16.mxu0 %v4080_v52  ;;  %vm3911_vm8 = vcmp.gt.f32.partialorder %v7875_v40, 0.0 }
 0x357   : > { %v3620_v36 = vpop.f32.mrb[52].mxu0  ;;  %v3846_v60 = vpop.f32.mrb[52].mxu1  ;;  %v5718_v28 = vadd.f32 %v3842_v26, %v7783_v63  ;;  %v4030_v56 = vsel %vm3902_vm15, %v7836_v22, %v3966_v19  ;;  %v4027_v43 = vsel %vm3899_vm11, %v7825_v17, %v7841_v3  ;;  %v4031_v20 = vsel %vm3903_vm3, %v5681_v59, %v3967_v1 }
 0x358   : > { %v4082_v23 = vpack.c.bf16 %v4034_v48, %v4030_v56  ;;  %v4029_v41 = vsel %vm3901_vm12, %v7829_v27, %v3965_v15  ;;  %v4033_v57 = vsel %vm3905_vm9, %v5713_v45, %v3969_v33  ;;  %v3622_v50 = vpop.f32.mrb[53].mxu0  ;;  %v3848_v9 = vpop.f32.mrb[53].mxu1  ;;  %v4079_v30 = vpack.c.bf16 %v4031_v20, %v4027_v43 }
 0x359   : > { %v4081_v11 = vpack.c.bf16 %v4033_v57, %v4029_v41  ;;  %v7903_v22 = vadd.f32 %v3620_v36, %v7771_v44  ;;  %v7906_v25 = vadd.f32 %v3846_v60, %v7775_v55  ;;  %v3624_v17 = vpop.f32.mrb[54].mxu0  ;;  %v3850_v3 = vpop.f32.mrb[54].mxu1  ;;  %v3975_v12 = vmul.f32 0.01, %v7875_v40 }
 0x35a   : > { %v3976_v16 = vmul.f32 0.01, %v5686_v39  ;;  %4515 = vmatprep.mubr.bf16.mxu1 %v4082_v23  ;;  %v7910_v27 = vadd.f32 %v3622_v50, %v7779_v37  ;;  %v7913_v32 = vadd.f32 %v3848_v9, %v7783_v63  ;;  %v3626_v6 = vpop.f32.mrb[55].mxu0  ;;  %v3852_v34 = vpop.f32.mrb[55].mxu1  ;;  %vm3912_vm10 = vcmp.gt.f32.partialorder %v5686_v39, 0.0  ;;  %4419 = vmatmul.mubr.bf16.gmra.mrb[76].mxu0 %v4079_v30 }
 0x35b   : > { %v3978_v24 = vmul.f32 0.01, %v5718_v28  ;;  %4516 = vmatmul.mubr.bf16.gmra.mrb[76].mxu1 %v4081_v11  ;;  %v7916_v2 = vadd.f32 %v3624_v17, %v7771_v44  ;;  %v7919_v21 = vadd.f32 %v3850_v3, %v7775_v55  ;;  %vm3913_vm1 = vcmp.gt.f32.partialorder %v7885_v62, 0.0 }
 0x35c   : > { %v3977_v35 = vmul.f32 0.01, %v7885_v62  ;;  %vm3914_vm5 = vcmp.gt.f32.partialorder %v5718_v28, 0.0  ;;  %v7924_v15 = vmul.f32 0.01, %v7903_v22  ;;  %vm3915_vm11 = vcmp.gt.f32.partialorder %v7903_v22, 0.0 }
 0x35d   : > { %v7928_v38 = vmul.f32 0.01, %v7906_v25  ;;  %vm3916_vm12 = vcmp.gt.f32.partialorder %v7910_v27, 0.0  ;;  %v3980_v59 = vmul.f32 0.01, %v7910_v27  ;;  %vm3918_vm14 = vcmp.gt.f32.partialorder %v7913_v32, 0.0 }
 0x35e   : > { %v3982_v45 = vmul.f32 0.01, %v7913_v32  ;;  %v5690_v31 = vadd.f32 %v3626_v6, %v7779_v37  ;;  %v4036_v51 = vsel %vm3908_vm7, %v7861_v29, %v3972_v46  ;;  %v4040_v13 = vsel %vm3912_vm10, %v5686_v39, %v3976_v16 }
 0x35f   : > { %v3630_v54 = vpop.f32.mrb[56].mxu0  ;;  %v3856_v8 = vpop.f32.mrb[56].mxu1  ;;  %vm3917_vm15 = vcmp.gt.f32.partialorder %v7906_v25, 0.0  ;;  %vm3919_vm2 = vcmp.gt.f32.partialorder %v7916_v2, 0.0  ;;  %v7942_v4 = vmul.f32 0.01, %v7916_v2  ;;  %v4084_v42 = vpack.c.bf16 %v4040_v13, %v4036_v51 }
 0x360   : > { %v7945_v0 = vmul.f32 0.01, %v7919_v21  ;;  %v4042_v47 = vsel %vm3914_vm5, %v5718_v28, %v3978_v24  ;;  %v3632_v5 = vpop.f32.mrb[57].mxu0  ;;  %v3858_v19 = vpop.f32.mrb[57].mxu1  ;;  %v3984_v29 = vmul.f32 0.01, %v5690_v31  ;;  %v5722_v1 = vadd.f32 %v3852_v34, %v7783_v63 }
 0x361   : > { %v4038_v33 = vsel %vm3910_vm0, %v7865_v49, %v3974_v58  ;;  %v4035_v61 = vsel %vm3907_vm6, %v7855_v10, %v7869_v14  ;;  %4426 = vmatprep.mubr.bf16.mxu0 %v4084_v42  ;;  %v4039_v26 = vsel %vm3911_vm8, %v7875_v40, %v3975_v12  ;;  %v4037_v52 = vsel %vm3909_vm4, %v7858_v7, %v7872_v53  ;;  %v3634_v46 = vpop.f32.mrb[58].mxu0  ;;  %v3860_v48 = vpop.f32.mrb[58].mxu1 }
 0x362   : > { %v4086_v18 = vpack.c.bf16 %v4042_v47, %v4038_v33  ;;  %v4041_v49 = vsel %vm3913_vm1, %v7885_v62, %v3977_v35  ;;  %v4083_v36 = vpack.c.bf16 %v4039_v26, %v4035_v61  ;;  %v7967_v10 = vadd.f32 %v3630_v54, %v7771_v44  ;;  %v3636_v40 = vpop.f32.mrb[59].mxu0  ;;  %v3862_v58 = vpop.f32.mrb[59].mxu1 }
 0x363   : > { %v4085_v60 = vpack.c.bf16 %v4041_v49, %v4037_v52  ;;  %v7970_v14 = vadd.f32 %v3856_v8, %v7775_v55  ;;  %v7973_v39 = vadd.f32 %v3632_v5, %v7779_v37  ;;  %v7976_v7 = vadd.f32 %v3858_v19, %v7783_v63 }
 0x364   : > { %4523 = vmatprep.mubr.bf16.mxu1 %v4086_v18  ;;  %v7979_v53 = vadd.f32 %v3634_v46, %v7771_v44  ;;  %v7982_v62 = vadd.f32 %v3860_v48, %v7775_v55  ;;  %vm3921_vm3 = vcmp.gt.f32.partialorder %v7919_v21, 0.0  ;;  %vm3920_vm13 = vcmp.gt.f32.partialorder %v5690_v31, 0.0  ;;  %4427 = vmatmul.mubr.bf16.gmra.mrb[80].mxu0 %v4083_v36 }
 0x365   : > { %v3986_v28 = vmul.f32 0.01, %v5722_v1  ;;  %4524 = vmatmul.mubr.bf16.gmra.mrb[80].mxu1 %v4085_v60  ;;  %v7986_v56 = vmul.f32 0.01, %v7967_v10  ;;  %vm3922_vm9 = vcmp.gt.f32.partialorder %v5722_v1, 0.0  ;;  %vm3924_vm6 = vcmp.gt.f32.partialorder %v7973_v39, 0.0 }
 0x366   : > { %v7989_v43 = vmul.f32 0.01, %v7970_v14  ;;  %v3988_v23 = vmul.f32 0.01, %v7973_v39  ;;  %vm3923_vm7 = vcmp.gt.f32.partialorder %v7967_v10, 0.0  ;;  %vm3926_vm4 = vcmp.gt.f32.partialorder %v7976_v7, 0.0 }
 0x367   : > { %v3990_v20 = vmul.f32 0.01, %v7976_v7  ;;  %v7997_v41 = vmul.f32 0.01, %v7979_v53  ;;  %v8000_v57 = vmul.f32 0.01, %v7982_v62  ;;  %v5694_v50 = vadd.f32 %v3636_v40, %v7779_v37 }
 0x368   : > { %v5726_v9 = vadd.f32 %v3862_v58, %v7783_v63  ;;  %v4044_v30 = vsel %vm3916_vm12, %v7910_v27, %v3980_v59  ;;  %v4048_v11 = vsel %vm3920_vm13, %v5690_v31, %v3984_v29  ;;  %v3640_v17 = vpop.f32.mrb[60].mxu0  ;;  %v3866_v3 = vpop.f32.mrb[60].mxu1  ;;  %vm3925_vm0 = vcmp.gt.f32.partialorder %v7970_v14, 0.0 }
 0x369   : > { %vm3927_vm8 = vcmp.gt.f32.partialorder %v7979_v53, 0.0  ;;  %vm3929_vm10 = vcmp.gt.f32.partialorder %v7982_v62, 0.0  ;;  %v4088_v12 = vpack.c.bf16 %v4048_v11, %v4044_v30  ;;  %v4046_v16 = vsel %vm3918_vm14, %v7913_v32, %v3982_v45  ;;  %v3642_v34 = vpop.f32.mrb[61].mxu0  ;;  %v3868_v24 = vpop.f32.mrb[61].mxu1  ;;  %v8072_v30 = vld [vmem:[%s8442_s6] ss:$0 sm:$0xff] }
 0x36a   : > { %v4050_v6 = vsel %vm3922_vm9, %v5722_v1, %v3986_v28  ;;  %v4043_v27 = vsel %vm3915_vm11, %v7903_v22, %v7924_v15  ;;  %vm3928_vm1 = vcmp.gt.f32.partialorder %v5694_v50, 0.0  ;;  %v3992_v35 = vmul.f32 0.01, %v5694_v50  ;;  %v3644_v15 = vpop.f32.mrb[62].mxu0  ;;  %v3870_v51 = vpop.f32.mrb[62].mxu1 }
 0x36b   : > { %vm3930_vm5 = vcmp.gt.f32.partialorder %v5726_v9, 0.0  ;;  %v3994_v59 = vmul.f32 0.01, %v5726_v9  ;;  %4434 = vmatprep.mubr.bf16.mxu0 %v4088_v12  ;;  %v4090_v31 = vpack.c.bf16 %v4050_v6, %v4046_v16  ;;  %v4047_v32 = vsel %vm3919_vm2, %v7916_v2, %v7942_v4  ;;  %v3646_v47 = vpop.f32.mrb[63].mxu0  ;;  %v3872_v2 = vpop.f32.mrb[63].mxu1 }
 0x36c   : > { %v4045_v45 = vsel %vm3917_vm15, %v7906_v25, %v7928_v38  ;;  %v4049_v22 = vsel %vm3921_vm3, %v7919_v21, %v7945_v0  ;;  %v4087_v13 = vpack.c.bf16 %v4047_v32, %v4043_v27  ;;  %v5695_v8 = vadd.f32 %v3640_v17, %v7771_v44 }
 0x36d   : > { %v4089_v54 = vpack.c.bf16 %v4049_v22, %v4045_v45  ;;  %v5727_v42 = vadd.f32 %v3866_v3, %v7775_v55  ;;  %4531 = vmatprep.mubr.bf16.mxu1 %v4090_v31  ;;  %v5696_v4 = vadd.f32 %v3642_v34, %v7779_v37  ;;  %v5728_v25 = vadd.f32 %v3868_v24, %v7783_v63 }
 0x36e   : > { %v5697_v38 = vadd.f32 %v3644_v15, %v7771_v44  ;;  %v5729_v5 = vadd.f32 %v3870_v51, %v7775_v55  ;;  %4435 = vmatmul.mubr.bf16.gmra.mrb[84].mxu0 %v4087_v13  ;;  %vm3931_vm11 = vcmp.gt.f32.partialorder %v5695_v8, 0.0  ;;  %v3995_v21 = vmul.f32 0.01, %v5695_v8 }
 0x36f   : > { %4532 = vmatmul.mubr.bf16.gmra.mrb[84].mxu1 %v4089_v54  ;;  %vm3933_vm12 = vcmp.gt.f32.partialorder %v5727_v42, 0.0  ;;  %v3997_v0 = vmul.f32 0.01, %v5727_v42  ;;  %vm3932_vm14 = vcmp.gt.f32.partialorder %v5696_v4, 0.0  ;;  %v3996_v19 = vmul.f32 0.01, %v5696_v4 }
 0x370   : > { %vm3934_vm15 = vcmp.gt.f32.partialorder %v5728_v25, 0.0  ;;  %v3998_v29 = vmul.f32 0.01, %v5728_v25  ;;  %vm3935_vm2 = vcmp.gt.f32.partialorder %v5697_v38, 0.0  ;;  %v3999_v1 = vmul.f32 0.01, %v5697_v38 }
 0x371   : > { %vm3937_vm3 = vcmp.gt.f32.partialorder %v5729_v5, 0.0  ;;  %v4001_v33 = vmul.f32 0.01, %v5729_v5  ;;  %v5698_v61 = vadd.f32 %v3646_v47, %v7779_v37  ;;  %v5730_v44 = vadd.f32 %v3872_v2, %v7783_v63 }
 0x372   : > { %v4052_v55 = vsel %vm3924_vm6, %v7973_v39, %v3988_v23  ;;  %v4056_v18 = vsel %vm3928_vm1, %v5694_v50, %v3992_v35  ;;  %v4054_v52 = vsel %vm3926_vm4, %v7976_v7, %v3990_v20  ;;  %v4058_v49 = vsel %vm3930_vm5, %v5726_v9, %v3994_v59 }
 0x373   : > { %v4092_v26 = vpack.c.bf16 %v4056_v18, %v4052_v55  ;;  %v4051_v37 = vsel %vm3923_vm7, %v7967_v10, %v7986_v56  ;;  %vm3936_vm13 = vcmp.gt.f32.partialorder %v5698_v61, 0.0  ;;  %v4000_v63 = vmul.f32 0.01, %v5698_v61 }
 0x374   : > { %vm3938_vm9 = vcmp.gt.f32.partialorder %v5730_v44, 0.0  ;;  %v4002_v46 = vmul.f32 0.01, %v5730_v44  ;;  %v4094_v48 = vpack.c.bf16 %v4058_v49, %v4054_v52  ;;  %v4055_v36 = vsel %vm3927_vm8, %v7979_v53, %v7997_v41 }
 0x375   : > { %4442 = vmatprep.mubr.bf16.mxu0 %v4092_v26  ;;  %v4053_v60 = vsel %vm3925_vm0, %v7970_v14, %v7989_v43  ;;  %v4057_v10 = vsel %vm3929_vm10, %v7982_v62, %v8000_v57  ;;  %v4091_v40 = vpack.c.bf16 %v4055_v36, %v4051_v37  ;;  %v4060_v39 = vsel %vm3932_vm14, %v5696_v4, %v3996_v19 }
 0x376   : > { %v4093_v58 = vpack.c.bf16 %v4057_v10, %v4053_v60  ;;  %v4064_v7 = vsel %vm3936_vm13, %v5698_v61, %v4000_v63  ;;  %4539 = vmatprep.mubr.bf16.mxu1 %v4094_v48  ;;  %v4062_v56 = vsel %vm3934_vm15, %v5728_v25, %v3998_v29  ;;  %v4066_v53 = vsel %vm3938_vm9, %v5730_v44, %v4002_v46 }
 0x377   : > { %v4096_v28 = vpack.c.bf16 %v4064_v7, %v4060_v39  ;;  %4443 = vmatmul.mubr.bf16.gmra.mrb[88].mxu0 %v4091_v40  ;;  %v4098_v23 = vpack.c.bf16 %v4066_v53, %v4062_v56  ;;  %v4059_v14 = vsel %vm3931_vm11, %v5695_v8, %v3995_v21  ;;  %v4063_v43 = vsel %vm3935_vm2, %v5697_v38, %v3999_v1 }
 0x378   : > { %4540 = vmatmul.mubr.bf16.gmra.mrb[88].mxu1 %v4093_v58  ;;  %v4095_v20 = vpack.c.bf16 %v4063_v43, %v4059_v14  ;;  %v4061_v62 = vsel %vm3933_vm12, %v5727_v42, %v3997_v0  ;;  %v4065_v41 = vsel %vm3937_vm3, %v5729_v5, %v4001_v33  ;;  %vm4556_vm6 = vcmask 15360  }
 0x379   : > { %4450 = vmatprep.mubr.bf16.mxu0 %v4096_v28  ;;  %4547 = vmatprep.mubr.bf16.mxu1 %v4098_v23  ;;  %v4097_v57 = vpack.c.bf16 %v4065_v41, %v4061_v62 }
 0x37f   : > { %4451 = vmatmul.mubr.bf16.gmra.mrb[92].mxu0 %v4095_v20 }
 0x380   : > { %4548 = vmatmul.mubr.bf16.gmra.mrb[92].mxu1 %v4097_v57 }
 0x412   : > { %v5491_v50 = vpop.f32.mrb[64].mxu0  ;;  %v5555_v9 = vpop.f32.mrb[64].mxu1 }
 0x413   : > { %v5492_v11 = vpop.f32.mrb[65].mxu0  ;;  %v5556_v17 = vpop.f32.mrb[65].mxu1 }
 0x414   : > { %v5493_v3 = vadd.f32 %v5492_v11, %v5491_v50  ;;  %v5557_v12 = vadd.f32 %v5556_v17, %v5555_v9  ;;  %v5494_v16 = vpop.f32.mrb[66].mxu0  ;;  %v5558_v6 = vpop.f32.mrb[66].mxu1 }
 0x415   : > { %v5495_v27 = vpop.f32.mrb[67].mxu0  ;;  %v5559_v34 = vpop.f32.mrb[67].mxu1 }
 0x416   : > { %v4397_v24 = vadd.f32 %v5493_v3, %v8072_v30  ;;  %v5496_v35 = vadd.f32 %v5495_v27, %v5494_v16  ;;  %v5560_v59 = vadd.f32 %v5559_v34, %v5558_v6 }
 0x418   : > { %v8075_v31 = vadd.f32 %v5557_v12, %v4397_v24  ;;  %v4400_v32 = vadd.f32 %v5496_v35, %v8072_v30 }
 0x41a   : > { %4557 = vst.msk [vmem:[%s6964_s14] sm:$0xff] %vm4556_vm6, %v8075_v31  ;;  %v8081_v45 = vadd.f32 %v5560_v59, %v4400_v32  ;;  %v5497_v22 = vpop.f32.mrb[68].mxu0  ;;  %v5561_v15 = vpop.f32.mrb[68].mxu1  ;;  %v4573_v51 = vsel %vm4556_vm6, %v8075_v31, -inf }
 0x41b   : > { %v5498_v13 = vpop.f32.mrb[69].mxu0  ;;  %v5562_v54 = vpop.f32.mrb[69].mxu1  ;;  %4574 = vmax.xlane.f32.xlu0 %v4573_v51 }
 0x41c   : > { %4558 = vst.msk [vmem:[%s6964_s14 + $0x8] sm:$0xff] %vm4556_vm6, %v8081_v45  ;;  %v5499_v8 = vadd.f32 %v5498_v13, %v5497_v22  ;;  %v5563_v42 = vadd.f32 %v5562_v54, %v5561_v15  ;;  %v5500_v47 = vpop.f32.mrb[70].mxu0  ;;  %v5564_v2 = vpop.f32.mrb[70].mxu1  ;;  %v4576_v0 = vsel %vm4556_vm6, %v8081_v45, -inf }
 0x41d   : > { %v5501_v4 = vpop.f32.mrb[71].mxu0  ;;  %v5565_v25 = vpop.f32.mrb[71].mxu1 }
 0x41e   : > { %v4405_v38 = vadd.f32 %v5499_v8, %v8072_v30  ;;  %v5502_v5 = vadd.f32 %v5501_v4, %v5500_v47  ;;  %v5566_v21 = vadd.f32 %v5565_v25, %v5564_v2 }
 0x41f   : > { %4577 = vmax.xlane.f32.xlu0 %v4576_v0 }
 0x420   : > { %v8091_v19 = vadd.f32 %v5563_v42, %v4405_v38  ;;  %v4408_v29 = vadd.f32 %v5502_v5, %v8072_v30 }
 0x422   : > { %4559 = vst.msk [vmem:[%s6964_s14 + $0x10] sm:$0xff] %vm4556_vm6, %v8091_v19  ;;  %v8097_v1 = vadd.f32 %v5566_v21, %v4408_v29  ;;  %v4579_v33 = vsel %vm4556_vm6, %v8091_v19, -inf  ;;  %v5503_v61 = vpop.f32.mrb[72].mxu0 }
 0x423   : > { %4580 = vmax.xlane.f32.xlu1 %v4579_v33  ;;  %v5504_v44 = vpop.f32.mrb[73].mxu0 }
 0x424   : > { %4560 = vst.msk [vmem:[%s6964_s14 + $0x18] sm:$0xff] %vm4556_vm6, %v8097_v1  ;;  %v5505_v55 = vadd.f32 %v5504_v44, %v5503_v61  ;;  %v5506_v18 = vpop.f32.mrb[74].mxu0  ;;  %v4582_v52 = vsel %vm4556_vm6, %v8097_v1, -inf }
 0x425   : > { %v5507_v26 = vpop.f32.mrb[75].mxu0  ;;  %v5567_v49 = vpop.f32.mrb[72].mxu1 }
 0x426   : > { %v4413_v37 = vadd.f32 %v5505_v55, %v8072_v30  ;;  %v5508_v63 = vadd.f32 %v5507_v26, %v5506_v18  ;;  %v5568_v46 = vpop.f32.mrb[73].mxu1 }
 0x427   : > { %4583 = vmax.xlane.f32.xlu1 %v4582_v52  ;;  %v5569_v48 = vadd.f32 %v5568_v46, %v5567_v49  ;;  %v5570_v36 = vpop.f32.mrb[74].mxu1 }
 0x428   : > { %v4416_v60 = vadd.f32 %v5508_v63, %v8072_v30  ;;  %v5571_v10 = vpop.f32.mrb[75].mxu1 }
 0x429   : > { %v8108_v40 = vadd.f32 %v5569_v48, %v4413_v37  ;;  %v5572_v58 = vadd.f32 %v5571_v10, %v5570_v36 }
 0x42b   : > { %4561 = vst.msk [vmem:[%s6964_s14 + $0x20] sm:$0xff] %vm4556_vm6, %v8108_v40  ;;  %v8113_v39 = vadd.f32 %v5572_v58, %v4416_v60  ;;  %v4585_v7 = vsel %vm4556_vm6, %v8108_v40, -inf }
 0x42c   : > { %4586 = vmax.xlane.f32.xlu0 %v4585_v7 }
 0x42d   : > { %4562 = vst.msk [vmem:[%s6964_s14 + $0x28] sm:$0xff] %vm4556_vm6, %v8113_v39  ;;  %v5509_v28 = vpop.f32.mrb[76].mxu0  ;;  %v4588_v53 = vsel %vm4556_vm6, %v8113_v39, -inf }
 0x42e   : > { %v5573_v56 = vpop.f32.mrb[76].mxu1  ;;  %v5510_v23 = vpop.f32.mrb[77].mxu0  ;;  %4589 = vmax.xlane.f32.xlu1 %v4588_v53 }
 0x42f   : > { %v5574_v14 = vpop.f32.mrb[77].mxu1  ;;  %v5511_v43 = vadd.f32 %v5510_v23, %v5509_v28  ;;  %v5512_v62 = vpop.f32.mrb[78].mxu0 }
 0x430   : > { %v5575_v20 = vadd.f32 %v5574_v14, %v5573_v56  ;;  %v5576_v41 = vpop.f32.mrb[78].mxu1  ;;  %v5513_v57 = vpop.f32.mrb[79].mxu0 }
 0x431   : > { %v5577_v50 = vpop.f32.mrb[79].mxu1  ;;  %v4421_v9 = vadd.f32 %v5511_v43, %v8072_v30  ;;  %v5514_v11 = vadd.f32 %v5513_v57, %v5512_v62 }
 0x432   : > { %v5578_v17 = vadd.f32 %v5577_v50, %v5576_v41 }
 0x433   : > { %v8123_v3 = vadd.f32 %v5575_v20, %v4421_v9  ;;  %v4424_v12 = vadd.f32 %v5514_v11, %v8072_v30 }
 0x435   : > { %4563 = vst.msk [vmem:[%s6964_s14 + $0x30] sm:$0xff] %vm4556_vm6, %v8123_v3  ;;  %v8129_v16 = vadd.f32 %v5578_v17, %v4424_v12  ;;  %v4591_v6 = vsel %vm4556_vm6, %v8123_v3, -inf }
 0x436   : > { %4592 = vmax.xlane.f32.xlu0 %v4591_v6 }
 0x437   : > { %v5515_v27 = vpop.f32.mrb[80].mxu0  ;;  %4564 = vst.msk [vmem:[%s6964_s14 + $0x38] sm:$0xff] %vm4556_vm6, %v8129_v16  ;;  %v4594_v59 = vsel %vm4556_vm6, %v8129_v16, -inf }
 0x438   : > { %v5579_v34 = vpop.f32.mrb[80].mxu1  ;;  %v5516_v24 = vpop.f32.mrb[81].mxu0  ;;  %4595 = vmax.xlane.f32.xlu1 %v4594_v59 }
 0x439   : > { %v5580_v35 = vpop.f32.mrb[81].mxu1  ;;  %v5517_v32 = vadd.f32 %v5516_v24, %v5515_v27  ;;  %v5518_v15 = vpop.f32.mrb[82].mxu0 }
 0x43a   : > { %v5581_v22 = vadd.f32 %v5580_v35, %v5579_v34  ;;  %v5582_v51 = vpop.f32.mrb[82].mxu1  ;;  %v5519_v13 = vpop.f32.mrb[83].mxu0 }
 0x43b   : > { %v5583_v54 = vpop.f32.mrb[83].mxu1  ;;  %v4429_v8 = vadd.f32 %v5517_v32, %v8072_v30  ;;  %v5520_v42 = vadd.f32 %v5519_v13, %v5518_v15 }
 0x43c   : > { %v5584_v47 = vadd.f32 %v5583_v54, %v5582_v51 }
 0x43d   : > { %v8139_v2 = vadd.f32 %v5581_v22, %v4429_v8  ;;  %v4432_v4 = vadd.f32 %v5520_v42, %v8072_v30 }
 0x43f   : > { %4565 = vst.msk [vmem:[%s6964_s14 + $0x40] sm:$0xff] %vm4556_vm6, %v8139_v2  ;;  %v8145_v25 = vadd.f32 %v5584_v47, %v4432_v4  ;;  %v4597_v38 = vsel %vm4556_vm6, %v8139_v2, -inf }
 0x440   : > { %4598 = vmax.xlane.f32.xlu0 %v4597_v38 }
 0x441   : > { %v5521_v5 = vpop.f32.mrb[84].mxu0  ;;  %4566 = vst.msk [vmem:[%s6964_s14 + $0x48] sm:$0xff] %vm4556_vm6, %v8145_v25  ;;  %v4600_v33 = vsel %vm4556_vm6, %v8145_v25, -inf }
 0x442   : > { %v5585_v21 = vpop.f32.mrb[84].mxu1  ;;  %v5522_v0 = vpop.f32.mrb[85].mxu0  ;;  %4601 = vmax.xlane.f32.xlu1 %v4600_v33 }
 0x443   : > { %v5586_v29 = vpop.f32.mrb[85].mxu1  ;;  %v5523_v61 = vadd.f32 %v5522_v0, %v5521_v5  ;;  %v5524_v55 = vpop.f32.mrb[86].mxu0  ;;  %v4781_v0 = vld [vmem:[%s6959_s12 + $0x70] sm:$0xff] }
 0x444   : > { %v5587_v44 = vadd.f32 %v5586_v29, %v5585_v21  ;;  %v5588_v18 = vpop.f32.mrb[86].mxu1  ;;  %v5525_v26 = vpop.f32.mrb[87].mxu0  ;;  %v4782_v29 = vld [vmem:[%s6959_s12 + $0x78] sm:$0xff] }
 0x445   : > { %v5589_v52 = vpop.f32.mrb[87].mxu1  ;;  %v4437_v49 = vadd.f32 %v5523_v61, %v8072_v30  ;;  %v5526_v37 = vadd.f32 %v5525_v26, %v5524_v55  ;;  %v8516_v61 = vlaneseq  ;;  %v4785_v55 = vpop.permute.xlu0 %4784 }
 0x446   : > { %v5590_v63 = vadd.f32 %v5589_v52, %v5588_v18 }
 0x447   : > { %v8155_v46 = vadd.f32 %v5587_v44, %v4437_v49  ;;  %v4440_v48 = vadd.f32 %v5526_v37, %v8072_v30  ;;  %v8205_v44 = vand.u32 127, %v8516_v61 }
 0x449   : > { %4567 = vst.msk [vmem:[%s6964_s14 + $0x50] sm:$0xff] %vm4556_vm6, %v8155_v46  ;;  %v8161_v36 = vadd.f32 %v5590_v63, %v4440_v48  ;;  %v4603_v60 = vsel %vm4556_vm6, %v8155_v46, -inf  ;;  %vm4831_vm4 = vcmp.eq.s32.totalorder %v8205_v44, %v4785_v55 }
 0x44a   : > { %v5527_v10 = vpop.f32.mrb[88].mxu0  ;;  %4604 = vmax.xlane.f32.xlu0 %v4603_v60  ;;  %v4847_v49 = vsel %vm4831_vm4, %v8075_v31, 0.0  ;;  %vm4977_vm4 = vcmask 0  }
 0x44b   : > { %v5591_v58 = vpop.f32.mrb[88].mxu1  ;;  %4568 = vst.msk [vmem:[%s6964_s14 + $0x58] sm:$0xff] %vm4556_vm6, %v8161_v36  ;;  %v5528_v7 = vpop.f32.mrb[89].mxu0  ;;  %v4606_v56 = vsel %vm4556_vm6, %v8161_v36, -inf  ;;  %v4863_v48 = vsel %vm4556_vm6, %v4847_v49, 0.0 }
 0x44c   : > { %v5592_v28 = vpop.f32.mrb[89].mxu1  ;;  %v5529_v53 = vadd.f32 %v5528_v7, %v5527_v10  ;;  %v5530_v14 = vpop.f32.mrb[90].mxu0  ;;  %4607 = vmax.xlane.f32.xlu1 %v4606_v56 }
 0x44d   : > { %v5593_v23 = vadd.f32 %v5592_v28, %v5591_v58  ;;  %v5594_v43 = vpop.f32.mrb[90].mxu1  ;;  %v5531_v20 = vpop.f32.mrb[91].mxu0 }
 0x44e   : > { %v5595_v62 = vpop.f32.mrb[91].mxu1  ;;  %v4445_v41 = vadd.f32 %v5529_v53, %v8072_v30  ;;  %v5532_v57 = vadd.f32 %v5531_v20, %v5530_v14 }
 0x44f   : > { %v5596_v50 = vadd.f32 %v5595_v62, %v5594_v43 }
 0x450   : > { %v8171_v9 = vadd.f32 %v5593_v23, %v4445_v41  ;;  %v4448_v11 = vadd.f32 %v5532_v57, %v8072_v30  ;;  %v8226_v23 = vpop.permute.xlu0 %4811 }
 0x451   : > { %vm4840_vm3 = vcmp.eq.s32.totalorder %v8205_v44, %v8226_v23 }
 0x452   : > { %4569 = vst.msk [vmem:[%s6964_s14 + $0x60] sm:$0xff] %vm4556_vm6, %v8171_v9  ;;  %v8177_v17 = vadd.f32 %v5596_v50, %v4448_v11  ;;  %v5533_v12 = vpop.f32.mrb[92].mxu0  ;;  %v4609_v27 = vsel %vm4556_vm6, %v8171_v9, -inf }
 0x453   : > { %v5597_v6 = vpop.f32.mrb[92].mxu1  ;;  %v5534_v34 = vpop.f32.mrb[93].mxu0  ;;  %4610 = vmax.xlane.f32.xlu0 %v4609_v27 }
 0x454   : > { %v5598_v24 = vpop.f32.mrb[93].mxu1  ;;  %4570 = vst.msk [vmem:[%s6964_s14 + $0x68] sm:$0xff] %vm4556_vm6, %v8177_v17  ;;  %v5535_v35 = vadd.f32 %v5534_v34, %v5533_v12  ;;  %v5536_v32 = vpop.f32.mrb[94].mxu0  ;;  %v4612_v15 = vsel %vm4556_vm6, %v8177_v17, -inf }
 0x455   : > { %v5599_v59 = vadd.f32 %v5598_v24, %v5597_v6  ;;  %v5600_v22 = vpop.f32.mrb[94].mxu1  ;;  %v5537_v51 = vpop.f32.mrb[95].mxu0  ;;  %4613 = vmax.xlane.f32.xlu1 %v4612_v15 }
 0x456   : > { %v5601_v13 = vpop.f32.mrb[95].mxu1  ;;  %v4453_v54 = vadd.f32 %v5535_v35, %v8072_v30  ;;  %v5538_v8 = vadd.f32 %v5537_v51, %v5536_v32  ;;  %v8230_v43 = vpop.permute.xlu0 %4817 }
 0x457   : > { %v5602_v42 = vadd.f32 %v5601_v13, %v5600_v22  ;;  %vm4842_vm13 = vcmp.eq.s32.totalorder %v8205_v44, %v8230_v43 }
 0x458   : > { %v8187_v47 = vadd.f32 %v5599_v59, %v4453_v54  ;;  %v4456_v4 = vadd.f32 %v5538_v8, %v8072_v30  ;;  %v4788_v30 = vpop.permute.xlu1 %4787 }
 0x459   : > { %vm4832_vm7 = vcmp.eq.s32.totalorder %v8205_v44, %v4788_v30 }
 0x45a   : > { %4571 = vst.msk [vmem:[%s6964_s14 + $0x70] sm:$0xff] %vm4556_vm6, %v8187_v47  ;;  %v8193_v38 = vadd.f32 %v5602_v42, %v4456_v4  ;;  %v4615_v5 = vsel %vm4556_vm6, %v8187_v47, -inf  ;;  %v4848_v26 = vsel %vm4832_vm7, %v8081_v45, 0.0  ;;  %v8234_v62 = vpop.permute.xlu0 %4823 }
 0x45b   : > { %4616 = vmax.xlane.f32.xlu0 %v4615_v5  ;;  %v4866_v37 = vsel %vm4556_vm6, %v4848_v26, 0.0  ;;  %vm4844_vm9 = vcmp.eq.s32.totalorder %v8205_v44, %v8234_v62 }
 0x45c   : > { %4572 = vst.msk [vmem:[%s6964_s14 + $0x78] sm:$0xff] %vm4556_vm6, %v8193_v38  ;;  %v4618_v21 = vsel %vm4556_vm6, %v8193_v38, -inf  ;;  %v4791_v33 = vpop.permute.xlu1 %4790 }
 0x45d   : > { %4619 = vmax.xlane.f32.xlu1 %v4618_v21  ;;  %vm4833_vm0 = vcmp.eq.s32.totalorder %v8205_v44, %v4791_v33 }
 0x45e   : > { %v4849_v63 = vsel %vm4833_vm0, %v8091_v19, 0.0 }
 0x45f   : > { %v4869_v60 = vsel %vm4556_vm6, %v4849_v63, 0.0 }
 0x460   : > { %v4794_v18 = vpop.permute.xlu1 %4793 }
 0x461   : > { %vm4834_vm8 = vcmp.eq.s32.totalorder %v8205_v44, %v4794_v18 }
 0x462   : > { %v4850_v58 = vsel %vm4834_vm8, %v8097_v1, 0.0 }
 0x463   : > { %v4872_v7 = vsel %vm4556_vm6, %v4850_v58, 0.0 }
 0x464   : > { %v4797_v52 = vpop.permute.xlu1 %4796 }
 0x465   : > { %vm4835_vm10 = vcmp.eq.s32.totalorder %v8205_v44, %v4797_v52 }
 0x466   : > { %v4851_v28 = vsel %vm4835_vm10, %v8108_v40, 0.0 }
 0x467   : > { %v4875_v53 = vsel %vm4556_vm6, %v4851_v28, 0.0 }
 0x468   : > { %v8217_v10 = vpop.permute.xlu1 %4799 }
 0x469   : > { %vm4836_vm1 = vcmp.eq.s32.totalorder %v8205_v44, %v8217_v10 }
 0x46c   : > { %v8223_v56 = vpop.permute.xlu1 %4802 }
 0x46d   : > { %vm4837_vm5 = vcmp.eq.s32.totalorder %v8205_v44, %v8223_v56 }
 0x46e   : > { %4826 = vperm.xlu1 %6002, %v4781_v0  }
 0x470   : > { %v8228_v14 = vpop.permute.xlu1 %4805 }
 0x471   : > { %4829 = vperm.xlu0 %6001, %v4782_v29   ;;  %vm4838_vm11 = vcmp.eq.s32.totalorder %v8205_v44, %v8228_v14 }
 0x474   : > { %v8232_v20 = vpop.permute.xlu1 %4808 }
 0x475   : > { %vm4839_vm12 = vcmp.eq.s32.totalorder %v8205_v44, %v8232_v20 }
 0x478   : > { %v8236_v41 = vpop.permute.xlu1 %4814 }
 0x479   : > { %vm4841_vm14 = vcmp.eq.s32.totalorder %v8205_v44, %v8236_v41 }
 0x47c   : > { %v8242_v12 = vpop.permute.xlu1 %4820 }
 0x47d   : > { %vm4843_vm15 = vcmp.eq.s32.totalorder %v8205_v44, %v8242_v12 }
 0x490   : > { %4867 = vadd.xlane.f32.xlu0 %v4866_v37 }
 0x492   : > { %4864 = vadd.xlane.f32.xlu1 %v4863_v48 }
 0x494   : > { %4870 = vadd.xlane.f32.xlu0 %v4869_v60 }
 0x498   : > { %4873 = vadd.xlane.f32.xlu0 %v4872_v7 }
 0x49c   : > { %4876 = vadd.xlane.f32.xlu0 %v4875_v53 }
 0x4a8   : > { %v8238_v57 = vpop.xlane.xlu0 %4574 }
 0x4a9   : > { %v4621_v50 = vsub.f32 %v8075_v31, %v8238_v57 }
 0x4ab   : > { %v4637_v11 = vmul.f32 1.442695, %v4621_v50 }
 0x4ac   : > { %v8244_v6 = vpop.xlane.xlu0 %4577 }
 0x4ad   : > { %6515 = vpow2.f32 %v4637_v11  ;;  %v4622_v27 = vsub.f32 %v8081_v45, %v8244_v6 }
 0x4af   : > { %v4639_v34 = vmul.f32 1.442695, %v4622_v27 }
 0x4b0   : > { %v8248_v24 = vpop.xlane.xlu1 %4580 }
 0x4b1   : > { %6517 = vpow2.f32 %v4639_v34  ;;  %v4623_v35 = vsub.f32 %v8091_v19, %v8248_v24 }
 0x4b3   : > { %v4641_v59 = vmul.f32 1.442695, %v4623_v35 }
 0x4b4   : > { %v8252_v32 = vpop.xlane.xlu1 %4583 }
 0x4b5   : > { %6519 = vpow2.f32 %v4641_v59  ;;  %v4624_v31 = vsub.f32 %v8097_v1, %v8252_v32 }
 0x4b7   : > { %v6516_v22 = vpop.eup %6515  ;;  %v4643_v15 = vmul.f32 1.442695, %v4624_v31 }
 0x4b8   : > { %v4669_v51 = vsel %vm4556_vm6, %v6516_v22, 0.0 }
 0x4b9   : > { %6521 = vpow2.f32 %v4643_v15  ;;  %4670 = vadd.xlane.f32.xlu1 %v4669_v51  ;;  %v8257_v13 = vpop.xlane.xlu0 %4586 }
 0x4ba   : > { %v4625_v54 = vsub.f32 %v8108_v40, %v8257_v13 }
 0x4bb   : > { %v6518_v45 = vpop.eup %6517  ;;  %v8262_v8 = vpop.xlane.xlu1 %4589 }
 0x4bc   : > { %v4672_v19 = vsel %vm4556_vm6, %v6518_v45, 0.0  ;;  %v4645_v42 = vmul.f32 1.442695, %v4625_v54  ;;  %v4626_v1 = vsub.f32 %v8113_v39, %v8262_v8 }
 0x4bd   : > { %4673 = vadd.xlane.f32.xlu0 %v4672_v19  ;;  %v4852_v19 = vsel %vm4836_vm1, %v8113_v39, 0.0  ;;  %v4853_v39 = vsel %vm4837_vm5, %v8123_v3, 0.0 }
 0x4be   : > { %6523 = vpow2.f32 %v4645_v42  ;;  %v4647_v5 = vmul.f32 1.442695, %v4626_v1 }
 0x4bf   : > { %v6520_v4 = vpop.eup %6519 }
 0x4c0   : > { %v4675_v21 = vsel %vm4556_vm6, %v6520_v4, 0.0  ;;  %6525 = vpow2.f32 %v4647_v5  ;;  %v4878_v5 = vsel %vm4556_vm6, %v4852_v19, 0.0  ;;  %v4860_v19 = vsel %vm4844_vm9, %v8177_v17, 0.0 }
 0x4c1   : > { %4676 = vadd.xlane.f32.xlu0 %v4675_v21 }
 0x4c3   : > { %v6522_v0 = vpop.eup %6521  ;;  %v8268_v40 = vpop.xlane.xlu0 %4592 }
 0x4c4   : > { %v4678_v29 = vsel %vm4556_vm6, %v6522_v0, 0.0  ;;  %v4627_v30 = vsub.f32 %v8123_v3, %v8268_v40 }
 0x4c5   : > { %4679 = vadd.xlane.f32.xlu1 %v4678_v29  ;;  %v8272_v33 = vpop.xlane.xlu1 %4595 }
 0x4c6   : > { %v4649_v61 = vmul.f32 1.442695, %v4627_v30  ;;  %v4628_v55 = vsub.f32 %v8129_v16, %v8272_v33  ;;  %v4881_v30 = vsel %vm4556_vm6, %v4853_v39, 0.0 }
 0x4c8   : > { %v6524_v18 = vpop.eup %6523  ;;  %6527 = vpow2.f32 %v4649_v61  ;;  %v4651_v26 = vmul.f32 1.442695, %v4628_v55  ;;  %v4854_v55 = vsel %vm4838_vm11, %v8129_v16, 0.0 }
 0x4c9   : > { %v4681_v52 = vsel %vm4556_vm6, %v6524_v18, 0.0 }
 0x4ca   : > { %v6526_v49 = vpop.eup %6525  ;;  %6529 = vpow2.f32 %v4651_v26  ;;  %4682 = vadd.xlane.f32.xlu0 %v4681_v52  ;;  %v4884_v52 = vsel %vm4556_vm6, %v4854_v55, 0.0 }
 0x4cb   : > { %v4684_v37 = vsel %vm4556_vm6, %v6526_v49, 0.0 }
 0x4cc   : > { %4685 = vadd.xlane.f32.xlu1 %v4684_v37 }
 0x4cd   : > { %v8278_v63 = vpop.xlane.xlu0 %4598 }
 0x4ce   : > { %v4629_v48 = vsub.f32 %v8139_v2, %v8278_v63 }
 0x4cf   : > { %v8282_v60 = vpop.xlane.xlu1 %4601 }
 0x4d0   : > { %v4653_v58 = vmul.f32 1.442695, %v4629_v48  ;;  %v4630_v7 = vsub.f32 %v8145_v25, %v8282_v60  ;;  %v4855_v48 = vsel %vm4839_vm12, %v8139_v2, 0.0 }
 0x4d2   : > { %6531 = vpow2.f32 %v4653_v58  ;;  %v4655_v28 = vmul.f32 1.442695, %v4630_v7  ;;  %v6528_v53 = vpop.eup %6527  ;;  %v4887_v58 = vsel %vm4556_vm6, %v4855_v48, 0.0 }
 0x4d3   : > { %v4687_v50 = vsel %vm4556_vm6, %v6528_v53, 0.0 }
 0x4d4   : > { %6533 = vpow2.f32 %v4655_v28  ;;  %v6530_v11 = vpop.eup %6529  ;;  %4688 = vadd.xlane.f32.xlu0 %v4687_v50  ;;  %v4857_v28 = vsel %vm4841_vm14, %v8155_v46, 0.0 }
 0x4d5   : > { %v4690_v34 = vsel %vm4556_vm6, %v6530_v11, 0.0  ;;  %v4893_v41 = vsel %vm4556_vm6, %v4857_v28, 0.0  ;;  %v4859_v11 = vsel %vm4843_vm15, %v8171_v9, 0.0 }
 0x4d6   : > { %4691 = vadd.xlane.f32.xlu1 %v4690_v34 }
 0x4d7   : > { %v8287_v27 = vpop.xlane.xlu0 %4604 }
 0x4d8   : > { %v4631_v35 = vsub.f32 %v8155_v46, %v8287_v27  ;;  %v4899_v46 = vsel %vm4556_vm6, %v4859_v11, 0.0 }
 0x4d9   : > { %v8292_v59 = vpop.xlane.xlu1 %4607 }
 0x4da   : > { %v4657_v31 = vmul.f32 1.442695, %v4631_v35  ;;  %v4632_v22 = vsub.f32 %v8161_v36, %v8292_v59 }
 0x4dc   : > { %6535 = vpow2.f32 %v4657_v31  ;;  %v4659_v15 = vmul.f32 1.442695, %v4632_v22  ;;  %v6532_v51 = vpop.eup %6531 }
 0x4dd   : > { %v4693_v45 = vsel %vm4556_vm6, %v6532_v51, 0.0  ;;  %v4856_v51 = vsel %vm4840_vm3, %v8145_v25, 0.0  ;;  %v4902_v25 = vsel %vm4556_vm6, %v4860_v19, 0.0 }
 0x4de   : > { %6537 = vpow2.f32 %v4659_v15  ;;  %v6534_v54 = vpop.eup %6533  ;;  %4694 = vadd.xlane.f32.xlu0 %v4693_v45  ;;  %v4858_v45 = vsel %vm4842_vm13, %v8161_v36, 0.0 }
 0x4df   : > { %v4696_v1 = vsel %vm4556_vm6, %v6534_v54, 0.0  ;;  %v4896_v54 = vsel %vm4556_vm6, %v4858_v45, 0.0 }
 0x4e0   : > { %v8302_v42 = vpop.xlane.xlu0 %4610  ;;  %4697 = vadd.xlane.f32.xlu1 %v4696_v1 }
 0x4e1   : > { %v4633_v10 = vsub.f32 %v8171_v9, %v8302_v42 }
 0x4e2   : > { %v8307_v4 = vpop.xlane.xlu1 %4613  ;;  %4879 = vadd.xlane.f32.xlu0 %v4878_v5 }
 0x4e3   : > { %v4661_v21 = vmul.f32 1.442695, %v4633_v10  ;;  %v4634_v0 = vsub.f32 %v8177_v17, %v8307_v4 }
 0x4e5   : > { %6539 = vpow2.f32 %v4661_v21  ;;  %v4663_v56 = vmul.f32 1.442695, %v4634_v0 }
 0x4e6   : > { %v6536_v29 = vpop.eup %6535  ;;  %4882 = vadd.xlane.f32.xlu0 %v4881_v30 }
 0x4e7   : > { %6541 = vpow2.f32 %v4663_v56  ;;  %v4699_v61 = vsel %vm4556_vm6, %v6536_v29, 0.0 }
 0x4e8   : > { %v6538_v18 = vpop.eup %6537  ;;  %v8320_v26 = vpop.xlane.xlu0 %4616  ;;  %4700 = vadd.xlane.f32.xlu1 %v4699_v61 }
 0x4e9   : > { %v4635_v3 = vsub.f32 %v8187_v47, %v8320_v26  ;;  %v4702_v16 = vsel %vm4556_vm6, %v6538_v18, 0.0 }
 0x4ea   : > { %v8324_v14 = vpop.xlane.xlu1 %4619  ;;  %4885 = vadd.xlane.f32.xlu0 %v4884_v52 }
 0x4eb   : > { %v4665_v49 = vmul.f32 1.442695, %v4635_v3  ;;  %v4636_v37 = vsub.f32 %v8193_v38, %v8324_v14 }
 0x4ec   : > { %4703 = vadd.xlane.f32.xlu1 %v4702_v16 }
 0x4ed   : > { %6543 = vpow2.f32 %v4665_v49  ;;  %v4667_v20 = vmul.f32 1.442695, %v4636_v37 }
 0x4ee   : > { %4888 = vadd.xlane.f32.xlu0 %v4887_v58  ;;  %v4827_v2 = vpop.permute.xlu1 %4826 }
 0x4ef   : > { %v6540_v7 = vpop.eup %6539  ;;  %6545 = vpow2.f32 %v4667_v20  ;;  %vm4845_vm2 = vcmp.eq.s32.totalorder %v8205_v44, %v4827_v2 }
 0x4f0   : > { %v4705_v53 = vsel %vm4556_vm6, %v6540_v7, 0.0  ;;  %v4861_v12 = vsel %vm4845_vm2, %v8187_v47, 0.0  ;;  %v4890_v47 = vsel %vm4556_vm6, %v4856_v51, 0.0  ;;  %v4830_v23 = vpop.permute.xlu0 %4829 }
 0x4f1   : > { %v6542_v50 = vpop.eup %6541  ;;  %4706 = vadd.xlane.f32.xlu1 %v4705_v53  ;;  %v4905_v9 = vsel %vm4556_vm6, %v4861_v12, 0.0  ;;  %vm4846_vm7 = vcmp.eq.s32.totalorder %v8205_v44, %v4830_v23 }
 0x4f2   : > { %4894 = vadd.xlane.f32.xlu0 %v4893_v41  ;;  %v4708_v34 = vsel %vm4556_vm6, %v6542_v50, 0.0  ;;  %v4862_v43 = vsel %vm4846_vm7, %v8193_v38, 0.0 }
 0x4f3   : > { %v4908_v1 = vsel %vm4556_vm6, %v4862_v43, 0.0 }
 0x4f5   : > { %4709 = vadd.xlane.f32.xlu1 %v4708_v34 }
 0x4f6   : > { %4900 = vadd.xlane.f32.xlu0 %v4899_v46 }
 0x4f7   : > { %v6544_v35 = vpop.eup %6543 }
 0x4f8   : > { %v4711_v31 = vsel %vm4556_vm6, %v6544_v35, 0.0 }
 0x4f9   : > { %v6546_v22 = vpop.eup %6545  ;;  %4712 = vadd.xlane.f32.xlu1 %v4711_v31 }
 0x4fa   : > { %4906 = vadd.xlane.f32.xlu0 %v4905_v9  ;;  %v4714_v15 = vsel %vm4556_vm6, %v6546_v22, 0.0  ;;  %vm4927_vm6 = vcmask 7168  }
 0x4fd   : > { %4715 = vadd.xlane.f32.xlu1 %v4714_v15 }
 0x501   : > { %4891 = vadd.xlane.f32.xlu1 %v4890_v47 }
 0x505   : > { %4897 = vadd.xlane.f32.xlu1 %v4896_v54 }
 0x509   : > { %4903 = vadd.xlane.f32.xlu1 %v4902_v25 }
 0x50d   : > { %4909 = vadd.xlane.f32.xlu1 %v4908_v1 }
 0x51d   : > { %v4868_v36 = vpop.xlane.xlu0 %4867 }
 0x51f   : > { %v4865_v0 = vpop.xlane.xlu1 %4864 }
 0x521   : > { %v4871_v10 = vpop.xlane.xlu0 %4870 }
 0x525   : > { %v8362_v5 = vpop.xlane.xlu0 %4873 }
 0x529   : > { %v8364_v62 = vpop.xlane.xlu0 %4876 }
 0x546   : > { %v4671_v17 = vpop.xlane.xlu1 %4670 }
 0x547   : > { %6547 = vlog2.f32 %v4671_v17 }
 0x54a   : > { %v4674_v21 = vpop.xlane.xlu0 %4673 }
 0x54b   : > { %6549 = vlog2.f32 %v4674_v21 }
 0x54e   : > { %v4677_v39 = vpop.xlane.xlu0 %4676 }
 0x54f   : > { %6551 = vlog2.f32 %v4677_v39 }
 0x551   : > { %v6548_v55 = vpop.eup %6547 }
 0x552   : > { %v4680_v44 = vpop.xlane.xlu1 %4679  ;;  %v4718_v48 = vmul.f32 0.6931472, %v6548_v55 }
 0x553   : > { %6553 = vlog2.f32 %v4680_v44 }
 0x554   : > { %v4749_v50 = vadd.f32 %v4718_v48, %v8238_v57 }
 0x555   : > { %v6550_v18 = vpop.eup %6549 }
 0x556   : > { %v4720_v37 = vmul.f32 0.6931472, %v6550_v18  ;;  %v4911_v22 = vsub.f32 %v4749_v50, %v4865_v0 }
 0x557   : > { %v4683_v56 = vpop.xlane.xlu0 %4682 }
 0x558   : > { %6555 = vlog2.f32 %v4683_v56  ;;  %v4750_v28 = vadd.f32 %v4720_v37, %v8244_v6  ;;  %v4928_v19 = vsel %vm4927_vm6, %v4911_v22, 0.0 }
 0x559   : > { %v4686_v38 = vpop.xlane.xlu1 %4685  ;;  %v6552_v3 = vpop.eup %6551 }
 0x55a   : > { %6557 = vlog2.f32 %v4686_v38  ;;  %v4722_v20 = vmul.f32 0.6931472, %v6552_v3  ;;  %v4912_v12 = vsub.f32 %v4750_v28, %v4868_v36 }
 0x55c   : > { %v4751_v2 = vadd.f32 %v4722_v20, %v8248_v24  ;;  %v4929_v23 = vsel %vm4927_vm6, %v4912_v12, 0.0 }
 0x55d   : > { %v6554_v16 = vpop.eup %6553 }
 0x55e   : > { %v4724_v53 = vmul.f32 0.6931472, %v6554_v16  ;;  %v4913_v9 = vsub.f32 %v4751_v2, %v4871_v10  ;;  %v4930_v10 = vadd.f32 %v4929_v23, %v4928_v19 }
 0x560   : > { %v4752_v31 = vadd.f32 %v4724_v53, %v8252_v32  ;;  %v4931_v32 = vsel %vm4927_vm6, %v4913_v9, 0.0 }
 0x561   : > { %v4689_v29 = vpop.xlane.xlu0 %4688  ;;  %v4932_v17 = vadd.f32 %v4931_v32, %v4930_v10 }
 0x562   : > { %6559 = vlog2.f32 %v4689_v29  ;;  %v6556_v58 = vpop.eup %6555  ;;  %v4914_v54 = vsub.f32 %v4752_v31, %v8362_v5 }
 0x563   : > { %v4692_v61 = vpop.xlane.xlu1 %4691  ;;  %v4726_v41 = vmul.f32 0.6931472, %v6556_v58 }
 0x564   : > { %6561 = vlog2.f32 %v4692_v61  ;;  %v6558_v34 = vpop.eup %6557  ;;  %v4933_v0 = vsel %vm4927_vm6, %v4914_v54, 0.0 }
 0x565   : > { %v4753_v15 = vadd.f32 %v4726_v41, %v8257_v13  ;;  %v4728_v51 = vmul.f32 0.6931472, %v6558_v34 }
 0x567   : > { %v4915_v25 = vsub.f32 %v4753_v15, %v8364_v62  ;;  %v4754_v1 = vadd.f32 %v4728_v51, %v8262_v8  ;;  %v4934_v8 = vadd.f32 %v4933_v0, %v4932_v17 }
 0x569   : > { %v4935_v44 = vsel %vm4927_vm6, %v4915_v25, 0.0 }
 0x56a   : > { %v4936_v3 = vadd.f32 %v4935_v44, %v4934_v8 }
 0x56b   : > { %v4695_v30 = vpop.xlane.xlu0 %4694 }
 0x56c   : > { %6563 = vlog2.f32 %v4695_v30  ;;  %v6560_v35 = vpop.eup %6559 }
 0x56d   : > { %v4698_v52 = vpop.xlane.xlu1 %4697  ;;  %v4730_v57 = vmul.f32 0.6931472, %v6560_v35 }
 0x56e   : > { %v6562_v6 = vpop.eup %6561 }
 0x56f   : > { %v4880_v49 = vpop.xlane.xlu0 %4879  ;;  %v4732_v13 = vmul.f32 0.6931472, %v6562_v6  ;;  %v4755_v36 = vadd.f32 %v4730_v57, %v8268_v40 }
 0x570   : > { %v4916_v39 = vsub.f32 %v4754_v1, %v4880_v49 }
 0x571   : > { %v4756_v62 = vadd.f32 %v4732_v13, %v8272_v33 }
 0x572   : > { %v4937_v40 = vsel %vm4927_vm6, %v4916_v39, 0.0 }
 0x573   : > { %v4883_v11 = vpop.xlane.xlu0 %4882  ;;  %v4938_v20 = vadd.f32 %v4937_v40, %v4936_v3 }
 0x574   : > { %v4917_v29 = vsub.f32 %v4755_v36, %v4883_v11 }
 0x575   : > { %v4701_v7 = vpop.xlane.xlu1 %4700 }
 0x576   : > { %6565 = vlog2.f32 %v4701_v7  ;;  %v6564_v47 = vpop.eup %6563  ;;  %v4939_v37 = vsel %vm4927_vm6, %v4917_v29, 0.0 }
 0x577   : > { %6567 = vlog2.f32 %v4698_v52  ;;  %v4886_v24 = vpop.xlane.xlu0 %4885  ;;  %v4734_v43 = vmul.f32 0.6931472, %v6564_v47  ;;  %v4940_v53 = vadd.f32 %v4939_v37, %v4938_v20 }
 0x578   : > { %v4918_v18 = vsub.f32 %v4756_v62, %v4886_v24 }
 0x579   : > { %v4704_v46 = vpop.xlane.xlu1 %4703  ;;  %v4757_v38 = vadd.f32 %v4734_v43, %v8278_v63 }
 0x57a   : > { %v4941_v63 = vsel %vm4927_vm6, %v4918_v18, 0.0  ;;  %v4971_v18 = vld [vmem:[#allocation8] sm:$0x1] }
 0x57b   : > { %v4889_v56 = vpop.xlane.xlu0 %4888  ;;  %v4942_v34 = vadd.f32 %v4941_v63, %v4940_v53 }
 0x57c   : > { %v4919_v16 = vsub.f32 %v4757_v38, %v4889_v56 }
 0x57e   : > { %v4707_v45 = vpop.xlane.xlu1 %4706  ;;  %v4943_v2 = vsel %vm4927_vm6, %v4919_v16, 0.0 }
 0x57f   : > { %6569 = vlog2.f32 %v4707_v45  ;;  %v4895_v58 = vpop.xlane.xlu0 %4894  ;;  %v4944_v22 = vadd.f32 %v4943_v2, %v4942_v34 }
 0x580   : > { %6571 = vlog2.f32 %v4704_v46  ;;  %v6566_v5 = vpop.eup %6565 }
 0x581   : > { %v6568_v30 = vpop.eup %6567  ;;  %v4738_v55 = vmul.f32 0.6931472, %v6566_v5 }
 0x582   : > { %v4710_v21 = vpop.xlane.xlu1 %4709  ;;  %v4736_v49 = vmul.f32 0.6931472, %v6568_v30 }
 0x583   : > { %6573 = vlog2.f32 %v4710_v21  ;;  %v4759_v28 = vadd.f32 %v4738_v55, %v8287_v27  ;;  %v4901_v9 = vpop.xlane.xlu0 %4900 }
 0x584   : > { %v4758_v41 = vadd.f32 %v4736_v49, %v8282_v60 }
 0x585   : > { %v4921_v35 = vsub.f32 %v4759_v28, %v4895_v58 }
 0x586   : > { %v4713_v61 = vpop.xlane.xlu1 %4712 }
 0x587   : > { %6575 = vlog2.f32 %v4713_v61  ;;  %v4947_v60 = vsel %vm4927_vm6, %v4921_v35, 0.0  ;;  %v4907_v43 = vpop.xlane.xlu0 %4906 }
 0x589   : > { %v6570_v52 = vpop.eup %6569 }
 0x58a   : > { %v6572_v48 = vpop.eup %6571  ;;  %v4716_v33 = vpop.xlane.xlu1 %4715  ;;  %v4742_v7 = vmul.f32 0.6931472, %v6570_v52 }
 0x58b   : > { %6577 = vlog2.f32 %v4716_v33  ;;  %v4740_v50 = vmul.f32 0.6931472, %v6572_v48 }
 0x58c   : > { %v4761_v12 = vadd.f32 %v4742_v7, %v8302_v42 }
 0x58d   : > { %v6574_v11 = vpop.eup %6573  ;;  %v4760_v51 = vadd.f32 %v4740_v50, %v8292_v59 }
 0x58e   : > { %v4892_v46 = vpop.xlane.xlu1 %4891  ;;  %v4744_v6 = vmul.f32 0.6931472, %v6574_v11  ;;  %v4923_v45 = vsub.f32 %v4761_v12, %v4901_v9 }
 0x58f   : > { %v4920_v31 = vsub.f32 %v4758_v41, %v4892_v46 }
 0x590   : > { %v4762_v25 = vadd.f32 %v4744_v6, %v8307_v4  ;;  %v4951_v59 = vsel %vm4927_vm6, %v4923_v45, 0.0 }
 0x591   : > { %v6576_v15 = vpop.eup %6575  ;;  %v4945_v27 = vsel %vm4927_vm6, %v4920_v31, 0.0 }
 0x592   : > { %v4746_v57 = vmul.f32 0.6931472, %v6576_v15  ;;  %v4946_v47 = vadd.f32 %v4945_v27, %v4944_v22  ;;  %v4898_v24 = vpop.xlane.xlu1 %4897 }
 0x593   : > { %v4922_v23 = vsub.f32 %v4760_v51, %v4898_v24 }
 0x594   : > { %v4763_v54 = vadd.f32 %v4746_v57, %v8320_v26  ;;  %v4948_v19 = vadd.f32 %v4947_v60, %v4946_v47 }
 0x595   : > { %v6578_v42 = vpop.eup %6577  ;;  %v4949_v32 = vsel %vm4927_vm6, %v4922_v23, 0.0 }
 0x596   : > { %v4748_v13 = vmul.f32 0.6931472, %v6578_v42  ;;  %v4950_v1 = vadd.f32 %v4949_v32, %v4948_v19  ;;  %v4904_v36 = vpop.xlane.xlu1 %4903  ;;  %v4925_v10 = vsub.f32 %v4763_v54, %v4907_v43 }
 0x597   : > { %v4924_v21 = vsub.f32 %v4762_v25, %v4904_v36 }
 0x598   : > { %v4952_v0 = vadd.f32 %v4951_v59, %v4950_v1  ;;  %v4764_v39 = vadd.f32 %v4748_v13, %v8324_v14  ;;  %v4955_v56 = vsel %vm4927_vm6, %v4925_v10, 0.0 }
 0x599   : > { %v4953_v5 = vsel %vm4927_vm6, %v4924_v21, 0.0 }
 0x59a   : > { %v4954_v26 = vadd.f32 %v4953_v5, %v4952_v0  ;;  %v4910_v17 = vpop.xlane.xlu1 %4909 }
 0x59b   : > { %v4926_v44 = vsub.f32 %v4764_v39, %v4910_v17 }
 0x59c   : > { %v4956_v29 = vadd.f32 %v4955_v56, %v4954_v26 }
 0x59d   : > { %v4957_v4 = vsel %vm4927_vm6, %v4926_v44, 0.0 }
 0x59e   : > { %v4958_v62 = vadd.f32 %v4957_v4, %v4956_v29 }
 0x5a0   : > { %4959 = vadd.xlane.f32.xlu0 %v4958_v62 }
 0x62d   : > { %v4960_v38 = vpop.xlane.xlu0 %4959 }
 0x62e   : > { %v4961_v30 = vrot.slane %v4960_v38, 4 }
 0x630   : > { %v4962_v8 = vadd.f32 %v4961_v30, %v4960_v38 }
 0x632   : > { %v4963_v61 = vrot.slane %v4962_v8, 2 }
 0x634   : > { %v4964_v40 = vadd.f32 %v4963_v61, %v4962_v8 }
 0x636   : > { %v4965_v55 = vrot.slane %v4964_v40, 1 }
 0x638   : > { %v4966_v14 = vadd.f32 %v4965_v55, %v4964_v40 }
 0x63a   : > { %5926 = vpush %v4966_v14 }
 0x66b   : > { %s5927_s12 = spop %5926 }
 0x66c   : > { %s4970_s14 = smul.f32 0.0078125, %s5927_s12 }
 0x66e   : > { %s4974_s29 = smul.f32 0.5, %s4970_s14 }
 0x670   : > { %v4975_v3 = vstv %s4974_s29 }
 0x671   : > { %v4976_v52 = vadd.f32 %v4975_v3, %v4971_v18 }
 0x673   : > { %4978 = vst.msk [vmem:[#allocation8] sm:$0x1] %vm4977_vm4, %v4976_v52 }
 0x674   : > { %6678 = shalt.err (!%p6675_p2)
}
 0x675   : > { %s6679_s20 = scalar_lea.hbm %s8444_s8, 16 }
 0x676   : > { %p6680_p11 = scmp.ne.s32.totalorder %s8444_s8, %s6679_s20  ;;  %p6685_p6 = scmp.lt.u32.totalorder %s6679_s20, %s8444_s8 }
 0x678   : > { %p6681_p13 = pnand %p6680_p11, %p5958_p9 }
 0x67a   : > { %p6682_p3 = pneg %p6681_p13 }
 0x67c   : > { %p6687_p7 = pnand %p6685_p6, %p6682_p3 }
 0x67e   : > { %6690 = shalt.err (!%p6687_p7)
}
 0x67f   : > { %5939 = dma.vmem_to_hbm [thread:$0]  (%p5958_p9), %s4992_s28, 16, %s8444_s8, [#allocation4]  }
 0x680   : > { %6716 = dma.done.wait (%p5958_p9), [#allocation4], 16  }
 0x681   : > { %6718 = vsyncadd (%p5958_p9), [#allocation4], 4294967280 }
 0x682 PF: > { %p22_p10 = scmp.ge.s32.totalorder %s6889_s19, 4   ;;  %s8517_s30 = smov %s6725_s10 }
 0x683   : > { %s8518_s10 = smov %s6729_s11  ;;  %s8519_s11 = smov %s6900_s23 }
 0x684   : > { %s8520_s12 = smov %s6889_s19  ;;  %24 = sbr.rel (!%p22_p10) target bundleno = 5 (0x5), region = 116 }
 0x68b   :  { %5016 = vsyncpa [#allocation3], 1 }
 0x68c   :  { %5018 = vsyncpa [#allocation3 + $0x1], 1 }
 0x68d   :  { %5019 = vsyncpa [#allocation6], 1 }
 0x68e   :  { %5020 = vsyncpa [#allocation4], 1 }
 0x68f   :  { %5022 = vsyncpa [#allocation4 + $0x1], 1 }

</bundles_post_ra>
